<compile_context>
chip_gen: v7x
topology: tpu7x:2x2x1
jax: 0.10.0
libtpu: 0.0.40
codegen_flags: <defaults>
</compile_context>

<pallas_src>
import functools

import jax
import jax.numpy as jnp
from jax.experimental import pallas as pl
from jax.experimental.pallas import tpu as pltpu


# ---------------------------------------------------------------------------
# Wrapper-side layout plumbing (XLA): im2col + weight re-layouts.
# ---------------------------------------------------------------------------
def _im2col_3x3(x):
    """x: (B, H, W, C) -> (B, H*W, 9*C), tap order (ky, kx) outer, c inner."""
    B, H, W, C = x.shape
    xp = jnp.pad(x, ((0, 0), (1, 1), (1, 1), (0, 0)))
    taps = [xp[:, ky:ky + H, kx:kx + W, :] for ky in range(3) for kx in range(3)]
    return jnp.concatenate(taps, axis=-1).reshape(B, H * W, 9 * C)


def _fc_transposed(fc_w, fc_b, Ci):
    """Permute FC columns so the FC output is flat F^T (index c*Ci + o)."""
    w_t = jnp.transpose(fc_w.reshape(2 * Ci, Ci, Ci), (0, 2, 1)).reshape(2 * Ci, Ci * Ci)
    b_t = fc_b.reshape(Ci, Ci).T.reshape(1, Ci * Ci).astype(jnp.float32)
    return (w_t[:Ci].astype(jnp.bfloat16),     # content-mean rows
            w_t[Ci:].astype(jnp.bfloat16),     # style-mean rows
            b_t)


def _const_spec(arr):
    zeros = (0,) * arr.ndim
    return pl.BlockSpec(arr.shape, lambda *_: zeros)


# ---------------------------------------------------------------------------
# Kernel A: fused down conv (im2col matmul) + predictor means + FC filters.
# One grid step per batch element.
# ---------------------------------------------------------------------------
def _down_predict_kernel(ccol_ref, scol_ref, wd_ref, bd_ref, wp_ref, bp_ref,
                         f1wc_ref, f1ws_ref, f1b_ref,
                         f2wc_ref, f2ws_ref, f2b_ref,
                         x_ref, filt1_ref, filt2_ref, *, ci):
    bf16 = jnp.bfloat16
    hw = ccol_ref.shape[1]
    inv_hw = 1.0 / hw

    ccol = ccol_ref[0]                               # (HW, 9*Cv) bf16
    scol = scol_ref[0]                               # (HW, 9*Cv) bf16

    # main down-sample conv: single MXU matmul, f32 accumulate, bias epilogue
    x = jnp.dot(ccol, wd_ref[...], preferred_element_type=jnp.float32) + bd_ref[...]
    x_ref[...] = x.astype(x_ref.dtype)[None]

    # FilterPredictor branch, spatial mean fused into the conv:
    #   mean_p(conv3x3(act)) == mean_p(im2col(act)) @ W_pred
    cmean = jnp.sum(ccol.astype(jnp.float32), axis=0, keepdims=True) * inv_hw
    smean = jnp.sum(scol.astype(jnp.float32), axis=0, keepdims=True) * inv_hw
    cfeat = jnp.dot(cmean.astype(bf16), wp_ref[...],
                    preferred_element_type=jnp.float32) + bp_ref[...]   # (1, 2*ci)
    sfeat = jnp.dot(smean.astype(bf16), wp_ref[...],
                    preferred_element_type=jnp.float32) + bp_ref[...]   # (1, 2*ci)

    cm1, cm2 = cfeat[:, :ci], cfeat[:, ci:]
    sm1, sm2 = sfeat[:, :ci], sfeat[:, ci:]

    # FC with column-permuted weights -> flat transposed filters F^T
    f1 = (jnp.dot(cm1.astype(bf16), f1wc_ref[...], preferred_element_type=jnp.float32)
          + jnp.dot(sm1.astype(bf16), f1ws_ref[...], preferred_element_type=jnp.float32)
          + f1b_ref[...])                            # (1, ci*ci)
    f2 = (jnp.dot(cm2.astype(bf16), f2wc_ref[...], preferred_element_type=jnp.float32)
          + jnp.dot(sm2.astype(bf16), f2ws_ref[...], preferred_element_type=jnp.float32)
          + f2b_ref[...])
    filt1_ref[...] = f1[None]
    filt2_ref[...] = f2[None]


def _down_predict_call(ccol, scol, w_down, b_down, w_pred, b_pred,
                       f1wc, f1ws, f1b, f2wc, f2ws, f2b, *, Ci):
    B, HW, K9 = ccol.shape
    kern = functools.partial(_down_predict_kernel, ci=Ci)
    per_b = lambda shape: pl.BlockSpec(shape, lambda b: (b, 0, 0))
    return pl.pallas_call(
        kern,
        out_shape=(
            jax.ShapeDtypeStruct((B, HW, Ci), jnp.bfloat16),
            jax.ShapeDtypeStruct((B, 1, Ci * Ci), jnp.float32),
            jax.ShapeDtypeStruct((B, 1, Ci * Ci), jnp.float32),
        ),
        grid=(B,),
        in_specs=[
            per_b((1, HW, K9)),            # content im2col
            per_b((1, HW, K9)),            # style im2col
            _const_spec(w_down), _const_spec(b_down),
            _const_spec(w_pred), _const_spec(b_pred),
            _const_spec(f1wc), _const_spec(f1ws), _const_spec(f1b),
            _const_spec(f2wc), _const_spec(f2ws), _const_spec(f2b),
        ],
        out_specs=(
            per_b((1, HW, Ci)),
            per_b((1, 1, Ci * Ci)),
            per_b((1, 1, Ci * Ci)),
        ),
        compiler_params=pltpu.CompilerParams(dimension_semantics=("parallel",)),
    )(ccol, scol, w_down, b_down, w_pred, b_pred,
      f1wc, f1ws, f1b, f2wc, f2ws, f2b)


# ---------------------------------------------------------------------------
# Kernel B: fused apply_filter(F1) + LeakyReLU(0.2) + apply_filter(F2).
# Filters arrive pre-transposed, so both matmuls are plain (HW,C)x(C,C) dots.
# ---------------------------------------------------------------------------
def _apply_chain_kernel(x_ref, f1_ref, f2_ref, o_ref, *, slope):
    x = x_ref[0]                                     # (HW, Ci) bf16
    f1 = f1_ref[0].astype(jnp.bfloat16)              # (Ci, Ci)  F1^T
    f2 = f2_ref[0].astype(jnp.bfloat16)              # (Ci, Ci)  F2^T
    y = jnp.dot(x, f1, preferred_element_type=jnp.float32)
    y = jnp.where(y >= 0.0, y, slope * y)            # LeakyReLU in f32
    y = jnp.dot(y.astype(jnp.bfloat16), f2, preferred_element_type=jnp.float32)
    o_ref[...] = y.astype(o_ref.dtype)[None]


def _apply_chain_call(x, filt1, filt2, *, slope):
    B, HW, Ci = x.shape
    kern = functools.partial(_apply_chain_kernel, slope=slope)
    return pl.pallas_call(
        kern,
        out_shape=jax.ShapeDtypeStruct((B, HW, Ci), jnp.bfloat16),
        grid=(B,),
        in_specs=[
            pl.BlockSpec((1, HW, Ci), lambda b: (b, 0, 0)),
            pl.BlockSpec((1, Ci, Ci), lambda b: (b, 0, 0)),
            pl.BlockSpec((1, Ci, Ci), lambda b: (b, 0, 0)),
        ],
        out_specs=pl.BlockSpec((1, HW, Ci), lambda b: (b, 0, 0)),
        compiler_params=pltpu.CompilerParams(dimension_semantics=("parallel",)),
    )(x, filt1, filt2)


# ---------------------------------------------------------------------------
# Kernel C: upsample 3x3 conv (im2col matmul) + bias + residual epilogue.
# Output last dim = Cv = 128 -> lane-dense stores.
# ---------------------------------------------------------------------------
def _up_conv_kernel(ycol_ref, w_ref, b_ref, res_ref, o_ref):
    y = jnp.dot(ycol_ref[0], w_ref[...], preferred_element_type=jnp.float32)
    o_ref[...] = (y + b_ref[...] + res_ref[0]).astype(o_ref.dtype)[None]


def _up_conv_call(ycol, w_up, b_up, res):
    B, HW, K9 = ycol.shape
    Cv = w_up.shape[-1]
    return pl.pallas_call(
        _up_conv_kernel,
        out_shape=jax.ShapeDtypeStruct((B, HW, Cv), jnp.float32),
        grid=(B,),
        in_specs=[
            pl.BlockSpec((1, HW, K9), lambda b: (b, 0, 0)),
            _const_spec(w_up), _const_spec(b_up),
            pl.BlockSpec((1, HW, Cv), lambda b: (b, 0, 0)),
        ],
        out_specs=pl.BlockSpec((1, HW, Cv), lambda b: (b, 0, 0)),
        compiler_params=pltpu.CompilerParams(dimension_semantics=("parallel",)),
    )(ycol, w_up, b_up, res)


# ---------------------------------------------------------------------------
# Full KernelFilter forward (NCHW in / NCHW out).
# ---------------------------------------------------------------------------
def kernel_filter_forward(params, content_nchw, style_nchw):
    content = jnp.transpose(content_nchw, (0, 2, 3, 1)).astype(jnp.float32)
    style = jnp.transpose(style_nchw, (0, 2, 3, 1)).astype(jnp.float32)
    B, H, W, Cv = content.shape
    Ci = params["down_w"].shape[-1]
    HW = H * W

    # layout plumbing (XLA): im2col + weight re-layouts, bf16 MXU operands
    ccol = _im2col_3x3(content).astype(jnp.bfloat16)        # (B, HW, 9*Cv)
    scol = _im2col_3x3(style).astype(jnp.bfloat16)

    w_down = params["down_w"].reshape(9 * Cv, Ci).astype(jnp.bfloat16)
    b_down = params["down_b"].reshape(1, Ci).astype(jnp.float32)
    # shared-input predictor convs fused along Cout: [f1_down | f2_down]
    w_pred = jnp.concatenate([params["f1_down_w"], params["f2_down_w"]],
                             axis=-1).reshape(9 * Cv, 2 * Ci).astype(jnp.bfloat16)
    b_pred = jnp.concatenate([params["f1_down_b"], params["f2_down_b"]]
                             ).reshape(1, 2 * Ci).astype(jnp.float32)

    f1wc, f1ws, f1b = _fc_transposed(params["f1_fc_w"], params["f1_fc_b"], Ci)
    f2wc, f2ws, f2b = _fc_transposed(params["f2_fc_w"], params["f2_fc_b"], Ci)

    # kernel A: down conv + fused spatial means + both FC filter predictions
    x, filt1, filt2 = _down_predict_call(
        ccol, scol, w_down, b_down, w_pred, b_pred,
        f1wc, f1ws, f1b, f2wc, f2ws, f2b, Ci=Ci)
    filt1 = filt1.reshape(B, Ci, Ci)                        # F1^T  [c, o]
    filt2 = filt2.reshape(B, Ci, Ci)                        # F2^T  [c, o]

    # kernel B: apply_filter(F1) + LeakyReLU + apply_filter(F2)
    y = _apply_chain_call(x, filt1, filt2, slope=0.2)       # (B, HW, Ci) bf16

    # kernel C: upsample conv + residual (content + upsample(...))
    ycol = _im2col_3x3(y.reshape(B, H, W, Ci))              # bf16 (B, HW, 9*Ci)
    w_up = params["up_w"].reshape(9 * Ci, Cv).astype(jnp.bfloat16)
    b_up = params["up_b"].reshape(1, Cv).astype(jnp.float32)
    res = content.reshape(B, HW, Cv)
    out = _up_conv_call(ycol, w_up, b_up, res)              # (B, HW, Cv) f32

    return jnp.transpose(out.reshape(B, H, W, Cv), (0, 3, 1, 2))


# ---------------------------------------------------------------------------
# Deterministic parameter init (shapes match the PyTorch module; HWIO weights).
# ---------------------------------------------------------------------------
def init_params(key, Cv, Ci):
    ks = jax.random.split(key, 12)
    n = lambda k, shape, s=0.05: s * jax.random.normal(k, shape, jnp.float32)
    return {
        "down_w": n(ks[0], (3, 3, Cv, Ci)), "down_b": n(ks[1], (Ci,)),
        "up_w": n(ks[2], (3, 3, Ci, Cv)), "up_b": n(ks[3], (Cv,)),
        "f1_down_w": n(ks[4], (3, 3, Cv, Ci)), "f1_down_b": n(ks[5], (Ci,)),
        "f1_fc_w": n(ks[6], (2 * Ci, Ci * Ci)), "f1_fc_b": n(ks[7], (Ci * Ci,)),
        "f2_down_w": n(ks[8], (3, 3, Cv, Ci)), "f2_down_b": n(ks[9], (Ci,)),
        "f2_fc_w": n(ks[10], (2 * Ci, Ci * Ci)), "f2_fc_b": n(ks[11], (Ci * Ci,)),
    }


# ---------------------------------------------------------------------------
# Pure-JAX f32 reference (correctness check only).
# ---------------------------------------------------------------------------
def ref_forward(p, content_nchw, style_nchw):
    P = jax.lax.Precision.HIGHEST
    content = jnp.transpose(content_nchw, (0, 2, 3, 1)).astype(jnp.float32)
    style = jnp.transpose(style_nchw, (0, 2, 3, 1)).astype(jnp.float32)
    B, H, W, Cv = content.shape
    Ci = p["down_w"].shape[-1]

    def conv(x, w, b):
        y = jax.lax.conv_general_dilated(
            x, w, (1, 1), ((1, 1), (1, 1)),
            dimension_numbers=("NHWC", "HWIO", "NHWC"), precision=P)
        return y + b

    def predict(dw, db, fw, fb):
        c = conv(content, dw, db).reshape(B, H * W, Ci).mean(axis=1)
        s = conv(style, dw, db).reshape(B, H * W, Ci).mean(axis=1)
        feat = jnp.concatenate([c, s], axis=1)
        return (jnp.dot(feat, fw, precision=P) + fb).reshape(B, Ci, Ci)

    x = conv(content, p["down_w"], p["down_b"]).reshape(B, H * W, Ci)
    f1 = predict(p["f1_down_w"], p["f1_down_b"], p["f1_fc_w"], p["f1_fc_b"])
    x = jnp.einsum("bpc,boc->bpo", x, f1, precision=P)
    x = jnp.where(x >= 0.0, x, 0.2 * x)
    f2 = predict(p["f2_down_w"], p["f2_down_b"], p["f2_fc_w"], p["f2_fc_b"])
    x = jnp.einsum("bpc,boc->bpo", x, f2, precision=P)
    out = content + conv(x.reshape(B, H, W, Ci), p["up_w"], p["up_b"])
    return jnp.transpose(out, (0, 3, 1, 2))


if __name__ == "__main__":
    # Small shapes consistent with the module: vgg_channel -> 128, inner -> 32.
    B, Cv, Ci, H, W = 2, 128, 32, 8, 8
    key = jax.random.PRNGKey(0)
    kc, ks, kp = jax.random.split(key, 3)
    content = jax.random.normal(kc, (B, Cv, H, W), dtype=jnp.float32)
    style = jax.random.normal(ks, (B, Cv, H, W), dtype=jnp.float32)
    params = init_params(kp, Cv, Ci)

    fwd = jax.jit(kernel_filter_forward)
    out = jax.block_until_ready(fwd(params, content, style))

    ref = jax.block_until_ready(ref_forward(params, content, style))
    assert out.shape == (B, Cv, H, W), out.shape
    # bf16 MXU operands -> slightly looser tolerance than an all-f32 pipeline.
    if not jnp.allclose(out, ref, atol=5e-2, rtol=5e-2):
        err = float(jnp.max(jnp.abs(out - ref)))
        raise AssertionError(f"Pallas output mismatch vs reference, max abs err = {err}")
    print("KERNEL_OK")
</pallas_src>

<mosaic_0001>
module attributes {stable_mosaic.version = 11 : i64} {
  func.func @_down_predict_kernel(%arg0: i32, %arg1: memref<1x64x1152xbf16, #tpu.memory_space<vmem>>, %arg2: memref<1x64x1152xbf16, #tpu.memory_space<vmem>>, %arg3: memref<1152x32xbf16, #tpu.memory_space<vmem>>, %arg4: memref<1x32xf32, #tpu.memory_space<vmem>>, %arg5: memref<1152x64xbf16, #tpu.memory_space<vmem>>, %arg6: memref<1x64xf32, #tpu.memory_space<vmem>>, %arg7: memref<32x1024xbf16, #tpu.memory_space<vmem>>, %arg8: memref<32x1024xbf16, #tpu.memory_space<vmem>>, %arg9: memref<1x1024xf32, #tpu.memory_space<vmem>>, %arg10: memref<32x1024xbf16, #tpu.memory_space<vmem>>, %arg11: memref<32x1024xbf16, #tpu.memory_space<vmem>>, %arg12: memref<1x1024xf32, #tpu.memory_space<vmem>>, %arg13: memref<1x64x32xbf16, #tpu.memory_space<vmem>>, %arg14: memref<1x1x1024xf32, #tpu.memory_space<vmem>>, %arg15: memref<1x1x1024xf32, #tpu.memory_space<vmem>>) attributes {dimension_semantics = [#tpu.dimension_semantics<parallel>], iteration_bounds = array<i64: 2>, scalar_prefetch = 0 : i64, scratch_operands = 0 : i64, tpu.core_type = #tpu.core_type<tc>, window_params = [{transform_indices = @transform_0, window_bounds = array<i64: 1, 64, 1152>}, {transform_indices = @transform_1, window_bounds = array<i64: 1, 64, 1152>}, {pipeline_mode = #tpu.pipeline_mode<synchronous>, transform_indices = @transform_2, window_bounds = array<i64: 1152, 32>}, {pipeline_mode = #tpu.pipeline_mode<synchronous>, transform_indices = @transform_3, window_bounds = array<i64: 1, 32>}, {pipeline_mode = #tpu.pipeline_mode<synchronous>, transform_indices = @transform_4, window_bounds = array<i64: 1152, 64>}, {pipeline_mode = #tpu.pipeline_mode<synchronous>, transform_indices = @transform_5, window_bounds = array<i64: 1, 64>}, {pipeline_mode = #tpu.pipeline_mode<synchronous>, transform_indices = @transform_6, window_bounds = array<i64: 32, 1024>}, {pipeline_mode = #tpu.pipeline_mode<synchronous>, transform_indices = @transform_7, window_bounds = array<i64: 32, 1024>}, {pipeline_mode = #tpu.pipeline_mode<synchronous>, transform_indices = @transform_8, window_bounds = array<i64: 1, 1024>}, {pipeline_mode = #tpu.pipeline_mode<synchronous>, transform_indices = @transform_9, window_bounds = array<i64: 32, 1024>}, {pipeline_mode = #tpu.pipeline_mode<synchronous>, transform_indices = @transform_10, window_bounds = array<i64: 32, 1024>}, {pipeline_mode = #tpu.pipeline_mode<synchronous>, transform_indices = @transform_11, window_bounds = array<i64: 1, 1024>}, {transform_indices = @transform_12, window_bounds = array<i64: 1, 64, 32>}, {transform_indices = @transform_13, window_bounds = array<i64: 1, 1, 1024>}, {transform_indices = @transform_14, window_bounds = array<i64: 1, 1, 1024>}]} {
    %c0 = arith.constant 0 : index
    %c0_0 = arith.constant 0 : index
    %c0_1 = arith.constant 0 : index
    %0 = vector.load %arg1[%c0, %c0_0, %c0_1] : memref<1x64x1152xbf16, #tpu.memory_space<vmem>>, vector<1x64x1152xbf16>
    %1 = vector.shape_cast %0 : vector<1x64x1152xbf16> to vector<64x1152xbf16>
    %c0_2 = arith.constant 0 : index
    %c0_3 = arith.constant 0 : index
    %c0_4 = arith.constant 0 : index
    %2 = vector.load %arg2[%c0_2, %c0_3, %c0_4] : memref<1x64x1152xbf16, #tpu.memory_space<vmem>>, vector<1x64x1152xbf16>
    %3 = vector.shape_cast %2 : vector<1x64x1152xbf16> to vector<64x1152xbf16>
    %c0_5 = arith.constant 0 : index
    %c0_6 = arith.constant 0 : index
    %4 = vector.load %arg3[%c0_5, %c0_6] : memref<1152x32xbf16, #tpu.memory_space<vmem>>, vector<1152x32xbf16>
    %cst = arith.constant dense<0.000000e+00> : vector<64x32xf32>
    %5 = tpu.matmul %1, %4, %cst {dimension_numbers = #tpu.dot_dimension_numbers<[1], [0], [0], [1], [0, 0, 1, 1], [], []>} : vector<64x1152xbf16>, vector<1152x32xbf16>, vector<64x32xf32> -> vector<64x32xf32>
    %c0_7 = arith.constant 0 : index
    %c0_8 = arith.constant 0 : index
    %6 = vector.load %arg4[%c0_7, %c0_8] : memref<1x32xf32, #tpu.memory_space<vmem>>, vector<1x32xf32>
    %7 = vector.broadcast %6 : vector<1x32xf32> to vector<64x32xf32>
    %8 = arith.addf %5, %7 : vector<64x32xf32>
    %9 = arith.truncf %8 : vector<64x32xf32> to vector<64x32xbf16>
    %10 = vector.shape_cast %9 : vector<64x32xbf16> to vector<1x64x32xbf16>
    %c0_9 = arith.constant 0 : index
    %c0_10 = arith.constant 0 : index
    %c0_11 = arith.constant 0 : index
    %11 = vector.load %arg13[%c0_9, %c0_10, %c0_11] : memref<1x64x32xbf16, #tpu.memory_space<vmem>>, vector<1x64x32xbf16>
    tpu.vector_store %arg13[%c0_9, %c0_10, %c0_11], %10 {strides = array<i32>} : memref<1x64x32xbf16, #tpu.memory_space<vmem>>, vector<1x64x32xbf16>,
    %12 = arith.extf %1 : vector<64x1152xbf16> to vector<64x1152xf32>
    %cst_12 = arith.constant dense<0.000000e+00> : vector<1152xf32>
    %13 = vector.multi_reduction <add>, %12, %cst_12 [0] : vector<64x1152xf32> to vector<1152xf32>
    %14 = vector.shape_cast %13 : vector<1152xf32> to vector<1x1152xf32>
    %cst_13 = arith.constant 1.562500e-02 : f32
    %15 = vector.broadcast %cst_13 : f32 to vector<1x1152xf32>
    %16 = arith.mulf %14, %15 : vector<1x1152xf32>
    %17 = arith.extf %3 : vector<64x1152xbf16> to vector<64x1152xf32>
    %cst_14 = arith.constant dense<0.000000e+00> : vector<1152xf32>
    %18 = vector.multi_reduction <add>, %17, %cst_14 [0] : vector<64x1152xf32> to vector<1152xf32>
    %19 = vector.shape_cast %18 : vector<1152xf32> to vector<1x1152xf32>
    %cst_15 = arith.constant 1.562500e-02 : f32
    %20 = vector.broadcast %cst_15 : f32 to vector<1x1152xf32>
    %21 = arith.mulf %19, %20 : vector<1x1152xf32>
    %22 = arith.truncf %16 : vector<1x1152xf32> to vector<1x1152xbf16>
    %c0_16 = arith.constant 0 : index
    %c0_17 = arith.constant 0 : index
    %23 = vector.load %arg5[%c0_16, %c0_17] : memref<1152x64xbf16, #tpu.memory_space<vmem>>, vector<1152x64xbf16>
    %cst_18 = arith.constant dense<0.000000e+00> : vector<1x64xf32>
    %24 = tpu.matmul %22, %23, %cst_18 {dimension_numbers = #tpu.dot_dimension_numbers<[1], [0], [0], [1], [0, 0, 1, 1], [], []>} : vector<1x1152xbf16>, vector<1152x64xbf16>, vector<1x64xf32> -> vector<1x64xf32>
    %c0_19 = arith.constant 0 : index
    %c0_20 = arith.constant 0 : index
    %25 = vector.load %arg6[%c0_19, %c0_20] : memref<1x64xf32, #tpu.memory_space<vmem>>, vector<1x64xf32>
    %26 = arith.addf %24, %25 : vector<1x64xf32>
    %27 = arith.truncf %21 : vector<1x1152xf32> to vector<1x1152xbf16>
    %c0_21 = arith.constant 0 : index
    %c0_22 = arith.constant 0 : index
    %28 = vector.load %arg5[%c0_21, %c0_22] : memref<1152x64xbf16, #tpu.memory_space<vmem>>, vector<1152x64xbf16>
    %cst_23 = arith.constant dense<0.000000e+00> : vector<1x64xf32>
    %29 = tpu.matmul %27, %28, %cst_23 {dimension_numbers = #tpu.dot_dimension_numbers<[1], [0], [0], [1], [0, 0, 1, 1], [], []>} : vector<1x1152xbf16>, vector<1152x64xbf16>, vector<1x64xf32> -> vector<1x64xf32>
    %c0_24 = arith.constant 0 : index
    %c0_25 = arith.constant 0 : index
    %30 = vector.load %arg6[%c0_24, %c0_25] : memref<1x64xf32, #tpu.memory_space<vmem>>, vector<1x64xf32>
    %31 = arith.addf %29, %30 : vector<1x64xf32>
    %32 = vector.extract_strided_slice %26 {offsets = [0, 0], sizes = [1, 32], strides = [1, 1]} : vector<1x64xf32> to vector<1x32xf32>
    %33 = vector.extract_strided_slice %26 {offsets = [0, 32], sizes = [1, 32], strides = [1, 1]} : vector<1x64xf32> to vector<1x32xf32>
    %34 = vector.extract_strided_slice %31 {offsets = [0, 0], sizes = [1, 32], strides = [1, 1]} : vector<1x64xf32> to vector<1x32xf32>
    %35 = vector.extract_strided_slice %31 {offsets = [0, 32], sizes = [1, 32], strides = [1, 1]} : vector<1x64xf32> to vector<1x32xf32>
    %36 = arith.truncf %32 : vector<1x32xf32> to vector<1x32xbf16>
    %c0_26 = arith.constant 0 : index
    %c0_27 = arith.constant 0 : index
    %37 = vector.load %arg7[%c0_26, %c0_27] : memref<32x1024xbf16, #tpu.memory_space<vmem>>, vector<32x1024xbf16>
    %cst_28 = arith.constant dense<0.000000e+00> : vector<1x1024xf32>
    %38 = tpu.matmul %36, %37, %cst_28 {dimension_numbers = #tpu.dot_dimension_numbers<[1], [0], [0], [1], [0, 0, 1, 1], [], []>} : vector<1x32xbf16>, vector<32x1024xbf16>, vector<1x1024xf32> -> vector<1x1024xf32>
    %39 = arith.truncf %34 : vector<1x32xf32> to vector<1x32xbf16>
    %c0_29 = arith.constant 0 : index
    %c0_30 = arith.constant 0 : index
    %40 = vector.load %arg8[%c0_29, %c0_30] : memref<32x1024xbf16, #tpu.memory_space<vmem>>, vector<32x1024xbf16>
    %cst_31 = arith.constant dense<0.000000e+00> : vector<1x1024xf32>
    %41 = tpu.matmul %39, %40, %cst_31 {dimension_numbers = #tpu.dot_dimension_numbers<[1], [0], [0], [1], [0, 0, 1, 1], [], []>} : vector<1x32xbf16>, vector<32x1024xbf16>, vector<1x1024xf32> -> vector<1x1024xf32>
    %42 = arith.addf %38, %41 : vector<1x1024xf32>
    %c0_32 = arith.constant 0 : index
    %c0_33 = arith.constant 0 : index
    %43 = vector.load %arg9[%c0_32, %c0_33] : memref<1x1024xf32, #tpu.memory_space<vmem>>, vector<1x1024xf32>
    %44 = arith.addf %42, %43 : vector<1x1024xf32>
    %45 = arith.truncf %33 : vector<1x32xf32> to vector<1x32xbf16>
    %c0_34 = arith.constant 0 : index
    %c0_35 = arith.constant 0 : index
    %46 = vector.load %arg10[%c0_34, %c0_35] : memref<32x1024xbf16, #tpu.memory_space<vmem>>, vector<32x1024xbf16>
    %cst_36 = arith.constant dense<0.000000e+00> : vector<1x1024xf32>
    %47 = tpu.matmul %45, %46, %cst_36 {dimension_numbers = #tpu.dot_dimension_numbers<[1], [0], [0], [1], [0, 0, 1, 1], [], []>} : vector<1x32xbf16>, vector<32x1024xbf16>, vector<1x1024xf32> -> vector<1x1024xf32>
    %48 = arith.truncf %35 : vector<1x32xf32> to vector<1x32xbf16>
    %c0_37 = arith.constant 0 : index
    %c0_38 = arith.constant 0 : index
    %49 = vector.load %arg11[%c0_37, %c0_38] : memref<32x1024xbf16, #tpu.memory_space<vmem>>, vector<32x1024xbf16>
    %cst_39 = arith.constant dense<0.000000e+00> : vector<1x1024xf32>
    %50 = tpu.matmul %48, %49, %cst_39 {dimension_numbers = #tpu.dot_dimension_numbers<[1], [0], [0], [1], [0, 0, 1, 1], [], []>} : vector<1x32xbf16>, vector<32x1024xbf16>, vector<1x1024xf32> -> vector<1x1024xf32>
    %51 = arith.addf %47, %50 : vector<1x1024xf32>
    %c0_40 = arith.constant 0 : index
    %c0_41 = arith.constant 0 : index
    %52 = vector.load %arg12[%c0_40, %c0_41] : memref<1x1024xf32, #tpu.memory_space<vmem>>, vector<1x1024xf32>
    %53 = arith.addf %51, %52 : vector<1x1024xf32>
    %54 = vector.shape_cast %44 : vector<1x1024xf32> to vector<1x1x1024xf32>
    %c0_42 = arith.constant 0 : index
    %c0_43 = arith.constant 0 : index
    %c0_44 = arith.constant 0 : index
    %55 = vector.load %arg14[%c0_42, %c0_43, %c0_44] : memref<1x1x1024xf32, #tpu.memory_space<vmem>>, vector<1x1x1024xf32>
    tpu.vector_store %arg14[%c0_42, %c0_43, %c0_44], %54 {strides = array<i32>} : memref<1x1x1024xf32, #tpu.memory_space<vmem>>, vector<1x1x1024xf32>,
    %56 = vector.shape_cast %53 : vector<1x1024xf32> to vector<1x1x1024xf32>
    %c0_45 = arith.constant 0 : index
    %c0_46 = arith.constant 0 : index
    %c0_47 = arith.constant 0 : index
    %57 = vector.load %arg15[%c0_45, %c0_46, %c0_47] : memref<1x1x1024xf32, #tpu.memory_space<vmem>>, vector<1x1x1024xf32>
    tpu.vector_store %arg15[%c0_45, %c0_46, %c0_47], %56 {strides = array<i32>} : memref<1x1x1024xf32, #tpu.memory_space<vmem>>, vector<1x1x1024xf32>,
    return
  }
  func.func @transform_0(%arg0: i32) -> (i32, i32, i32) {
    %c0_i32 = arith.constant 0 : i32
    %c0_i32_0 = arith.constant 0 : i32
    %c0_i32_1 = arith.constant 0 : i32
    return %arg0, %c0_i32, %c0_i32_0 : i32, i32, i32
  }
  func.func @transform_1(%arg0: i32) -> (i32, i32, i32) {
    %c0_i32 = arith.constant 0 : i32
    %c0_i32_0 = arith.constant 0 : i32
    %c0_i32_1 = arith.constant 0 : i32
    return %arg0, %c0_i32, %c0_i32_0 : i32, i32, i32
  }
  func.func @transform_2(%arg0: i32) -> (i32, i32) {
    %c0_i32 = arith.constant 0 : i32
    %c0_i32_0 = arith.constant 0 : i32
    %c0_i32_1 = arith.constant 0 : i32
    return %c0_i32, %c0_i32_0 : i32, i32
  }
  func.func @transform_3(%arg0: i32) -> (i32, i32) {
    %c0_i32 = arith.constant 0 : i32
    %c0_i32_0 = arith.constant 0 : i32
    %c0_i32_1 = arith.constant 0 : i32
    return %c0_i32, %c0_i32_0 : i32, i32
  }
  func.func @transform_4(%arg0: i32) -> (i32, i32) {
    %c0_i32 = arith.constant 0 : i32
    %c0_i32_0 = arith.constant 0 : i32
    %c0_i32_1 = arith.constant 0 : i32
    return %c0_i32, %c0_i32_0 : i32, i32
  }
  func.func @transform_5(%arg0: i32) -> (i32, i32) {
    %c0_i32 = arith.constant 0 : i32
    %c0_i32_0 = arith.constant 0 : i32
    %c0_i32_1 = arith.constant 0 : i32
    return %c0_i32, %c0_i32_0 : i32, i32
  }
  func.func @transform_6(%arg0: i32) -> (i32, i32) {
    %c0_i32 = arith.constant 0 : i32
    %c0_i32_0 = arith.constant 0 : i32
    %c0_i32_1 = arith.constant 0 : i32
    return %c0_i32, %c0_i32_0 : i32, i32
  }
  func.func @transform_7(%arg0: i32) -> (i32, i32) {
    %c0_i32 = arith.constant 0 : i32
    %c0_i32_0 = arith.constant 0 : i32
    %c0_i32_1 = arith.constant 0 : i32
    return %c0_i32, %c0_i32_0 : i32, i32
  }
  func.func @transform_8(%arg0: i32) -> (i32, i32) {
    %c0_i32 = arith.constant 0 : i32
    %c0_i32_0 = arith.constant 0 : i32
    %c0_i32_1 = arith.constant 0 : i32
    return %c0_i32, %c0_i32_0 : i32, i32
  }
  func.func @transform_9(%arg0: i32) -> (i32, i32) {
    %c0_i32 = arith.constant 0 : i32
    %c0_i32_0 = arith.constant 0 : i32
    %c0_i32_1 = arith.constant 0 : i32
    return %c0_i32, %c0_i32_0 : i32, i32
  }
  func.func @transform_10(%arg0: i32) -> (i32, i32) {
    %c0_i32 = arith.constant 0 : i32
    %c0_i32_0 = arith.constant 0 : i32
    %c0_i32_1 = arith.constant 0 : i32
    return %c0_i32, %c0_i32_0 : i32, i32
  }
  func.func @transform_11(%arg0: i32) -> (i32, i32) {
    %c0_i32 = arith.constant 0 : i32
    %c0_i32_0 = arith.constant 0 : i32
    %c0_i32_1 = arith.constant 0 : i32
    return %c0_i32, %c0_i32_0 : i32, i32
  }
  func.func @transform_12(%arg0: i32) -> (i32, i32, i32) {
    %c0_i32 = arith.constant 0 : i32
    %c0_i32_0 = arith.constant 0 : i32
    %c0_i32_1 = arith.constant 0 : i32
    return %arg0, %c0_i32, %c0_i32_0 : i32, i32, i32
  }
  func.func @transform_13(%arg0: i32) -> (i32, i32, i32) {
    %c0_i32 = arith.constant 0 : i32
    %c0_i32_0 = arith.constant 0 : i32
    %c0_i32_1 = arith.constant 0 : i32
    return %arg0, %c0_i32, %c0_i32_0 : i32, i32, i32
  }
  func.func @transform_14(%arg0: i32) -> (i32, i32, i32) {
    %c0_i32 = arith.constant 0 : i32
    %c0_i32_0 = arith.constant 0 : i32
    %c0_i32_1 = arith.constant 0 : i32
    return %arg0, %c0_i32, %c0_i32_0 : i32, i32, i32
  }
}

module attributes {stable_mosaic.version = 11 : i64} {
  func.func @_apply_chain_kernel(%arg0: i32, %arg1: memref<1x64x32xbf16, #tpu.memory_space<vmem>>, %arg2: memref<1x32x32xf32, #tpu.memory_space<vmem>>, %arg3: memref<1x32x32xf32, #tpu.memory_space<vmem>>, %arg4: memref<1x64x32xbf16, #tpu.memory_space<vmem>>) attributes {dimension_semantics = [#tpu.dimension_semantics<parallel>], iteration_bounds = array<i64: 2>, scalar_prefetch = 0 : i64, scratch_operands = 0 : i64, tpu.core_type = #tpu.core_type<tc>, window_params = [{transform_indices = @transform_0, window_bounds = array<i64: 1, 64, 32>}, {transform_indices = @transform_1, window_bounds = array<i64: 1, 32, 32>}, {transform_indices = @transform_2, window_bounds = array<i64: 1, 32, 32>}, {transform_indices = @transform_3, window_bounds = array<i64: 1, 64, 32>}]} {
    %c0 = arith.constant 0 : index
    %c0_0 = arith.constant 0 : index
    %c0_1 = arith.constant 0 : index
    %0 = vector.load %arg1[%c0, %c0_0, %c0_1] : memref<1x64x32xbf16, #tpu.memory_space<vmem>>, vector<1x64x32xbf16>
    %1 = vector.shape_cast %0 : vector<1x64x32xbf16> to vector<64x32xbf16>
    %c0_2 = arith.constant 0 : index
    %c0_3 = arith.constant 0 : index
    %c0_4 = arith.constant 0 : index
    %2 = vector.load %arg2[%c0_2, %c0_3, %c0_4] : memref<1x32x32xf32, #tpu.memory_space<vmem>>, vector<1x32x32xf32>
    %3 = vector.shape_cast %2 : vector<1x32x32xf32> to vector<32x32xf32>
    %4 = arith.truncf %3 : vector<32x32xf32> to vector<32x32xbf16>
    %c0_5 = arith.constant 0 : index
    %c0_6 = arith.constant 0 : index
    %c0_7 = arith.constant 0 : index
    %5 = vector.load %arg3[%c0_5, %c0_6, %c0_7] : memref<1x32x32xf32, #tpu.memory_space<vmem>>, vector<1x32x32xf32>
    %6 = vector.shape_cast %5 : vector<1x32x32xf32> to vector<32x32xf32>
    %7 = arith.truncf %6 : vector<32x32xf32> to vector<32x32xbf16>
    %cst = arith.constant dense<0.000000e+00> : vector<64x32xf32>
    %8 = tpu.matmul %1, %4, %cst {dimension_numbers = #tpu.dot_dimension_numbers<[1], [0], [0], [1], [0, 0, 1, 1], [], []>} : vector<64x32xbf16>, vector<32x32xbf16>, vector<64x32xf32> -> vector<64x32xf32>
    %cst_8 = arith.constant 0.000000e+00 : f32
    %9 = vector.broadcast %cst_8 : f32 to vector<64x32xf32>
    %10 = arith.cmpf oge, %8, %9 : vector<64x32xf32>
    %cst_9 = arith.constant 2.000000e-01 : f32
    %11 = vector.broadcast %cst_9 : f32 to vector<64x32xf32>
    %12 = arith.mulf %11, %8 : vector<64x32xf32>
    %13 = arith.select %10, %8, %12 : vector<64x32xi1>, vector<64x32xf32>
    %14 = arith.truncf %13 : vector<64x32xf32> to vector<64x32xbf16>
    %cst_10 = arith.constant dense<0.000000e+00> : vector<64x32xf32>
    %15 = tpu.matmul %14, %7, %cst_10 {dimension_numbers = #tpu.dot_dimension_numbers<[1], [0], [0], [1], [0, 0, 1, 1], [], []>} : vector<64x32xbf16>, vector<32x32xbf16>, vector<64x32xf32> -> vector<64x32xf32>
    %16 = arith.truncf %15 : vector<64x32xf32> to vector<64x32xbf16>
    %17 = vector.shape_cast %16 : vector<64x32xbf16> to vector<1x64x32xbf16>
    %c0_11 = arith.constant 0 : index
    %c0_12 = arith.constant 0 : index
    %c0_13 = arith.constant 0 : index
    %18 = vector.load %arg4[%c0_11, %c0_12, %c0_13] : memref<1x64x32xbf16, #tpu.memory_space<vmem>>, vector<1x64x32xbf16>
    tpu.vector_store %arg4[%c0_11, %c0_12, %c0_13], %17 {strides = array<i32>} : memref<1x64x32xbf16, #tpu.memory_space<vmem>>, vector<1x64x32xbf16>,
    return
  }
  func.func @transform_0(%arg0: i32) -> (i32, i32, i32) {
    %c0_i32 = arith.constant 0 : i32
    %c0_i32_0 = arith.constant 0 : i32
    %c0_i32_1 = arith.constant 0 : i32
    return %arg0, %c0_i32, %c0_i32_0 : i32, i32, i32
  }
  func.func @transform_1(%arg0: i32) -> (i32, i32, i32) {
    %c0_i32 = arith.constant 0 : i32
    %c0_i32_0 = arith.constant 0 : i32
    %c0_i32_1 = arith.constant 0 : i32
    return %arg0, %c0_i32, %c0_i32_0 : i32, i32, i32
  }
  func.func @transform_2(%arg0: i32) -> (i32, i32, i32) {
    %c0_i32 = arith.constant 0 : i32
    %c0_i32_0 = arith.constant 0 : i32
    %c0_i32_1 = arith.constant 0 : i32
    return %arg0, %c0_i32, %c0_i32_0 : i32, i32, i32
  }
  func.func @transform_3(%arg0: i32) -> (i32, i32, i32) {
    %c0_i32 = arith.constant 0 : i32
    %c0_i32_0 = arith.constant 0 : i32
    %c0_i32_1 = arith.constant 0 : i32
    return %arg0, %c0_i32, %c0_i32_0 : i32, i32, i32
  }
}

module attributes {stable_mosaic.version = 11 : i64} {
  func.func @_up_conv_kernel(%arg0: i32, %arg1: memref<1x64x288xbf16, #tpu.memory_space<vmem>>, %arg2: memref<288x128xbf16, #tpu.memory_space<vmem>>, %arg3: memref<1x128xf32, #tpu.memory_space<vmem>>, %arg4: memref<1x64x128xf32, #tpu.memory_space<vmem>>, %arg5: memref<1x64x128xf32, #tpu.memory_space<vmem>>) attributes {dimension_semantics = [#tpu.dimension_semantics<parallel>], iteration_bounds = array<i64: 2>, scalar_prefetch = 0 : i64, scratch_operands = 0 : i64, tpu.core_type = #tpu.core_type<tc>, window_params = [{transform_indices = @transform_0, window_bounds = array<i64: 1, 64, 288>}, {pipeline_mode = #tpu.pipeline_mode<synchronous>, transform_indices = @transform_1, window_bounds = array<i64: 288, 128>}, {pipeline_mode = #tpu.pipeline_mode<synchronous>, transform_indices = @transform_2, window_bounds = array<i64: 1, 128>}, {transform_indices = @transform_3, window_bounds = array<i64: 1, 64, 128>}, {transform_indices = @transform_4, window_bounds = array<i64: 1, 64, 128>}]} {
    %c0 = arith.constant 0 : index
    %c0_0 = arith.constant 0 : index
    %c0_1 = arith.constant 0 : index
    %0 = vector.load %arg1[%c0, %c0_0, %c0_1] : memref<1x64x288xbf16, #tpu.memory_space<vmem>>, vector<1x64x288xbf16>
    %1 = vector.shape_cast %0 : vector<1x64x288xbf16> to vector<64x288xbf16>
    %c0_2 = arith.constant 0 : index
    %c0_3 = arith.constant 0 : index
    %2 = vector.load %arg2[%c0_2, %c0_3] : memref<288x128xbf16, #tpu.memory_space<vmem>>, vector<288x128xbf16>
    %cst = arith.constant dense<0.000000e+00> : vector<64x128xf32>
    %3 = tpu.matmul %1, %2, %cst {dimension_numbers = #tpu.dot_dimension_numbers<[1], [0], [0], [1], [0, 0, 1, 1], [], []>} : vector<64x288xbf16>, vector<288x128xbf16>, vector<64x128xf32> -> vector<64x128xf32>
    %c0_4 = arith.constant 0 : index
    %c0_5 = arith.constant 0 : index
    %4 = vector.load %arg3[%c0_4, %c0_5] : memref<1x128xf32, #tpu.memory_space<vmem>>, vector<1x128xf32>
    %5 = vector.broadcast %4 : vector<1x128xf32> to vector<64x128xf32>
    %6 = arith.addf %3, %5 : vector<64x128xf32>
    %c0_6 = arith.constant 0 : index
    %c0_7 = arith.constant 0 : index
    %c0_8 = arith.constant 0 : index
    %7 = vector.load %arg4[%c0_6, %c0_7, %c0_8] : memref<1x64x128xf32, #tpu.memory_space<vmem>>, vector<1x64x128xf32>
    %8 = vector.shape_cast %7 : vector<1x64x128xf32> to vector<64x128xf32>
    %9 = arith.addf %6, %8 : vector<64x128xf32>
    %10 = vector.shape_cast %9 : vector<64x128xf32> to vector<1x64x128xf32>
    %c0_9 = arith.constant 0 : index
    %c0_10 = arith.constant 0 : index
    %c0_11 = arith.constant 0 : index
    %11 = vector.load %arg5[%c0_9, %c0_10, %c0_11] : memref<1x64x128xf32, #tpu.memory_space<vmem>>, vector<1x64x128xf32>
    tpu.vector_store %arg5[%c0_9, %c0_10, %c0_11], %10 {strides = array<i32>} : memref<1x64x128xf32, #tpu.memory_space<vmem>>, vector<1x64x128xf32>,
    return
  }
  func.func @transform_0(%arg0: i32) -> (i32, i32, i32) {
    %c0_i32 = arith.constant 0 : i32
    %c0_i32_0 = arith.constant 0 : i32
    %c0_i32_1 = arith.constant 0 : i32
    return %arg0, %c0_i32, %c0_i32_0 : i32, i32, i32
  }
  func.func @transform_1(%arg0: i32) -> (i32, i32) {
    %c0_i32 = arith.constant 0 : i32
    %c0_i32_0 = arith.constant 0 : i32
    %c0_i32_1 = arith.constant 0 : i32
    return %c0_i32, %c0_i32_0 : i32, i32
  }
  func.func @transform_2(%arg0: i32) -> (i32, i32) {
    %c0_i32 = arith.constant 0 : i32
    %c0_i32_0 = arith.constant 0 : i32
    %c0_i32_1 = arith.constant 0 : i32
    return %c0_i32, %c0_i32_0 : i32, i32
  }
  func.func @transform_3(%arg0: i32) -> (i32, i32, i32) {
    %c0_i32 = arith.constant 0 : i32
    %c0_i32_0 = arith.constant 0 : i32
    %c0_i32_1 = arith.constant 0 : i32
    return %arg0, %c0_i32, %c0_i32_0 : i32, i32, i32
  }
  func.func @transform_4(%arg0: i32) -> (i32, i32, i32) {
    %c0_i32 = arith.constant 0 : i32
    %c0_i32_0 = arith.constant 0 : i32
    %c0_i32_1 = arith.constant 0 : i32
    return %arg0, %c0_i32, %c0_i32_0 : i32, i32, i32
  }
}

</mosaic_0001>

<bundles_post_ra>
// kernel: kernel_filter_forward.4
= control target key start
LH: loop header
LB: loop body
LE: loop exit
PB: predicated region body
PF: predicated region fallthrough
CT: control target
= control target key end

     0   :  { %s678_s12 = smov 0   ;;  %s723_s0 = inlined_call_operand.vmem [shape: bf16[2,64,32], index: 0, kind: input, shape index: {}]   ;;  %s724_s1 = inlined_call_operand.vmem [shape: f32[2,32,32], index: 1, kind: input, shape index: {}]   ;;  %s725_s2 = inlined_call_operand.vmem [shape: f32[2,32,32], index: 2, kind: input, shape index: {}]   ;;  %s726_s3 = inlined_call_operand.vmem [shape: bf16[2,64,32], index: 3, kind: output, shape index: {}]  }
   0x1 LB: > { %s555_s13 = sadd.s32 4294967295, %s656_s12   ;;  %p559_p0 = scmp.ge.s32.totalorder %s656_s12, 1  ;;  %s656_s12 = sphi %s678_s12, %s13_s12  }
   0x2   : > { %p157_p1 = scmp.lt.s32.totalorder %s656_s12, 3 }
   0x4   : > { %p158_p2 = pnand %p559_p0, %p157_p1 }
   0x5   : > { %p191_p3 = scmp.lt.s32.totalorder (!%p158_p2), %s555_s13, 1  ;;  %vm252_vm0 = vcmask (!%p158_p2), 261120   ;;  %vm467_vm9 = vcmask (!%p158_p2), 257024  }
   0x6   : > { %161 = sbr.rel (%p158_p2) target bundleno = 474 (0x1da), region = 32 }
   0xd   : > { %s728_s13 = smov (!%p191_p3, %s555_s13), 1 }
   0xe   : > { %s686_s14 = sshll.u32 %s728_s13, 5 }
   0xf   : > { %s195_s17 = scalar_lea.vmem %s723_s0, %s686_s14  ;;  %s200_s20 = scalar_lea.vmem %s724_s1, %s686_s14 }
  0x10   : > { %v220_v0 = vld [vmem:[%s200_s20] sm:$0xff]  ;;  %v221_v1 = vld [vmem:[%s200_s20 + $0x8] sm:$0xff]  ;;  %v222_v2 = vld [vmem:[%s200_s20 + $0x10] sm:$0xff]  ;;  %s205_s23 = scalar_lea.vmem %s725_s2, %s686_s14  ;;  %s210_s26 = scalar_lea.vmem %s726_s3, %s686_s14 }
  0x11   : > { %v224_v3 = vpack.c.bf16 %v221_v1, %v220_v0  ;;  %v223_v4 = vld [vmem:[%s200_s20 + $0x18] sm:$0xff]  ;;  %v646_v6 = vld [vmem:[%s195_s17] sm:$0xff]   ;;  %v647_v7 = vld [vmem:[%s195_s17 + $0x8] sm:$0xff]  }
  0x12   : > { %v225_v5 = vpack.c.bf16 %v223_v4, %v222_v2  ;;  %618 = vmatprep.mubr.msk.bf16.mxu0 %vm252_vm0, %v646_v6  ;;  %v648_v8 = vld [vmem:[%s195_s17 + $0x10] sm:$0xff]   ;;  %v649_v9 = vld [vmem:[%s195_s17 + $0x18] sm:$0xff]   ;;  %v226_v10 = vld [vmem:[%s205_s23] sm:$0xff] }
  0x13   : > { %614 = vmatprep.subr.bf16.mxu0 %v224_v3  ;;  %v227_v11 = vld [vmem:[%s205_s23 + $0x8] sm:$0xff]  ;;  %v228_v13 = vld [vmem:[%s205_s23 + $0x10] sm:$0xff]  ;;  %v229_v14 = vld [vmem:[%s205_s23 + $0x18] sm:$0xff] }
  0x14   : > { %615 = vmatpush3.bf16.msra.mxu0 %v224_v3  ;;  %v230_v12 = vpack.c.bf16 %v227_v11, %v226_v10  ;;  %v231_v15 = vpack.c.bf16 %v229_v14, %v228_v13 }
  0x15   : > { %616 = vmatprep.subr.bf16.mxu0 %v225_v5 }
  0x16   : > { %626 = vmatprep.subr.bf16.mxu1 %v230_v12 }
  0x17   : > { %627 = vmatpush3.bf16.msra.mxu1 %v230_v12 }
  0x18   : > { %617 = vmatpush3.bf16.msra.mxu0 %v225_v5  ;;  %628 = vmatprep.subr.bf16.mxu1 %v231_v15 }
  0x1b   : > { %619 = vmatmul.mubr.msk.bf16.vlgmr.msra.gmra.mrb[0].mxu0 %vm252_vm0, %v647_v7  ;;  %629 = vmatpush3.bf16.msra.mxu1 %v231_v15 }
  0x1c   : > { %622 = vmatprep.mubr.msk.bf16.mxu0 %vm252_vm0, %v648_v8 }
  0x23   : > { %623 = vmatmul.mubr.msk.bf16.gmra.mrb[4].mxu0 %vm252_vm0, %v649_v9 }
  0xee   : > { %v620_v16 = vpop.f32.mrb[0].mxu0 }
  0xef   : > { %v340_v17 = vmul.f32 0.2, %v620_v16  ;;  %v299_v18 = vpop.f32.mrb[1].mxu0  ;;  %vm332_vm1 = vcmp.ge.f32.partialorder %v620_v16, 0.0 }
  0xf0   : > { %v338_v19 = vmul.f32 0.2, %v299_v18  ;;  %v621_v20 = vpop.f32.mrb[2].mxu0  ;;  %vm330_vm2 = vcmp.ge.f32.partialorder %v299_v18, 0.0 }
  0xf1   : > { %vm333_vm3 = vcmp.ge.f32.partialorder %v621_v20, 0.0  ;;  %v341_v21 = vmul.f32 0.2, %v621_v20  ;;  %v302_v22 = vpop.f32.mrb[3].mxu0  ;;  %v348_v24 = vsel %vm332_vm1, %v620_v16, %v340_v17 }
  0xf2   : > { %vm331_vm4 = vcmp.ge.f32.partialorder %v302_v22, 0.0  ;;  %v339_v23 = vmul.f32 0.2, %v302_v22  ;;  %v346_v27 = vsel %vm330_vm2, %v299_v18, %v338_v19 }
  0xf3   : > { %v349_v25 = vsel %vm333_vm3, %v621_v20, %v341_v21 }
  0xf4   : > { %v355_v26 = vpack.c.bf16 %v349_v25, %v348_v24  ;;  %v347_v28 = vsel %vm331_vm4, %v302_v22, %v339_v23 }
  0xf5   : > { %v354_v29 = vpack.c.bf16 %v347_v28, %v346_v27 }
  0xf6   : > { %v624_v30 = vpop.f32.mrb[4].mxu0 }
  0xf7   : > { %v344_v31 = vmul.f32 0.2, %v624_v30  ;;  %v315_v32 = vpop.f32.mrb[5].mxu0  ;;  %630 = vmatprep.mubr.msk.bf16.mxu1 %vm252_vm0, %v354_v29  ;;  %vm336_vm5 = vcmp.ge.f32.partialorder %v624_v30, 0.0 }
  0xf8   : > { %v342_v33 = vmul.f32 0.2, %v315_v32  ;;  %v625_v34 = vpop.f32.mrb[6].mxu0  ;;  %631 = vmatmul.mubr.msk.bf16.vlgmr.msra.gmra.mrb[0].mxu1 %vm252_vm0, %v355_v26  ;;  %vm334_vm6 = vcmp.ge.f32.partialorder %v315_v32, 0.0 }
  0xf9   : > { %vm337_vm7 = vcmp.ge.f32.partialorder %v625_v34, 0.0  ;;  %v345_v35 = vmul.f32 0.2, %v625_v34  ;;  %v318_v36 = vpop.f32.mrb[7].mxu0  ;;  %v352_v38 = vsel %vm336_vm5, %v624_v30, %v344_v31 }
  0xfa   : > { %vm335_vm8 = vcmp.ge.f32.partialorder %v318_v36, 0.0  ;;  %v343_v37 = vmul.f32 0.2, %v318_v36  ;;  %v350_v40 = vsel %vm334_vm6, %v315_v32, %v342_v33 }
  0xfb   : > { %v353_v39 = vsel %vm337_vm7, %v625_v34, %v345_v35 }
  0xfc   : > { %v357_v41 = vpack.c.bf16 %v353_v39, %v352_v38  ;;  %v351_v42 = vsel %vm335_vm8, %v318_v36, %v343_v37 }
  0xfd   : > { %v356_v43 = vpack.c.bf16 %v351_v42, %v350_v40 }
  0xff   : > { %634 = vmatprep.mubr.msk.bf16.mxu1 %vm252_vm0, %v356_v43 }
 0x100   : > { %635 = vmatmul.mubr.msk.bf16.gmra.mrb[4].mxu1 %vm252_vm0, %v357_v41 }
 0x1cb   : > { %v632_v44 = vpop.f32.mrb[0].mxu1 }
 0x1cc   : > { %v596_v45 = vpack.c.bf16 %v632_v44, %v632_v44  ;;  %v404_v46 = vpop.f32.mrb[1].mxu1 }
 0x1cd   : > { %v594_v47 = vpack.c.bf16 %v404_v46, %v404_v46  ;;  %v633_v48 = vpop.f32.mrb[2].mxu1 }
 0x1ce   : > { %470 = vst.msk [vmem:[%s210_s26 + $0x8] sm:$0xf] %vm467_vm9, %v596_v45  ;;  %v597_v49 = vpack.c.bf16 %v633_v48, %v633_v48  ;;  %v407_v50 = vpop.f32.mrb[3].mxu1 }
 0x1cf   : > { %468 = vst.msk [vmem:[%s210_s26] sm:$0xf] %vm467_vm9, %v594_v47  ;;  %v595_v51 = vpack.c.bf16 %v407_v50, %v407_v50 }
 0x1d0   : > { %471 = vst.msk [vmem:[%s210_s26 + $0xc] sm:$0xf] %vm467_vm9, %v597_v49 }
 0x1d1   : > { %469 = vst.msk [vmem:[%s210_s26 + $0x4] sm:$0xf] %vm467_vm9, %v595_v51 }
 0x1d3   : > { %v636_v52 = vpop.f32.mrb[4].mxu1 }
 0x1d4   : > { %v600_v53 = vpack.c.bf16 %v636_v52, %v636_v52  ;;  %v420_v54 = vpop.f32.mrb[5].mxu1 }
 0x1d5   : > { %v598_v55 = vpack.c.bf16 %v420_v54, %v420_v54  ;;  %v637_v56 = vpop.f32.mrb[6].mxu1 }
 0x1d6   : > { %474 = vst.msk [vmem:[%s210_s26 + $0x18] sm:$0xf] %vm467_vm9, %v600_v53  ;;  %v601_v57 = vpack.c.bf16 %v637_v56, %v637_v56  ;;  %v423_v58 = vpop.f32.mrb[7].mxu1 }
 0x1d7   : > { %472 = vst.msk [vmem:[%s210_s26 + $0x10] sm:$0xf] %vm467_vm9, %v598_v55  ;;  %v599_v59 = vpack.c.bf16 %v423_v58, %v423_v58 }
 0x1d8   : > { %475 = vst.msk [vmem:[%s210_s26 + $0x1c] sm:$0xf] %vm467_vm9, %v601_v57 }
 0x1d9   : > { %473 = vst.msk [vmem:[%s210_s26 + $0x14] sm:$0xf] %vm467_vm9, %v599_v59 }
 0x1da PF: > { %s13_s12 = sadd.s32 1, %s656_s12  }
 0x1db   : > { %p10_p4 = scmp.ge.s32.totalorder %s13_s12, 4  }
 0x1dd   :  { %12 = sbr.rel (!%p10_p4) target bundleno = 1 (0x1), region = 68 }

// kernel: kernel_filter_forward.5
= control target key start
LH: loop header
LB: loop body
LE: loop exit
PB: predicated region body
PF: predicated region fallthrough
CT: control target
= control target key end

     0   :  { %9 = vsyncpa [#allocation3], 0  ;;  %s1201_s0 = inlined_call_operand.vmem [shape: bf16[2,64,288], index: 0, kind: input, shape index: {}]   ;;  %s1202_s1 = inlined_call_operand.vmem [shape: bf16[288,128], index: 1, kind: input, shape index: {}]   ;;  %s1203_s2 = inlined_call_operand.vmem [shape: f32[1,128], index: 2, kind: input, shape index: {}]   ;;  %s1204_s3 = inlined_call_operand.vmem [shape: f32[2,64,128], index: 3, kind: input, shape index: {}]   ;;  %s1205_s4 = inlined_call_operand.hbm [shape: f32[2,64,128], index: 4, kind: output, shape index: {}]  }
   0x1   :  { %11 = vsyncpa [#allocation3 + $0x1], 0  ;;  %s991_s15 = smov 0   ;;  %s993_s16 = smov 0  }
   0x2   :  { %s995_s17 = smov 0   ;;  %s997_s18 = smov 0  }
   0x3 LB: > { %s1012_s19 = sadd.s32 4294967295, %s961_s18   ;;  %s699_s20 = sadd.s32 4294967294, %s961_s18   ;;  %s961_s18 = sphi %s997_s18, %s1211_s18   ;;  %s957_s17 = sphi %s995_s17, %s1210_s17   ;;  %s953_s16 = sphi %s993_s16, %s1209_s16   ;;  %s949_s15 = sphi %s991_s15, %s1208_s15  }
   0x4   : > { %s1016_s21 = sadd.s32 1, %s961_s18   ;;  %s118_s22 = sadd.s32 1, %s957_s17 }
   0x5   : > { %s115_s23 = ssub.s32 %s961_s18, %s1016_s21  ;;  %p128_p0 = scmp.ne.s32.totalorder %s957_s17, %s953_s16 }
   0x6   : > { %p116_p1 = scmp.eq.s32.totalorder %s115_s23, 0  ;;  %p129_p2 = scmp.eq.s32.totalorder %s1012_s19, 1 }
   0x7   : > { %p134_p3 = scmp.ne.s32.totalorder %s953_s16, %s949_s15  ;;  %p135_p4 = scmp.eq.s32.totalorder %s699_s20, 1 }
   0x8   : > { %s1027_s24 = scalar_select %p116_p1, %s957_s17, %s118_s22  }
   0x9   : > { %p1029_p5 = por %p129_p2, %p128_p0  ;;  %p1033_p6 = por %p135_p4, %p134_p3 }
   0xa   : > { %p702_p7 = scmp.ge.s32.totalorder %s961_s18, 1  ;;  %p175_p8 = scmp.lt.s32.totalorder %s961_s18, 3 }
   0xc   : > { %p176_p9 = pnand %p702_p7, %p175_p8 }
   0xd   : > { %v865_v0 = vld [vmem:[%s1202_s1 + $0x40] sm:$0xff] (!%p176_p9)   ;;  %v867_v2 = vld [vmem:[%s1202_s1 + $0x48] sm:$0xff] (!%p176_p9)   ;;  %p206_p10 = scmp.lt.s32.totalorder (!%p176_p9), %s1012_s19, 1  ;;  %v869_v4 = vld [vmem:[%s1202_s1 + $0x50] sm:$0xff] (!%p176_p9)   ;;  %vm444_vm0 = vcmask (!%p176_p9), 261120   ;;  %s203_s12 = sand.u32 (!%p176_p9), 1, %s953_s16  }
   0xe   : > { %179 = sbr.rel (%p176_p9) target bundleno = 300 (0x12c), region = 36  ;;  %v866_v1 = vld [vmem:[%s1202_s1] sm:$0xff] (!%p176_p9)   ;;  %749 = vmatprep.subr.bf16.mxu0 (!%p176_p9), %v865_v0  ;;  %807 = vmatprep.subr.bf16.mxu1 (!%p176_p9), %v865_v0  ;;  %v868_v3 = vld [vmem:[%s1202_s1 + $0x8] sm:$0xff] (!%p176_p9)   ;;  %v870_v5 = vld [vmem:[%s1202_s1 + $0x10] sm:$0xff] (!%p176_p9)   ;;  %s703_s23 = sshll.u32 (!%p176_p9), %s203_s12, 6 }
   0xf   : > { %750 = vmatpush3.bf16.msra.mxu0 (!%p176_p9), %v866_v1  ;;  %815 = vmatpush3.bf16.msra.mxu1 (!%p176_p9), %v866_v1  ;;  %v871_v6 = vld [vmem:[%s1202_s1 + $0x58] sm:$0xff] (!%p176_p9)   ;;  %v873_v8 = vld [vmem:[%s1202_s1 + $0x60] sm:$0xff] (!%p176_p9)   ;;  %v875_v10 = vld [vmem:[%s1202_s1 + $0x68] sm:$0xff] (!%p176_p9)   ;;  %s748_s27 = sshll.u32 (!%p176_p9), %s1012_s19, 10  ;;  %s963_s8 = smov (!%p176_p9), [#allocation2]  }
  0x10   : > { %751 = vmatprep.subr.bf16.mxu0 (!%p176_p9), %v867_v2  ;;  %808 = vmatprep.subr.bf16.mxu1 (!%p176_p9), %v867_v2  ;;  %v872_v7 = vld [vmem:[%s1202_s1 + $0x18] sm:$0xff] (!%p176_p9)   ;;  %v874_v9 = vld [vmem:[%s1202_s1 + $0x20] sm:$0xff] (!%p176_p9)   ;;  %v876_v13 = vld [vmem:[%s1202_s1 + $0x28] sm:$0xff] (!%p176_p9)   ;;  %s1152_s5 = scalar_lea.hbm (!%p176_p9), %s1205_s4, %s748_s27  ;;  %s903_s9 = sshll.u32 (!%p176_p9), %s963_s8, 4  ;;  %s904_s9 = int_to_ptr.vmem [resolvable:$false] %s903_s9 }
  0x11   : > { %v877_v14 = vld [vmem:[%s1202_s1 + $0x70] sm:$0xff] (!%p176_p9)   ;;  %v879_v16 = vld [vmem:[%s1202_s1 + $0x78] sm:$0xff] (!%p176_p9)   ;;  %v887_v18 = vld [vmem:[%s1202_s1 + $0x80] sm:$0xff] (!%p176_p9)  }
  0x12   : > { %v878_v15 = vld [vmem:[%s1202_s1 + $0x30] sm:$0xff] (!%p176_p9)   ;;  %v880_v17 = vld [vmem:[%s1202_s1 + $0x38] sm:$0xff] (!%p176_p9)   ;;  %v888_v22 = vld [vmem:[%s1202_s1 + $0x88] sm:$0xff] (!%p176_p9)  }
  0x13   : > { %752 = vmatpush3.bf16.msra.mxu0 (!%p176_p9), %v868_v3  ;;  %816 = vmatpush3.bf16.msra.mxu1 (!%p176_p9), %v868_v3  ;;  %v707_v42 = vld [vmem:[%s1203_s2] ss:$0 sm:$0xff] (!%p176_p9) }
  0x14   : > { %753 = vmatprep.subr.bf16.mxu0 (!%p176_p9), %v869_v4  ;;  %809 = vmatprep.subr.bf16.mxu1 (!%p176_p9), %v869_v4 }
  0x15   : > { %s1056_s11 = scalar_select %p206_p10, %s1012_s19, 1 }
  0x16   : > { %s1160_s19 = scalar_lea.sflag [#allocation3], %s203_s12 }
  0x17   : > { %s823_s22 = smul.u32 96, %s1056_s11  ;;  %754 = vmatpush3.bf16.msra.mxu0 %v870_v5  ;;  %817 = vmatpush3.bf16.msra.mxu1 %v870_v5  ;;  %s747_s10 = sshll.u32 %s1056_s11, 6 }
  0x18   : > { %755 = vmatprep.subr.bf16.mxu0 %v871_v6  ;;  %810 = vmatprep.subr.bf16.mxu1 %v871_v6  ;;  %s1134_s11 = scalar_lea.vmem [#allocation2], %s703_s23 }
  0x19   : > { %s1074_s6 = scalar_lea.vmem %s1201_s0, %s823_s22  ;;  %s1127_s22 = scalar_lea.vmem %s1204_s3, %s747_s10 }
  0x1a   : > { %v883_v11 = vld [vmem:[%s1074_s6 + $0x4] ss:$12 sps:$4 sm:$0xff]   ;;  %v886_v12 = vld [vmem:[%s1074_s6 + $0x4c] ss:$12 sps:$4 sm:$0xff]   ;;  %v884_v20 = vld [vmem:[%s1074_s6 + $0x48] ss:$12 sps:$4 sm:$0xff]  }
  0x1b   : > { %756 = vmatpush3.bf16.msra.mxu0 %v872_v7  ;;  %818 = vmatpush3.bf16.msra.mxu1 %v872_v7  ;;  %v881_v19 = vld [vmem:[%s1074_s6] ss:$12 sps:$4 sm:$0xff]   ;;  %v889_v21 = vld [vmem:[%s1074_s6 + $0x1c] ss:$12 sps:$4 sm:$0xff]   ;;  %v892_v24 = vld [vmem:[%s1074_s6 + $0x18] ss:$12 sps:$4 sm:$0xff]  }
  0x1c   : > { %757 = vmatprep.subr.bf16.mxu0 %v873_v8  ;;  %811 = vmatprep.subr.bf16.mxu1 %v873_v8  ;;  %v891_v23 = vld [vmem:[%s1074_s6 + $0x8] ss:$12 sps:$4 sm:$0xff]   ;;  %v893_v25 = vld [vmem:[%s1074_s6 + $0x20] ss:$12 sps:$4 sm:$0xff]   ;;  %v896_v27 = vld [vmem:[%s1074_s6 + $0x38] ss:$12 sps:$4 sm:$0xff]  }
  0x1d   : > { %489 = vmatprep.mubr.bf16.mxu0 %v883_v11  ;;  %513 = vmatprep.mubr.bf16.mxu1 %v886_v12  ;;  %v894_v26 = vld [vmem:[%s1074_s6 + $0x34] ss:$12 sps:$4 sm:$0xff]   ;;  %v897_v28 = vld [vmem:[%s1074_s6 + $0x30] ss:$12 sps:$4 sm:$0xff]   ;;  %v588_v56 = vld [vmem:[%s1127_s22 + $0x8] sm:$0xff]  ;;  %s625_s28 = sshll.u32 %s1134_s11, 4  ;;  %s1154_s28 = int_to_ptr.vmem [resolvable:$true] %s625_s28 }
  0x1e   : > { %v898_v29 = vld [vmem:[%s1074_s6 + $0x50] ss:$12 sps:$4 sm:$0xff]   ;;  %v587_v48 = vld [vmem:[%s1127_s22] sm:$0xff]  ;;  %s899_s7 = scalar_lea.vmem %s1154_s28, 1024  ;;  %s905_s10 = scalar_lea.vmem %s904_s9, 2048 }
  0x1f   : > { %758 = vmatpush3.bf16.msra.mxu0 %v874_v9  ;;  %819 = vmatpush3.bf16.msra.mxu1 %v874_v9  ;;  %v589_v61 = vld [vmem:[%s1127_s22 + $0x10] sm:$0xff]  ;;  %v590_v1 = vld [vmem:[%s1127_s22 + $0x18] sm:$0xff]  ;;  %p900_p11 = scmp.ne.s32.totalorder %s1154_s28, %s899_s7  ;;  %p906_p0 = scmp.lt.s32.totalorder %s1154_s28, %s904_s9 }
  0x20   : > { %759 = vmatprep.subr.bf16.mxu0 %v875_v10  ;;  %812 = vmatprep.subr.bf16.mxu1 %v875_v10  ;;  %v593_v7 = vld [vmem:[%s1127_s22 + $0x30] sm:$0xff]  ;;  %p907_p1 = scmp.lt.s32.totalorder %s905_s10, %s899_s7 }
  0x21   : > { %p901_p12 = pnand %p900_p11, %p1029_p5 }
  0x22   : > { %p908_p2 = por %p907_p1, %p906_p0 }
  0x23   : > { %760 = vmatpush3.bf16.msra.mxu0 %v876_v13  ;;  %820 = vmatpush3.bf16.msra.mxu1 %v876_v13  ;;  %p902_p13 = pneg %p901_p12 }
  0x24   : > { %761 = vmatprep.subr.bf16.mxu0 %v877_v14  ;;  %813 = vmatprep.subr.bf16.mxu1 %v877_v14 }
  0x25   : > { %p909_p3 = pnand %p908_p2, %p902_p13 }
  0x27   : > { %762 = vmatpush3.bf16.msra.mxu0 %v878_v15  ;;  %821 = vmatpush3.bf16.msra.mxu1 %v878_v15 }
  0x28   : > { %763 = vmatprep.subr.bf16.mxu0 %v879_v16  ;;  %814 = vmatprep.subr.bf16.mxu1 %v879_v16  ;;  %v594_v16 = vld [vmem:[%s1127_s22 + $0x38] sm:$0xff] }
  0x2b   : > { %764 = vmatpush3.bf16.msra.mxu0 %v880_v17  ;;  %822 = vmatpush3.bf16.msra.mxu1 %v880_v17 }
  0x2c   : > { %795 = vmatprep.subr.bf16.mxu1 %v887_v18 }
  0x2e   : > { %490 = vmatmul.mubr.bf16.vlgmr.msra.gmra.mrb[0].mxu0 %v881_v19  ;;  %514 = vmatmul.mubr.bf16.vlgmr.msra.gmra.mrb[0].mxu1 %v884_v20 }
  0x2f   : > { %796 = vmatpush3.bf16.msra.mxu1 %v887_v18  ;;  %497 = vmatprep.mubr.bf16.mxu0 %v889_v21 }
  0x30   : > { %797 = vmatprep.subr.bf16.mxu1 %v888_v22  ;;  %799 = vmatprep.mubr.msk.bf16.mxu1 %vm444_vm0, %v891_v23  ;;  %v591_v23 = vld [vmem:[%s1127_s22 + $0x20] sm:$0xff] }
  0x33   : > { %798 = vmatpush3.bf16.msra.mxu1 %v888_v22 }
  0x36   : > { %498 = vmatmul.mubr.bf16.gmra.mrb[4].mxu0 %v892_v24  ;;  %800 = vmatmul.mubr.msk.bf16.vlgmr.msra.gmra.mrb[4].mxu1 %vm444_vm0, %v893_v25 }
  0x37   : > { %505 = vmatprep.mubr.bf16.mxu0 %v894_v26  ;;  %803 = vmatprep.mubr.msk.bf16.mxu1 %vm444_vm0, %v896_v27  ;;  %v592_v27 = vld [vmem:[%s1127_s22 + $0x28] sm:$0xff] }
  0x3e   : > { %506 = vmatmul.mubr.bf16.gmra.mrb[8].mxu0 %v897_v28  ;;  %804 = vmatmul.mubr.msk.bf16.gmra.mrb[8].mxu1 %vm444_vm0, %v898_v29 }
 0x101   : > { %v765_v30 = vpop.f32.mrb[0].mxu0  ;;  %v783_v31 = vpop.f32.mrb[0].mxu1 }
 0x102   : > { %v766_v32 = vpop.f32.mrb[1].mxu0  ;;  %v784_v33 = vpop.f32.mrb[1].mxu1 }
 0x103   : > { %v767_v34 = vadd.f32 %v766_v32, %v765_v30  ;;  %v768_v35 = vpop.f32.mrb[2].mxu0  ;;  %v785_v36 = vadd.f32 %v784_v33, %v783_v31  ;;  %v786_v37 = vpop.f32.mrb[2].mxu1 }
 0x104   : > { %v769_v38 = vpop.f32.mrb[3].mxu0  ;;  %v787_v39 = vpop.f32.mrb[3].mxu1 }
 0x105   : > { %v770_v40 = vadd.f32 %v769_v38, %v768_v35  ;;  %v788_v41 = vadd.f32 %v787_v39, %v786_v37  ;;  %v492_v45 = vadd.f32 %v767_v34, %v707_v42  ;;  %v516_v2 = vadd.f32 %v785_v36, %v707_v42 }
 0x107   : > { %v495_v53 = vadd.f32 %v770_v40, %v707_v42  ;;  %v519_v11 = vadd.f32 %v788_v41, %v707_v42 }
 0x109   : > { %v771_v43 = vpop.f32.mrb[4].mxu0  ;;  %v801_v44 = vpop.f32.mrb[4].mxu1 }
 0x10a   : > { %v772_v46 = vpop.f32.mrb[5].mxu0  ;;  %v556_v47 = vpop.f32.mrb[5].mxu1 }
 0x10b   : > { %v773_v49 = vadd.f32 %v772_v46, %v771_v43  ;;  %v557_v50 = vadd.f32 %v556_v47, %v492_v45  ;;  %v774_v51 = vpop.f32.mrb[6].mxu0  ;;  %v802_v52 = vpop.f32.mrb[6].mxu1 }
 0x10c   : > { %v775_v54 = vpop.f32.mrb[7].mxu0  ;;  %v559_v55 = vpop.f32.mrb[7].mxu1 }
 0x10d   : > { %v500_v57 = vadd.f32 %v773_v49, %v707_v42  ;;  %v595_v58 = vadd.f32 %v587_v48, %v557_v50  ;;  %v776_v59 = vadd.f32 %v775_v54, %v774_v51  ;;  %v560_v60 = vadd.f32 %v559_v55, %v495_v53 }
 0x10f   : > { %v565_v62 = vadd.f32 %v801_v44, %v500_v57  ;;  %603 = vst [vmem:[%s1134_s11] sm:$0xff] %v595_v58  ;;  %v503_v63 = vadd.f32 %v776_v59, %v707_v42  ;;  %v596_v0 = vadd.f32 %v588_v56, %v560_v60 }
 0x111   : > { %v597_v3 = vadd.f32 %v589_v61, %v565_v62  ;;  %v568_v4 = vadd.f32 %v802_v52, %v503_v63  ;;  %604 = vst [vmem:[%s1134_s11 + $0x8] sm:$0xff] %v596_v0  ;;  %v777_v5 = vpop.f32.mrb[8].mxu0  ;;  %v805_v6 = vpop.f32.mrb[8].mxu1 }
 0x112   : > { %v581_v8 = vadd.f32 %v805_v6, %v516_v2  ;;  %v778_v9 = vpop.f32.mrb[9].mxu0  ;;  %v572_v10 = vpop.f32.mrb[9].mxu1 }
 0x113   : > { %605 = vst [vmem:[%s1134_s11 + $0x10] sm:$0xff] %v597_v3  ;;  %v598_v12 = vadd.f32 %v590_v1, %v568_v4  ;;  %v779_v13 = vadd.f32 %v778_v9, %v777_v5  ;;  %v780_v14 = vpop.f32.mrb[10].mxu0  ;;  %v806_v15 = vpop.f32.mrb[10].mxu1 }
 0x114   : > { %v601_v17 = vadd.f32 %v593_v7, %v581_v8  ;;  %v584_v18 = vadd.f32 %v806_v15, %v519_v11  ;;  %v781_v19 = vpop.f32.mrb[11].mxu0  ;;  %v575_v20 = vpop.f32.mrb[11].mxu1 }
 0x115   : > { %606 = vst [vmem:[%s1134_s11 + $0x18] sm:$0xff] %v598_v12  ;;  %v508_v21 = vadd.f32 %v779_v13, %v707_v42  ;;  %v782_v22 = vadd.f32 %v781_v19, %v780_v14 }
 0x116   : > { %609 = vst [vmem:[%s1134_s11 + $0x30] sm:$0xff] %v601_v17  ;;  %v602_v24 = vadd.f32 %v594_v16, %v584_v18 }
 0x117   : > { %v573_v25 = vadd.f32 %v572_v10, %v508_v21  ;;  %v511_v26 = vadd.f32 %v782_v22, %v707_v42 }
 0x118   : > { %610 = vst [vmem:[%s1134_s11 + $0x38] sm:$0xff] %v602_v24 }
 0x119   : > { %v599_v28 = vadd.f32 %v591_v23, %v573_v25  ;;  %v576_v29 = vadd.f32 %v575_v20, %v511_v26 }
 0x11b   : > { %607 = vst [vmem:[%s1134_s11 + $0x20] sm:$0xff] %v599_v28  ;;  %v600_v30 = vadd.f32 %v592_v27, %v576_v29 }
 0x11d   : > { %608 = vst [vmem:[%s1134_s11 + $0x28] sm:$0xff] %v600_v30 }
 0x11e   : > { %912 = shalt.err (!%p909_p3)
}
 0x11f   : > { %s913_s12 = scalar_lea.hbm %s1152_s5, 1024  ;;  %s917_s14 = scalar_lea.hbm %s1205_s4, 2048 }
 0x120   : > { %p914_p4 = scmp.ne.s32.totalorder %s1152_s5, %s913_s12  ;;  %p918_p9 = scmp.lt.u32.totalorder %s1152_s5, %s1205_s4 }
 0x121   : > { %p919_p10 = scmp.lt.u32.totalorder %s917_s14, %s913_s12  ;;  %p921_p12 = scmp.lt.u32.totalorder %s913_s12, %s1152_s5 }
 0x122   : > { %p915_p7 = pnand %p914_p4, %p1029_p5 }
 0x123   : > { %p920_p11 = por %p919_p10, %p918_p9 }
 0x124   : > { %p916_p8 = pneg %p915_p7 }
 0x125   : > { %p922_p13 = por %p921_p12, %p920_p11 }
 0x127   : > { %p923_p0 = pnand %p922_p13, %p916_p8 }
 0x129   : > { %926 = shalt.err (!%p923_p0)
}
 0x12a   : > { %s964_s23 = smov 128   ;;  %s965_s11 = smov 8  }
 0x12b   : > { %824 = dma.vmem_to_hbm [thread:$0]  (%p1029_p5), %s1154_s28, 1024, %s1152_s5, %s1160_s19, %s964_s23, %s964_s23, %s965_s11  }
 0x12c PF: > { %p830_p1 = scmp.ge.s32.totalorder %s961_s18, 2  ;;  %s640_s27 = sand.u32 1, %s949_s15  }
 0x12d   : > { %s641_s29 = scalar_lea.sflag [#allocation3], %s640_s27 }
 0x12e   : > { %p827_p2 = pnand %p830_p1, %p1033_p6 }
 0x130   : > { %944 = dma.done.wait (!%p827_p2), %s641_s29, 1024  }
 0x131   : > { %946 = vsyncadd (!%p827_p2), %s641_s29, 4294966272  ;;  %p14_p3 = scmp.ge.s32.totalorder %s1016_s21, 4   ;;  %s1208_s15 = smov %s953_s16 }
 0x132   : > { %s1209_s16 = smov %s957_s17  ;;  %s1210_s17 = smov %s1027_s24 }
 0x133   : > { %s1211_s18 = smov %s1016_s21  ;;  %16 = sbr.rel (!%p14_p3) target bundleno = 3 (0x3), region = 74 }
 0x13a   :  { %646 = vsyncpa [#allocation3], 1 }
 0x13b   :  { %648 = vsyncpa [#allocation3 + $0x1], 1 }

// kernel: kernel_filter_forward.3
= control target key start
LH: loop header
LB: loop body
LE: loop exit
PB: predicated region body
PF: predicated region fallthrough
CT: control target
= control target key end

     0   :  { %s5545_s29 = smov 0   ;;  %s6909_s0 = inlined_call_operand.vmem [shape: bf16[2,64,1152], index: 0, kind: input, shape index: {}]   ;;  %s6910_s1 = inlined_call_operand.vmem [shape: bf16[2,64,1152], index: 1, kind: input, shape index: {}]   ;;  %s6911_s2 = inlined_call_operand.vmem [shape: bf16[1152,32], index: 2, kind: input, shape index: {}]   ;;  %s6912_s3 = inlined_call_operand.vmem [shape: f32[1,32], index: 3, kind: input, shape index: {}]   ;;  %s6913_s4 = inlined_call_operand.vmem [shape: bf16[1152,64], index: 4, kind: input, shape index: {}]   ;;  %s6914_s5 = inlined_call_operand.vmem [shape: f32[1,64], index: 5, kind: input, shape index: {}]   ;;  %s6915_s6 = inlined_call_operand.vmem [shape: bf16[32,1024], index: 6, kind: input, shape index: {}]   ;;  %s6916_s7 = inlined_call_operand.vmem [shape: bf16[32,1024], index: 7, kind: input, shape index: {}]   ;;  %s6917_s8 = inlined_call_operand.vmem [shape: f32[1,1024], index: 8, kind: input, shape index: {}]   ;;  %s6918_s9 = inlined_call_operand.vmem [shape: bf16[32,1024], index: 9, kind: input, shape index: {}]   ;;  %s6919_s10 = inlined_call_operand.vmem [shape: bf16[32,1024], index: 10, kind: input, shape index: {}]   ;;  %s6920_s11 = inlined_call_operand.vmem [shape: f32[1,1024], index: 11, kind: input, shape index: {}]   ;;  %s6921_s12 = inlined_call_operand.vmem [shape: bf16[2,64,32], index: 12, kind: output, shape index: {0}]   ;;  %s6922_s13 = inlined_call_operand.vmem [shape: f32[2,1,1024], index: 13, kind: output, shape index: {1}]   ;;  %s6923_s14 = inlined_call_operand.vmem [shape: f32[2,1,1024], index: 14, kind: output, shape index: {2}]  }
   0x1 LB: > { %s4522_s30 = sadd.s32 4294967295, %s5463_s29   ;;  %p4526_p0 = scmp.ge.s32.totalorder %s5463_s29, 1  ;;  %s5463_s29 = sphi %s5545_s29, %s25_s29  }
   0x2   : > { %p427_p1 = scmp.lt.s32.totalorder %s5463_s29, 3 }
   0x4   : > { %p428_p2 = pnand %p4526_p0, %p427_p1 }
   0x6   : > { %431 = sbr.rel (%p428_p2) target bundleno = 853 (0x355), region = 68 }
   0xd   : > { %v5257_v0 = vld [vmem:[%s6911_s2 + $0x40] sm:$0xff]   ;;  %v5261_v4 = vld [vmem:[%s6911_s2 + $0x48] sm:$0xff]   ;;  %v5265_v8 = vld [vmem:[%s6911_s2 + $0x50] sm:$0xff]   ;;  %p486_p3 = scmp.lt.s32.totalorder %s4522_s30, 1  ;;  %vm5466_vm0 = vmmov 0   ;;  %vm1714_vm1 = vcmask 257024  }
   0xe   : > { %v5258_v1 = vld [vmem:[%s6911_s2] sm:$0xff]   ;;  %4813 = vmatprep.subr.bf16.mxu0 %v5257_v0  ;;  %v5262_v5 = vld [vmem:[%s6911_s2 + $0x8] sm:$0xff]   ;;  %v5266_v9 = vld [vmem:[%s6911_s2 + $0x10] sm:$0xff]   ;;  %vm3228_vm2 = vcmask 261120   ;;  %s5468_s21 = smov 96  }
   0xf   : > { %v5259_v2 = vld [vmem:[%s6911_s2 + $0xc0] sm:$0xff]   ;;  %4814 = vmatpush3.bf16.msra.mxu0 %v5258_v1  ;;  %v5263_v6 = vld [vmem:[%s6911_s2 + $0xc8] sm:$0xff]   ;;  %v5267_v10 = vld [vmem:[%s6911_s2 + $0xd0] sm:$0xff]   ;;  %s7002_s30 = smov (!%p486_p3, %s4522_s30), 1 }
  0x10   : > { %v5260_v3 = vld [vmem:[%s6911_s2 + $0x80] sm:$0xff]   ;;  %4853 = vmatprep.subr.bf16.mxu1 %v5259_v2  ;;  %4815 = vmatprep.subr.bf16.mxu0 %v5261_v4  ;;  %v5264_v7 = vld [vmem:[%s6911_s2 + $0x88] sm:$0xff]   ;;  %v5268_v11 = vld [vmem:[%s6911_s2 + $0x90] sm:$0xff]   ;;  %s5243_s23 = smul.u32 288, %s7002_s30  ;;  %s4531_s17 = sshll.u32 %s7002_s30, 3 }
  0x11   : > { %4854 = vmatpush3.bf16.msra.mxu1 %v5260_v3  ;;  %v5269_v12 = vld [vmem:[%s6911_s2 + $0x58] sm:$0xff]   ;;  %v5273_v16 = vld [vmem:[%s6911_s2 + $0x60] sm:$0xff]   ;;  %v5277_v20 = vld [vmem:[%s6911_s2 + $0x68] sm:$0xff]   ;;  %s504_s18 = scalar_lea.vmem %s6922_s13, %s4531_s17  ;;  %s508_s25 = scalar_lea.vmem %s6923_s14, %s4531_s17 }
  0x12   : > { %4855 = vmatprep.subr.bf16.mxu1 %v5263_v6  ;;  %v5270_v13 = vld [vmem:[%s6911_s2 + $0x18] sm:$0xff]   ;;  %v5274_v17 = vld [vmem:[%s6911_s2 + $0x20] sm:$0xff]   ;;  %v5278_v21 = vld [vmem:[%s6911_s2 + $0x28] sm:$0xff]   ;;  %s5652_s20 = scalar_lea.vmem %s6909_s0, %s5243_s23 }
  0x13   : > { %4816 = vmatpush3.bf16.msra.mxu0 %v5262_v5  ;;  %v5271_v14 = vld [vmem:[%s6911_s2 + $0xd8] sm:$0xff]   ;;  %v5275_v18 = vld [vmem:[%s6911_s2 + $0xe0] sm:$0xff]   ;;  %v5279_v22 = vld [vmem:[%s6911_s2 + $0xe8] sm:$0xff]  }
  0x14   : > { %4817 = vmatprep.subr.bf16.mxu0 %v5265_v8  ;;  %v5272_v15 = vld [vmem:[%s6911_s2 + $0x98] sm:$0xff]   ;;  %v5276_v19 = vld [vmem:[%s6911_s2 + $0xa0] sm:$0xff]   ;;  %v5280_v23 = vld [vmem:[%s6911_s2 + $0xa8] sm:$0xff]  }
  0x15   : > { %4856 = vmatpush3.bf16.msra.mxu1 %v5264_v7  ;;  %v5281_v24 = vld [vmem:[%s6911_s2 + $0x70] sm:$0xff]   ;;  %v5285_v28 = vld [vmem:[%s6911_s2 + $0x78] sm:$0xff]   ;;  %v510_v31 = vld [vmem:[%s5652_s20] sm:$0xff] }
  0x16   : > { %4857 = vmatprep.subr.bf16.mxu1 %v5267_v10  ;;  %v5282_v25 = vld [vmem:[%s6911_s2 + $0x30] sm:$0xff]   ;;  %v5286_v29 = vld [vmem:[%s6911_s2 + $0x38] sm:$0xff]   ;;  %v515_v32 = vld [vmem:[%s5652_s20 + $0x24] sm:$0xff]  ;;  %v1724_v47 = vunpack.c.h.bf16 %v510_v31  ;;  %v1723_v54 = vunpack.c.l.bf16 %v510_v31 }
  0x17   : > { %4818 = vmatpush3.bf16.msra.mxu0 %v5266_v9  ;;  %v5283_v26 = vld [vmem:[%s6911_s2 + $0xf0] sm:$0xff]   ;;  %v5287_v30 = vld [vmem:[%s6911_s2 + $0xf8] sm:$0xff]   ;;  %v4535_v33 = vcombine.high %v510_v31, %v515_v32  ;;  %v4534_v35 = vcombine.low %v510_v31, %v515_v32  ;;  %v5291_v36 = vld [vmem:[%s6911_s2 + $0x140] sm:$0xff]   ;;  %v1733_v48 = vunpack.c.h.bf16 %v515_v32  ;;  %v1732_v55 = vunpack.c.l.bf16 %v515_v32 }
  0x18   : > { %4819 = vmatprep.subr.bf16.mxu0 %v5269_v12  ;;  %v5284_v27 = vld [vmem:[%s6911_s2 + $0xb0] sm:$0xff]   ;;  %v5289_v34 = vld [vmem:[%s6911_s2 + $0xb8] sm:$0xff]   ;;  %v5669_v37 = vld [vmem:[%s5652_s20 + $0x8] sm:$0xff] }
  0x19   : > { %4858 = vmatpush3.bf16.msra.mxu1 %v5268_v11  ;;  %1389 = vmatprep.mubr.bf16.mxu0 %v4535_v33  ;;  %v5672_v38 = vld [vmem:[%s5652_s20 + $0x2c] sm:$0xff]  ;;  %v1725_v39 = vunpack.c.l.bf16 %v5669_v37  ;;  %v5293_v42 = vld [vmem:[%s6911_s2 + $0x100] sm:$0xff]   ;;  %v1808_v58 = vadd.f32 %v1733_v48, %v1724_v47  ;;  %v5708_v63 = vld [vmem:[%s5652_s20 + $0x74] sm:$0xff]  ;;  %v1795_v4 = vadd.f32 %v1732_v55, %v1723_v54  ;;  %v1726_v12 = vunpack.c.h.bf16 %v5669_v37 }
  0x1a   : > { %4859 = vmatprep.subr.bf16.mxu1 %v5271_v14  ;;  %v4537_v40 = vcombine.high %v5669_v37, %v5672_v38  ;;  %v1734_v41 = vunpack.c.l.bf16 %v5672_v38  ;;  %v4536_v43 = vcombine.low %v5669_v37, %v5672_v38  ;;  %v5295_v44 = vld [vmem:[%s6911_s2 + $0x1c0] sm:$0xff]   ;;  %v5297_v49 = vld [vmem:[%s6911_s2 + $0x148] sm:$0xff]   ;;  %v5303_v61 = vld [vmem:[%s6911_s2 + $0x150] sm:$0xff]   ;;  %v1752_v2 = vunpack.c.l.bf16 %v5708_v63 }
  0x1b   : > { %4820 = vmatpush3.bf16.msra.mxu0 %v5270_v13  ;;  %v5296_v46 = vld [vmem:[%s6911_s2 + $0x180] sm:$0xff]   ;;  %v5298_v50 = vld [vmem:[%s6911_s2 + $0x108] sm:$0xff]   ;;  %v521_v62 = vld [vmem:[%s5652_s20 + $0x50] sm:$0xff]  ;;  %v1735_v13 = vunpack.c.h.bf16 %v5672_v38 }
  0x1c   : > { %4821 = vmatprep.subr.bf16.mxu0 %v5273_v16  ;;  %1454 = vmatprep.mubr.bf16.mxu1 %v4537_v40  ;;  %v1821_v45 = vadd.f32 %v1734_v41, %v1725_v39  ;;  %v5299_v51 = vld [vmem:[%s6911_s2 + $0x1c8] sm:$0xff]   ;;  %v4546_v0 = vcombine.high %v521_v62, %v5708_v63  ;;  %v1743_v1 = vunpack.c.l.bf16 %v521_v62  ;;  %v5305_v3 = vld [vmem:[%s6911_s2 + $0x110] sm:$0xff]   ;;  %v4545_v6 = vcombine.low %v521_v62, %v5708_v63  ;;  %v5309_v14 = vld [vmem:[%s6911_s2 + $0x158] sm:$0xff]  }
  0x1d   : > { %4860 = vmatpush3.bf16.msra.mxu1 %v5272_v15  ;;  %v520_v52 = vld [vmem:[%s5652_s20 + $0x48] sm:$0xff]  ;;  %v5307_v7 = vld [vmem:[%s6911_s2 + $0x1d0] sm:$0xff]   ;;  %v5310_v16 = vld [vmem:[%s6911_s2 + $0x118] sm:$0xff]   ;;  %v1753_v40 = vunpack.c.h.bf16 %v5708_v63 }
  0x1e   : > { %4861 = vmatprep.subr.bf16.mxu1 %v5275_v18  ;;  %v525_v53 = vld [vmem:[%s5652_s20 + $0x6c] sm:$0xff]  ;;  %v1742_v59 = vunpack.c.h.bf16 %v520_v52  ;;  %v1741_v5 = vunpack.c.l.bf16 %v520_v52  ;;  %v1822_v10 = vadd.f32 %v1821_v45, %v1743_v1  ;;  %v5747_v31 = vld [vmem:[%s5652_s20 + $0xbc] sm:$0xff] }
  0x1f   : > { %4822 = vmatpush3.bf16.msra.mxu0 %v5274_v17  ;;  %v4544_v56 = vcombine.high %v520_v52, %v525_v53  ;;  %v5301_v57 = vld [vmem:[%s6911_s2 + $0x188] sm:$0xff]   ;;  %v4543_v60 = vcombine.low %v520_v52, %v525_v53  ;;  %v1751_v8 = vunpack.c.h.bf16 %v525_v53  ;;  %v5308_v11 = vld [vmem:[%s6911_s2 + $0x190] sm:$0xff]   ;;  %v1750_v17 = vunpack.c.l.bf16 %v525_v53  ;;  %v5319_v39 = vld [vmem:[%s6911_s2 + $0x1e0] sm:$0xff]  }
  0x20   : > { %4823 = vmatprep.subr.bf16.mxu0 %v5277_v20  ;;  %v1809_v9 = vadd.f32 %v1808_v58, %v1742_v59  ;;  %v5727_v15 = vadd.f32 %v1822_v10, %v1752_v2  ;;  %v1796_v18 = vadd.f32 %v1795_v4, %v1741_v5  ;;  %v530_v20 = vld [vmem:[%s5652_s20 + $0x90] sm:$0xff]  ;;  %v5323_v48 = vld [vmem:[%s6911_s2 + $0x1e8] sm:$0xff]   ;;  %v545_v52 = vld [vmem:[%s5652_s20 + $0xfc] sm:$0xff] }
  0x21   : > { %4862 = vmatpush3.bf16.msra.mxu1 %v5276_v19  ;;  %v5311_v19 = vld [vmem:[%s6911_s2 + $0x1d8] sm:$0xff]   ;;  %v1759_v33 = vunpack.c.l.bf16 %v530_v20  ;;  %v5325_v55 = vld [vmem:[%s6911_s2 + $0x1a8] sm:$0xff]   ;;  %v1787_v58 = vunpack.c.h.bf16 %v545_v52  ;;  %v5331_v5 = vld [vmem:[%s6911_s2 + $0x1f0] sm:$0xff]  }
  0x22   : > { %4863 = vmatprep.subr.bf16.mxu1 %v5279_v22  ;;  %v535_v22 = vld [vmem:[%s5652_s20 + $0xb4] sm:$0xff]  ;;  %v1797_v32 = vadd.f32 %v1796_v18, %v1750_v17 }
  0x23   : > { %4824 = vmatpush3.bf16.msra.mxu0 %v5278_v21  ;;  %v1810_v21 = vadd.f32 %v1809_v9, %v1751_v8  ;;  %v5332_v9 = vld [vmem:[%s6911_s2 + $0x1b0] sm:$0xff]   ;;  %v5333_v10 = vld [vmem:[%s6911_s2 + $0x178] sm:$0xff]  }
  0x24   : > { %4825 = vmatprep.subr.bf16.mxu0 %v5281_v24  ;;  %v1834_v24 = vadd.f32 %v1735_v13, %v1726_v12  ;;  %v1798_v45 = vadd.f32 %v1797_v32, %v1759_v33  ;;  %v5334_v13 = vld [vmem:[%s6911_s2 + $0x138] sm:$0xff]   ;;  %v512_v17 = vld [vmem:[%s5652_s20 + $0x10] sm:$0xff] }
  0x25   : > { %4864 = vmatpush3.bf16.msra.mxu1 %v5280_v23  ;;  %v1760_v23 = vunpack.c.h.bf16 %v530_v20  ;;  %v517_v18 = vld [vmem:[%s5652_s20 + $0x34] sm:$0xff]  ;;  %v1727_v33 = vunpack.c.l.bf16 %v512_v17 }
  0x26   : > { %4865 = vmatprep.subr.bf16.mxu1 %v5283_v26  ;;  %v4553_v26 = vcombine.high %v530_v20, %v535_v22 }
  0x27   : > { %4826 = vmatpush3.bf16.msra.mxu0 %v5282_v25  ;;  %v1744_v25 = vunpack.c.h.bf16 %v521_v62  ;;  %v1811_v37 = vadd.f32 %v1810_v21, %v1760_v23  ;;  %v5785_v62 = vld [vmem:[%s5652_s20 + $0x104] sm:$0xff]  ;;  %v5337_v21 = vld [vmem:[%s6911_s2 + $0x1b8] sm:$0xff]   ;;  %v1737_v23 = vunpack.c.h.bf16 %v517_v18 }
  0x28   : > { %4827 = vmatprep.subr.bf16.mxu0 %v5285_v28  ;;  %v4552_v28 = vcombine.low %v530_v20, %v535_v22  ;;  %v4539_v20 = vcombine.high %v512_v17, %v517_v18 }
  0x29   : > { %4866 = vmatpush3.bf16.msra.mxu1 %v5284_v27  ;;  %v5313_v27 = vld [vmem:[%s6911_s2 + $0x198] sm:$0xff]   ;;  %v1835_v41 = vadd.f32 %v1834_v24, %v1744_v25  ;;  %v4538_v24 = vcombine.low %v512_v17, %v517_v18  ;;  %v5339_v25 = vld [vmem:[%s6911_s2 + $0x200] sm:$0xff]  }
  0x2a   : > { %4867 = vmatprep.subr.bf16.mxu1 %v5287_v30  ;;  %v5744_v30 = vld [vmem:[%s5652_s20 + $0x98] sm:$0xff] }
  0x2b   : > { %4828 = vmatpush3.bf16.msra.mxu0 %v5286_v29  ;;  %v5315_v29 = vld [vmem:[%s6911_s2 + $0x160] sm:$0xff]   ;;  %v4554_v38 = vcombine.low %v5744_v30, %v5747_v31 }
  0x2c   : > { %4893 = vmatprep.subr.bf16.mxu0 %v5291_v36  ;;  %v1769_v36 = vunpack.c.h.bf16 %v535_v22 }
  0x2d   : > { %4868 = vmatpush3.bf16.msra.mxu1 %v5289_v34  ;;  %v4555_v34 = vcombine.high %v5744_v30, %v5747_v31 }
  0x2e   : > { %1390 = vmatmul.mubr.bf16.vlgmr.msra.gmra.mrb[0].mxu0 %v4534_v35  ;;  %4933 = vmatprep.subr.bf16.mxu1 %v5295_v44  ;;  %v5317_v35 = vld [vmem:[%s6911_s2 + $0x120] sm:$0xff]   ;;  %v1768_v44 = vunpack.c.l.bf16 %v535_v22  ;;  %v1812_v47 = vadd.f32 %v1811_v37, %v1769_v36  ;;  %v1728_v22 = vunpack.c.h.bf16 %v512_v17 }
  0x2f   : > { %4894 = vmatpush3.bf16.msra.mxu0 %v5293_v42  ;;  %1397 = vmatprep.mubr.bf16.mxu0 %v4544_v56  ;;  %v5320_v42 = vld [vmem:[%s6911_s2 + $0x1a0] sm:$0xff]  }
  0x30   : > { %1455 = vmatmul.mubr.bf16.vlgmr.msra.gmra.mrb[0].mxu1 %v4536_v43  ;;  %4895 = vmatprep.subr.bf16.mxu0 %v5297_v49  ;;  %v5321_v43 = vld [vmem:[%s6911_s2 + $0x168] sm:$0xff]   ;;  %v1836_v49 = vadd.f32 %v1835_v41, %v1753_v40  ;;  %v1799_v56 = vadd.f32 %v1798_v45, %v1768_v44  ;;  %v5342_v37 = vld [vmem:[%s6913_s4 + $0x40] sm:$0xff]  }
  0x31   : > { %4934 = vmatpush3.bf16.msra.mxu1 %v5296_v46  ;;  %1462 = vmatprep.mubr.bf16.mxu1 %v4546_v0  ;;  %v5322_v46 = vld [vmem:[%s6911_s2 + $0x128] sm:$0xff]   ;;  %v1771_v0 = vunpack.c.h.bf16 %v5747_v31  ;;  %v5343_v41 = vld [vmem:[%s6913_s4] sm:$0xff]  }
  0x32   : > { %4935 = vmatprep.subr.bf16.mxu1 %v5299_v51  ;;  %v540_v51 = vld [vmem:[%s5652_s20 + $0xd8] sm:$0xff]  ;;  %v5344_v45 = vld [vmem:[%s6911_s2 + $0x208] sm:$0xff]  }
  0x33   : > { %4896 = vmatpush3.bf16.msra.mxu0 %v5298_v50  ;;  %v1762_v50 = vunpack.c.h.bf16 %v5744_v30  ;;  %v4562_v53 = vcombine.high %v540_v51, %v545_v52  ;;  %v1778_v54 = vunpack.c.h.bf16 %v540_v51  ;;  %v4561_v59 = vcombine.low %v540_v51, %v545_v52 }
  0x34   : > { %4897 = vmatprep.subr.bf16.mxu0 %v5303_v61  ;;  %v5782_v61 = vld [vmem:[%s5652_s20 + $0xe0] sm:$0xff] }
  0x35   : > { %4936 = vmatpush3.bf16.msra.mxu1 %v5301_v57  ;;  %v1777_v57 = vunpack.c.l.bf16 %v540_v51  ;;  %v1813_v63 = vadd.f32 %v1812_v47, %v1778_v54  ;;  %v1837_v1 = vadd.f32 %v1836_v49, %v1762_v50  ;;  %v4564_v2 = vcombine.high %v5782_v61, %v5785_v62  ;;  %v5345_v47 = vld [vmem:[%s6913_s4 + $0x48] sm:$0xff]  }
  0x36   : > { %1398 = vmatmul.mubr.bf16.gmra.mrb[4].mxu0 %v4543_v60  ;;  %4937 = vmatprep.subr.bf16.mxu1 %v5307_v7  ;;  %v5327_v60 = vld [vmem:[%s6911_s2 + $0x170] sm:$0xff]   ;;  %v4563_v4 = vcombine.low %v5782_v61, %v5785_v62  ;;  %v1786_v7 = vunpack.c.l.bf16 %v545_v52  ;;  %v1780_v12 = vunpack.c.h.bf16 %v5782_v61  ;;  %v527_v52 = vld [vmem:[%s5652_s20 + $0x7c] sm:$0xff] }
  0x37   : > { %4898 = vmatpush3.bf16.msra.mxu0 %v5305_v3  ;;  %1405 = vmatprep.mubr.bf16.mxu0 %v4553_v26  ;;  %v5329_v3 = vld [vmem:[%s6911_s2 + $0x130] sm:$0xff]   ;;  %v1800_v8 = vadd.f32 %v1799_v56, %v1777_v57  ;;  %v1789_v26 = vunpack.c.h.bf16 %v5785_v62  ;;  %v5347_v57 = vld [vmem:[%s6913_s4 + $0x8] sm:$0xff]  }
  0x38   : > { %1463 = vmatmul.mubr.bf16.gmra.mrb[4].mxu1 %v4545_v6  ;;  %4899 = vmatprep.subr.bf16.mxu0 %v5309_v14  ;;  %v1814_v6 = vadd.f32 %v1813_v63, %v1787_v58 }
  0x39   : > { %4938 = vmatpush3.bf16.msra.mxu1 %v5308_v11  ;;  %1470 = vmatprep.mubr.bf16.mxu1 %v4555_v34  ;;  %v1838_v11 = vadd.f32 %v1837_v1, %v1771_v0  ;;  %v1736_v34 = vunpack.c.l.bf16 %v517_v18  ;;  %v5349_v0 = vld [vmem:[%s6911_s2 + $0x210] sm:$0xff]   ;;  %v5845_v1 = vld [vmem:[%s5652_s20 + $0x60] sm:$0xff] }
  0x3a   : > { %4939 = vmatprep.subr.bf16.mxu1 %v5311_v19  ;;  %v1815_v14 = vrot.slane %v1814_v6, 4  ;;  %v1801_v19 = vadd.f32 %v1800_v8, %v1786_v7  ;;  %v1754_v8 = vunpack.c.l.bf16 %v527_v52 }
  0x3b   : > { %4900 = vmatpush3.bf16.msra.mxu0 %v5310_v16  ;;  %v5335_v16 = vld [vmem:[%s6911_s2 + $0x1f8] sm:$0xff]   ;;  %v1839_v32 = vadd.f32 %v1838_v11, %v1780_v12  ;;  %v1847_v51 = vadd.f32 %v1736_v34, %v1727_v33  ;;  %v5353_v11 = vld [vmem:[%s6913_s4 + $0x10] sm:$0xff]   ;;  %v5359_v33 = vld [vmem:[%s6911_s2 + $0x220] sm:$0xff]  }
  0x3c   : > { %4901 = vmatprep.subr.bf16.mxu0 %v5315_v29  ;;  %v1816_v29 = vadd.f32 %v1815_v14, %v1814_v6  ;;  %v5354_v12 = vld [vmem:[%s6911_s2 + $0x218] sm:$0xff]   ;;  %v1761_v14 = vunpack.c.l.bf16 %v5744_v30  ;;  %v5879_v34 = vld [vmem:[%s5652_s20 + $0xa8] sm:$0xff] }
  0x3d   : > { %4940 = vmatpush3.bf16.msra.mxu1 %v5313_v27  ;;  %v513_v27 = vld [vmem:[%s5652_s20 + $0x18] sm:$0xff]  ;;  %v1840_v50 = vadd.f32 %v1839_v32, %v1789_v26 }
  0x3e   : > { %1406 = vmatmul.mubr.bf16.gmra.mrb[8].mxu0 %v4552_v28  ;;  %4941 = vmatprep.subr.bf16.mxu1 %v5319_v39  ;;  %v518_v28 = vld [vmem:[%s5652_s20 + $0x3c] sm:$0xff]  ;;  %v1729_v36 = vunpack.c.l.bf16 %v513_v27  ;;  %v1817_v49 = vrot.slane %v1816_v29, 2 }
  0x3f   : > { %4902 = vmatpush3.bf16.msra.mxu0 %v5317_v35  ;;  %1413 = vmatprep.mubr.bf16.mxu0 %v4562_v53  ;;  %v4541_v35 = vcombine.high %v513_v27, %v518_v28  ;;  %v1738_v39 = vunpack.c.l.bf16 %v518_v28  ;;  %v4540_v40 = vcombine.low %v513_v27, %v518_v28  ;;  %v1739_v44 = vunpack.c.h.bf16 %v518_v28 }
  0x40   : > { %1471 = vmatmul.mubr.bf16.gmra.mrb[8].mxu1 %v4554_v38  ;;  %4903 = vmatprep.subr.bf16.mxu0 %v5321_v43  ;;  %v1802_v38 = vrot.slane %v1801_v19, 4  ;;  %v1730_v43 = vunpack.c.h.bf16 %v513_v27  ;;  %v1818_v6 = vadd.f32 %v1817_v49, %v1816_v29  ;;  %v1841_v7 = vrot.slane %v1840_v50, 4  ;;  %v5357_v27 = vld [vmem:[%s6913_s4 + $0x18] sm:$0xff]   ;;  %v5364_v49 = vld [vmem:[%s6911_s2 + $0x228] sm:$0xff]  }
  0x41   : > { %4942 = vmatpush3.bf16.msra.mxu1 %v5320_v42  ;;  %1478 = vmatprep.mubr.bf16.mxu1 %v4564_v2  ;;  %v1860_v42 = vadd.f32 %v1737_v23, %v1728_v22  ;;  %v5848_v2 = vld [vmem:[%s5652_s20 + $0x84] sm:$0xff]  ;;  %v1770_v28 = vunpack.c.l.bf16 %v5747_v31  ;;  %v1766_v31 = vunpack.c.h.bf16 %v5879_v34 }
  0x42   : > { %4943 = vmatprep.subr.bf16.mxu1 %v5323_v48  ;;  %v522_v48 = vld [vmem:[%s5652_s20 + $0x58] sm:$0xff]  ;;  %v1757_v17 = vunpack.c.h.bf16 %v5848_v2  ;;  %v1819_v22 = vrot.slane %v1818_v6, 1  ;;  %v1842_v23 = vadd.f32 %v1841_v7, %v1840_v50  ;;  %v1788_v7 = vunpack.c.l.bf16 %v5785_v62  ;;  %v5372_v62 = vld [vmem:[%s6913_s4 + $0x70] sm:$0xff]  }
  0x43   : > { %4904 = vmatpush3.bf16.msra.mxu0 %v5322_v46  ;;  %v5831_v46 = vadd.f32 %v1738_v39, %v1729_v36  ;;  %v1745_v53 = vunpack.c.l.bf16 %v522_v48  ;;  %v1746_v54 = vunpack.c.h.bf16 %v522_v48  ;;  %v4548_v56 = vcombine.high %v522_v48, %v527_v52  ;;  %v5883_v39 = vld [vmem:[%s5652_s20 + $0xcc] sm:$0xff] }
  0x44   : > { %4905 = vmatprep.subr.bf16.mxu0 %v5327_v60  ;;  %v4547_v58 = vcombine.low %v522_v48, %v527_v52  ;;  %v1755_v60 = vunpack.c.h.bf16 %v527_v52  ;;  %v1824_v36 = vadd.f32 %v5727_v15, %v1761_v14  ;;  %v1820_v15 = vadd.f32 %v1819_v22, %v1818_v6  ;;  %v5369_v6 = vld [vmem:[%s6911_s2 + $0x230] sm:$0xff]   ;;  %v5374_v22 = vld [vmem:[%s6911_s2 + $0x238] sm:$0xff]  }
  0x45   : > { %4944 = vmatpush3.bf16.msra.mxu1 %v5325_v55  ;;  %v1803_v55 = vadd.f32 %v1802_v38, %v1801_v19  ;;  %v1861_v63 = vadd.f32 %v1860_v42, %v1746_v54  ;;  %v5355_v19 = vld [vmem:[%s6913_s4 + $0x58] sm:$0xff]   ;;  %v5362_v42 = vld [vmem:[%s6913_s4 + $0x60] sm:$0xff]   ;;  %v1779_v52 = vunpack.c.l.bf16 %v5782_v61  ;;  %v5367_v61 = vld [vmem:[%s6913_s4 + $0x28] sm:$0xff]  }
  0x46   : > { %1414 = vmatmul.mubr.bf16.gmra.mrb[12].mxu0 %v4561_v59  ;;  %4945 = vmatprep.subr.bf16.mxu1 %v5331_v5  ;;  %v1886_v59 = vadd.f32 %v1739_v44, %v1730_v43  ;;  %v5352_v5 = vld [vmem:[%s6913_s4 + $0x50] sm:$0xff]   ;;  %v1843_v43 = vrot.slane %v1842_v23, 2 }
  0x47   : > { %4906 = vmatpush3.bf16.msra.mxu0 %v5329_v3  ;;  %1519 = vmatprep.mubr.bf16.mxu0 %v4539_v20  ;;  %v4550_v3 = vcombine.high %v5845_v1, %v5848_v2  ;;  %v532_v20 = vld [vmem:[%s5652_s20 + $0xa0] sm:$0xff] }
  0x48   : > { %1479 = vmatmul.mubr.bf16.gmra.mrb[12].mxu1 %v4563_v4  ;;  %4907 = vmatprep.subr.bf16.mxu0 %v5333_v10  ;;  %v1748_v4 = vunpack.c.h.bf16 %v5845_v1  ;;  %v4549_v10 = vcombine.low %v5845_v1, %v5848_v2  ;;  %v1764_v26 = vunpack.c.h.bf16 %v532_v20 }
  0x49   : > { %4946 = vmatpush3.bf16.msra.mxu1 %v5332_v9  ;;  %1584 = vmatprep.mubr.bf16.mxu1 %v4541_v35  ;;  %v1848_v9 = vadd.f32 %v1847_v51, %v1745_v53  ;;  %v1825_v51 = vadd.f32 %v1824_v36, %v1770_v28  ;;  %v1775_v53 = vunpack.c.h.bf16 %v5883_v39  ;;  %v5377_v36 = vld [vmem:[%s6913_s4 + $0x38] sm:$0xff]  }
  0x4a   : > { %4947 = vmatprep.subr.bf16.mxu1 %v5335_v16  ;;  %v1862_v16 = vadd.f32 %v1861_v63, %v1755_v60  ;;  %v1887_v18 = vadd.f32 %v1886_v59, %v1748_v4  ;;  %v1913_v60 = vmul.f32 0.015625, %v1820_v15  ;;  %v1844_v63 = vadd.f32 %v1843_v43, %v1842_v23 }
  0x4b   : > { %4908 = vmatpush3.bf16.msra.mxu0 %v5334_v13  ;;  %v1804_v13 = vrot.slane %v1803_v55, 2 }
  0x4c   : > { %5179 = vmatprep.subr.bf16.mxu0 %v5339_v25  ;;  %v1863_v38 = vadd.f32 %v1862_v16, %v1764_v26  ;;  %v2120_v23 = vpack.c.bf16 %v1913_v60, %v1913_v60 }
  0x4d   : > { %4948 = vmatpush3.bf16.msra.mxu1 %v5337_v21  ;;  %v537_v21 = vld [vmem:[%s5652_s20 + $0xc4] sm:$0xff]  ;;  %v1805_v35 = vadd.f32 %v1804_v13, %v1803_v55 }
  0x4e   : > { %1520 = vmatmul.mubr.bf16.vlgmr.msra.gmra.mrb[16].mxu0 %v4538_v24  ;;  %4985 = vmatprep.subr.bf16.mxu1 %v5342_v37  ;;  %v1849_v24 = vadd.f32 %v1848_v9, %v1754_v8  ;;  %v4557_v30 = vcombine.high %v532_v20, %v537_v21  ;;  %v1773_v29 = vunpack.c.h.bf16 %v537_v21  ;;  %v4556_v32 = vcombine.low %v532_v20, %v537_v21  ;;  %v5365_v55 = vld [vmem:[%s6913_s4 + $0x68] sm:$0xff]   ;;  %v5914_v8 = vld [vmem:[%s5652_s20 + $0xf0] sm:$0xff] }
  0x4f   : > { %5180 = vmatpush3.bf16.msra.mxu0 %v5339_v25  ;;  %1527 = vmatprep.mubr.bf16.mxu0 %v4548_v56  ;;  %v1763_v25 = vunpack.c.l.bf16 %v532_v20  ;;  %v1888_v37 = vadd.f32 %v1887_v18, %v1757_v17  ;;  %v1772_v44 = vunpack.c.l.bf16 %v537_v21  ;;  %v1806_v50 = vrot.slane %v1805_v35, 1  ;;  %v542_v56 = vld [vmem:[%s5652_s20 + $0xe8] sm:$0xff]  ;;  %v5917_v9 = vld [vmem:[%s5652_s20 + $0x114] sm:$0xff] }
  0x50   : > { %1585 = vmatmul.mubr.bf16.vlgmr.msra.gmra.mrb[16].mxu1 %v4540_v40  ;;  %5181 = vmatprep.subr.bf16.mxu0 %v5344_v45  ;;  %v4559_v40 = vcombine.high %v5879_v34, %v5883_v39  ;;  %v1864_v48 = vadd.f32 %v1863_v38, %v1773_v29  ;;  %v1782_v59 = vunpack.c.h.bf16 %v542_v56  ;;  %v4568_v14 = vcombine.high %v5914_v8, %v5917_v9  ;;  %v5373_v18 = vld [vmem:[%s6913_s4 + $0x30] sm:$0xff]   ;;  %v519_v29 = vld [vmem:[%s5652_s20 + $0x44] sm:$0xf] }
  0x51   : > { %4986 = vmatpush3.bf16.msra.mxu1 %v5343_v41  ;;  %1592 = vmatprep.mubr.bf16.mxu1 %v4550_v3  ;;  %v4558_v41 = vcombine.low %v5879_v34, %v5883_v39  ;;  %v1889_v54 = vadd.f32 %v1888_v37, %v1766_v31  ;;  %v1781_v3 = vunpack.c.l.bf16 %v542_v56  ;;  %v1784_v16 = vunpack.c.h.bf16 %v5914_v8  ;;  %v5944_v37 = vld [vmem:[%s5652_s20 + $0x8c] sm:$0xf] }
  0x52   : > { %4987 = vmatprep.subr.bf16.mxu1 %v5345_v47  ;;  %v5363_v47 = vld [vmem:[%s6913_s4 + $0x20] sm:$0xff]   ;;  %v4567_v17 = vcombine.low %v5914_v8, %v5917_v9  ;;  %v1793_v28 = vunpack.c.h.bf16 %v5917_v9  ;;  %v1740_v15 = vunpack.c.l.bf16 %v519_v29 }
  0x53   : > { %5182 = vmatpush3.bf16.msra.mxu0 %v5344_v45  ;;  %v1850_v45 = vadd.f32 %v1849_v24, %v1763_v25  ;;  %v1890_v13 = vadd.f32 %v1889_v54, %v1775_v53  ;;  %v514_v25 = vld [vmem:[%s5652_s20 + $0x20] sm:$0xf]  ;;  %v1747_v53 = vunpack.c.l.bf16 %v5845_v1  ;;  %v5968_v54 = vld [vmem:[%s6913_s4 + $0xc8] sm:$0xff]  }
  0x54   : > { %5183 = vmatprep.subr.bf16.mxu0 %v5349_v0 }
  0x55   : > { %4988 = vmatpush3.bf16.msra.mxu1 %v5347_v57  ;;  %v547_v57 = vld [vmem:[%s5652_s20 + $0x10c] sm:$0xff] }
  0x56   : > { %1528 = vmatmul.mubr.bf16.gmra.mrb[20].mxu0 %v4547_v58  ;;  %4989 = vmatprep.subr.bf16.mxu1 %v5352_v5  ;;  %v4566_v58 = vcombine.high %v542_v56, %v547_v57  ;;  %v1791_v4 = vunpack.c.h.bf16 %v547_v57  ;;  %v4565_v5 = vcombine.low %v542_v56, %v547_v57  ;;  %v1790_v20 = vunpack.c.l.bf16 %v547_v57 }
  0x57   : > { %5184 = vmatpush3.bf16.msra.mxu0 %v5349_v0  ;;  %1535 = vmatprep.mubr.bf16.mxu0 %v4557_v30  ;;  %v1851_v0 = vadd.f32 %v1850_v45, %v1772_v44  ;;  %v5375_v30 = vld [vmem:[%s6913_s4 + $0x78] sm:$0xff]   ;;  %v5955_v44 = vld [vmem:[%s6913_s4 + $0x80] sm:$0xff]  }
  0x58   : > { %1593 = vmatmul.mubr.bf16.gmra.mrb[20].mxu1 %v4549_v10  ;;  %5185 = vmatprep.subr.bf16.mxu0 %v5354_v12  ;;  %v1807_v10 = vadd.f32 %v1806_v50, %v1805_v35  ;;  %v4542_v35 = vcombine.low %v514_v25, %v519_v29  ;;  %v6032_v29 = vld [vmem:[%s6913_s4 + $0x98] sm:$0xff]  }
  0x59   : > { %4990 = vmatpush3.bf16.msra.mxu1 %v5353_v11  ;;  %1600 = vmatprep.mubr.bf16.mxu1 %v4559_v40  ;;  %v1865_v11 = vadd.f32 %v1864_v48, %v1782_v59  ;;  %v1852_v21 = vadd.f32 %v1851_v0, %v1781_v3  ;;  %v5949_v40 = vld [vmem:[%s6913_s4 + $0xc0] sm:$0xff]   ;;  %v5982_v0 = vld [vmem:[%s5652_s20 + $0xd4] sm:$0xf]  ;;  %v1756_v3 = vunpack.c.l.bf16 %v5848_v2 }
  0x5a   : > { %4991 = vmatprep.subr.bf16.mxu1 %v5355_v19  ;;  %v1845_v19 = vrot.slane %v1844_v63, 1  ;;  %v1912_v26 = vmul.f32 0.015625, %v1807_v10  ;;  %v5381_v48 = vld [vmem:[%s6913_s4 + $0x140] sm:$0xff]   ;;  %v6003_v2 = vld [vmem:[%s6913_s4 + $0xd0] sm:$0xff]  }
  0x5b   : > { %5186 = vmatpush3.bf16.msra.mxu0 %v5354_v12  ;;  %v1826_v12 = vadd.f32 %v1825_v51, %v1779_v52  ;;  %v1866_v24 = vadd.f32 %v1865_v11, %v1791_v4  ;;  %v1853_v31 = vadd.f32 %v1852_v21, %v1790_v20  ;;  %v5382_v51 = vld [vmem:[%s6913_s4 + $0x100] sm:$0xff]   ;;  %v1874_v4 = vadd.f32 %v5831_v46, %v1747_v53 }
  0x5c   : > { %5187 = vmatprep.subr.bf16.mxu0 %v5359_v33  ;;  %v2119_v50 = vpack.c.bf16 %v1912_v26, %v1912_v26  ;;  %v1765_v21 = vunpack.c.l.bf16 %v5879_v34  ;;  %v6027_v34 = vld [vmem:[%s6913_s4 + $0xd8] sm:$0xff]  }
  0x5d   : > { %4992 = vmatpush3.bf16.msra.mxu1 %v5357_v27  ;;  %v1827_v27 = vadd.f32 %v1826_v12, %v1788_v7  ;;  %v1867_v38 = vrot.slane %v1866_v24, 4  ;;  %v1854_v59 = vrot.slane %v1853_v31, 4  ;;  %v5991_v7 = vld [vmem:[%s5652_s20 + $0xf8] sm:$0xf]  ;;  %v1875_v20 = vadd.f32 %v1874_v4, %v1756_v3  ;;  %v6110_v4 = vld [vmem:[%s6913_s4 + $0xb0] sm:$0xff]  }
  0x5e   : > { %1536 = vmatmul.mubr.bf16.gmra.mrb[24].mxu0 %v4556_v32  ;;  %4993 = vmatprep.subr.bf16.mxu1 %v5362_v42  ;;  %v524_v32 = vld [vmem:[%s5652_s20 + $0x68] sm:$0xf]  ;;  %v1731_v42 = vunpack.c.l.bf16 %v514_v25  ;;  %v6020_v25 = vld [vmem:[%s6913_s4 + $0x110] sm:$0xff]  }
  0x5f   : > { %5188 = vmatpush3.bf16.msra.mxu0 %v5359_v33  ;;  %1543 = vmatprep.mubr.bf16.mxu0 %v4566_v58  ;;  %v1891_v33 = vadd.f32 %v1890_v13, %v1784_v16  ;;  %v4551_v43 = vcombine.low %v524_v32, %v5944_v37  ;;  %v1868_v45 = vadd.f32 %v1867_v38, %v1866_v24  ;;  %v1749_v56 = vunpack.c.l.bf16 %v524_v32  ;;  %v5973_v58 = vld [vmem:[%s6913_s4 + $0x88] sm:$0xff]  }
  0x60   : > { %1601 = vmatmul.mubr.bf16.gmra.mrb[24].mxu1 %v4558_v41  ;;  %5189 = vmatprep.subr.bf16.mxu0 %v5364_v49  ;;  %v1846_v41 = vadd.f32 %v1845_v19, %v1844_v63  ;;  %v1899_v57 = vadd.f32 %v1740_v15, %v1731_v42  ;;  %v534_v63 = vld [vmem:[%s5652_s20 + $0xb0] sm:$0xf]  ;;  %v1758_v13 = vunpack.c.l.bf16 %v5944_v37  ;;  %v1855_v19 = vadd.f32 %v1854_v59, %v1853_v31  ;;  %v6046_v31 = vld [vmem:[%s6913_s4 + $0x118] sm:$0xff]   ;;  %v6058_v15 = vld [vmem:[%s6913_s4 + $0xa0] sm:$0xff]  }
  0x61   : > { %4994 = vmatpush3.bf16.msra.mxu1 %v5363_v47  ;;  %1608 = vmatprep.mubr.bf16.mxu1 %v4568_v14  ;;  %v1828_v47 = vrot.slane %v1827_v27, 4  ;;  %v1869_v52 = vrot.slane %v1868_v45, 2  ;;  %v5995_v14 = vld [vmem:[%s5652_s20 + $0x11c] sm:$0xf]  ;;  %v1767_v24 = vunpack.c.l.bf16 %v534_v63  ;;  %v1776_v37 = vunpack.c.l.bf16 %v5982_v0  ;;  %v6092_v59 = vld [vmem:[%s6913_s4 + $0x168] sm:$0xff]   ;;  %s6256_s20 = scalar_lea.vmem %s6910_s1, %s5243_s23 }
  0x62   : > { %4995 = vmatprep.subr.bf16.mxu1 %v5365_v55  ;;  %v1915_v55 = vmul.f32 0.015625, %v1846_v41  ;;  %v1900_v12 = vadd.f32 %v1899_v57, %v1749_v56  ;;  %v4569_v46 = vcombine.low %v5991_v7, %v5995_v14  ;;  %v1856_v32 = vrot.slane %v1855_v19, 2  ;;  %6952 = vst [vmem:[#allocation4_spill] sm:$0xff] %v6092_v59 }
  0x63   : > { %5190 = vmatpush3.bf16.msra.mxu0 %v5364_v49  ;;  %v1892_v49 = vadd.f32 %v1891_v33, %v1793_v28  ;;  %v1870_v1 = vadd.f32 %v1869_v52, %v1868_v45  ;;  %v1829_v11 = vadd.f32 %v1828_v47, %v1827_v27  ;;  %v1774_v33 = vunpack.c.l.bf16 %v5883_v39  ;;  %v6053_v39 = vld [vmem:[%s6913_s4 + $0xe0] sm:$0xff]  }
  0x64   : > { %5191 = vmatprep.subr.bf16.mxu0 %v5369_v6  ;;  %v1783_v47 = vunpack.c.l.bf16 %v5914_v8  ;;  %v6079_v8 = vld [vmem:[%s6913_s4 + $0xe8] sm:$0xff]   ;;  %v1792_v57 = vunpack.c.l.bf16 %v5917_v9  ;;  %v6105_v9 = vld [vmem:[%s6913_s4 + $0xf0] sm:$0xff]  }
  0x65   : > { %4996 = vmatpush3.bf16.msra.mxu1 %v5367_v61  ;;  %v5385_v61 = vld [vmem:[%s6913_s4 + $0x148] sm:$0xff]   ;;  %v1893_v60 = vrot.slane %v1892_v49, 4  ;;  %v1871_v10 = vrot.slane %v1870_v1, 1  ;;  %v1830_v26 = vrot.slane %v1829_v11, 2 }
  0x66   : > { %1544 = vmatmul.mubr.bf16.gmra.mrb[28].mxu0 %v4565_v5  ;;  %4997 = vmatprep.subr.bf16.mxu1 %v5372_v62  ;;  %v4560_v5 = vcombine.low %v534_v63, %v5982_v0  ;;  %v6098_v63 = vld [vmem:[%s6913_s4 + $0x128] sm:$0xff]  }
  0x67   : > { %5192 = vmatpush3.bf16.msra.mxu0 %v5369_v6  ;;  %5195 = vmatprep.mubr.bf16.mxu0 %v4542_v35  ;;  %v5387_v6 = vld [vmem:[%s6913_s4 + $0x108] sm:$0xff]   ;;  %v1872_v16 = vadd.f32 %v1871_v10, %v1870_v1  ;;  %v1894_v62 = vadd.f32 %v1893_v60, %v1892_v49  ;;  %v1876_v35 = vadd.f32 %v1875_v20, %v1765_v21  ;;  %v6146_v20 = vld [vmem:[%s6913_s4 + $0x138] sm:$0xff]  }
  0x68   : > { %1609 = vmatmul.mubr.bf16.gmra.mrb[28].mxu1 %v4567_v17  ;;  %5193 = vmatprep.subr.bf16.mxu0 %v5374_v22  ;;  %v6008_v17 = vld [vmem:[%s6913_s4 + $0x90] sm:$0xff]   ;;  %v1831_v41 = vadd.f32 %v1830_v26, %v1829_v11  ;;  %6953 = vst [vmem:[#allocation5_spill] sm:$0xff] %v6098_v63  ;;  %6957 = vst [vmem:[#allocation9_spill] sm:$0xff] %v6146_v20 }
  0x69   : > { %4998 = vmatpush3.bf16.msra.mxu1 %v5373_v18  ;;  %2737 = vmatprep.mubr.bf16.mxu1 %v2120_v23  ;;  %v2122_v18 = vpack.c.bf16 %v1915_v55, %v1915_v55  ;;  %v1917_v23 = vmul.f32 0.015625, %v1872_v16  ;;  %v1895_v28 = vrot.slane %v1894_v62, 2  ;;  %v1877_v45 = vadd.f32 %v1876_v35, %v1774_v33  ;;  %v6084_v55 = vld [vmem:[%s6913_s4 + $0xa8] sm:$0xff]   ;;  %v6122_v11 = vld [vmem:[%s6913_s4 + $0x130] sm:$0xff]  }
  0x6a   : > { %4999 = vmatprep.subr.bf16.mxu1 %v5375_v30  ;;  %v1901_v30 = vadd.f32 %v1900_v12, %v1758_v13  ;;  %v1832_v52 = vrot.slane %v1831_v41, 1  ;;  %6955 = vst [vmem:[#allocation7_spill] sm:$0xff] %v6122_v11  ;;  %v6129_v13 = vld [vmem:[%s6913_s4 + $0xf8] sm:$0xff]   ;;  %v6171_v33 = vld [vmem:[%s6913_s4 + $0x1c8] sm:$0xff]  }
  0x6b   : > { %5194 = vmatpush3.bf16.msra.mxu0 %v5374_v22  ;;  %v6015_v22 = vld [vmem:[%s6913_s4 + $0x150] sm:$0xff]   ;;  %v2124_v27 = vpack.c.bf16 %v1917_v23, %v1917_v23  ;;  %v1896_v42 = vadd.f32 %v1895_v28, %v1894_v62  ;;  %v1878_v1 = vadd.f32 %v1877_v45, %v1783_v47  ;;  %v6141_v62 = vld [vmem:[%s6913_s4 + $0x178] sm:$0xff]   ;;  %v6153_v23 = vld [vmem:[%s6913_s4 + $0x1c0] sm:$0xff]  }
  0x6c   : > { %5007 = vmatprep.subr.bf16.mxu0 %v5949_v40  ;;  %v1902_v38 = vadd.f32 %v1901_v30, %v1767_v24  ;;  %v1833_v0 = vadd.f32 %v1832_v52, %v1831_v41  ;;  %6956 = vst [vmem:[#allocation8_spill] sm:$0xff] %v6141_v62  ;;  %v6158_v30 = vld [vmem:[%s6913_s4 + $0x180] sm:$0xff]   ;;  %v6189_v41 = vld [vmem:[%s6913_s4 + $0x1d0] sm:$0xff]   ;;  %v6204_v47 = vld [vmem:[%s6913_s4 + $0x1d8] sm:$0xff]  }
  0x6d   : > { %5000 = vmatpush3.bf16.msra.mxu1 %v5377_v36  ;;  %v6040_v36 = vld [vmem:[%s6913_s4 + $0x158] sm:$0xff]   ;;  %v1897_v53 = vrot.slane %v1896_v42, 1  ;;  %v6198_v45 = vld [vmem:[%s6913_s4 + $0x190] sm:$0xff]  }
  0x6e   : > { %5196 = vmatmul.mubr.bf16.vlgmr.msra.gmra.mrb[32].mxu0 %v4551_v43  ;;  %5029 = vmatprep.subr.bf16.mxu1 %v5381_v48  ;;  %v1857_v43 = vadd.f32 %v1856_v32, %v1855_v19  ;;  %v6066_v48 = vld [vmem:[%s6913_s4 + $0x160] sm:$0xff]   ;;  %v1903_v49 = vadd.f32 %v1902_v38, %v1776_v37  ;;  %v1914_v12 = vmul.f32 0.015625, %v1833_v0  ;;  %v6931_v32 = vmov 0.0   ;;  %v6177_v37 = vld [vmem:[%s6913_s4 + $0x188] sm:$0xff]  }
  0x6f   : > { %5008 = vmatpush3.bf16.msra.mxu0 %v5955_v44  ;;  %5199 = vmatprep.mubr.bf16.mxu0 %v4560_v5  ;;  %6950 = vst [vmem:[#allocation2_spill] sm:$0xff] %v6066_v48  ;;  %v1898_v3 = vadd.f32 %v1897_v53, %v1896_v42  ;;  %v6183_v38 = vld [vmem:[%s6913_s4 + $0x208] sm:$0xff]   ;;  %v6217_v53 = vld [vmem:[%s6913_s4 + $0x198] sm:$0xff]  }
  0x70   : > { %2738 = vmatmul.mubr.bf16.vlgmr.msra.gmra.mrb[32].mxu1 %v2119_v50  ;;  %5009 = vmatprep.subr.bf16.mxu0 %v5968_v54  ;;  %v1785_v50 = vunpack.c.l.bf16 %v5991_v7  ;;  %v1858_v56 = vrot.slane %v1857_v43, 1  ;;  %v6117_v7 = vld [vmem:[%s6913_s4 + $0x170] sm:$0xff]   ;;  %v2121_v21 = vpack.c.bf16 %v1914_v12, %v1914_v12  ;;  %6959 = vst [vmem:[#allocation11_spill] sm:$0xff] %v6183_v38  ;;  %6961 = vst [vmem:[#allocation13_spill] sm:$0xff] %v6217_v53  ;;  %v6242_v0 = vld [vmem:[%s6913_s4 + $0x1e8] sm:$0xff]  }
  0x71   : > { %5030 = vmatpush3.bf16.msra.mxu1 %v5382_v51  ;;  %2817 = vmatprep.mubr.bf16.mxu1 %v2124_v27  ;;  %v6072_v51 = vld [vmem:[%s6913_s4 + $0x120] sm:$0xff]   ;;  %6954 = vst [vmem:[#allocation6_spill] sm:$0xff] %v6117_v7  ;;  %6965 = vst [vmem:[#allocation17_spill] sm:$0xff] %v6242_v0  ;;  %v6268_v12 = vld [vmem:[%s6913_s4 + $0x1f0] sm:$0xff]  }
  0x72   : > { %5031 = vmatprep.subr.bf16.mxu1 %v5385_v61  ;;  %6951 = vst [vmem:[#allocation3_spill] sm:$0xff] %v6072_v51  ;;  %v1794_v61 = vunpack.c.l.bf16 %v5995_v14  ;;  %v1904_v60 = vadd.f32 %v1903_v49, %v1785_v50  ;;  %v1859_v5 = vadd.f32 %v1858_v56, %v1857_v43  ;;  %v1919_v14 = vmul.f32 0.015625, %v1898_v3  ;;  %v6165_v27 = vld [vmem:[%s6913_s4 + $0x200] sm:$0xff]   ;;  %v6210_v49 = vld [vmem:[%s6913_s4 + $0x210] sm:$0xff]   ;;  %6968 = vst [vmem:[#allocation20_spill] sm:$0xff] %v6268_v12 }
  0x73   : > { %5010 = vmatpush3.bf16.msra.mxu0 %v5973_v58  ;;  %6958 = vst [vmem:[#allocation10_spill] sm:$0xff] %v6165_v27  ;;  %6960 = vst [vmem:[#allocation12_spill] sm:$0xff] %v6210_v49  ;;  %v6223_v56 = vld [vmem:[%s6913_s4 + $0x1e0] sm:$0xff]  }
  0x74   : > { %5011 = vmatprep.subr.bf16.mxu0 %v6003_v2  ;;  %v1905_v10 = vadd.f32 %v1904_v60, %v1794_v61  ;;  %v1916_v16 = vmul.f32 0.015625, %v1859_v5  ;;  %v2126_v24 = vpack.c.bf16 %v1919_v14, %v1919_v14  ;;  %6962 = vst [vmem:[#allocation14_spill] sm:$0xff] %v6223_v56  ;;  %v6236_v60 = vld [vmem:[%s6913_s4 + $0x1a0] sm:$0xff]   ;;  %v6274_v14 = vld [vmem:[%s6913_s4 + $0x228] sm:$0xff]  }
  0x75   : > { %5032 = vmatpush3.bf16.msra.mxu1 %v5387_v6  ;;  %v1879_v6 = vadd.f32 %v1878_v1, %v1792_v57  ;;  %v6229_v57 = vld [vmem:[%s6913_s4 + $0x218] sm:$0xff]   ;;  %6964 = vst [vmem:[#allocation16_spill] sm:$0xff] %v6236_v60  ;;  %v6248_v3 = vld [vmem:[%s6913_s4 + $0x220] sm:$0xff]   ;;  %6969 = vst [vmem:[#allocation21_spill] sm:$0xff] %v6274_v14 }
  0x76   : > { %5200 = vmatmul.mubr.bf16.gmra.mrb[36].mxu0 %v4569_v46  ;;  %5033 = vmatprep.subr.bf16.mxu1 %v6015_v22  ;;  %v6134_v46 = vld [vmem:[%s6913_s4 + $0xb8] sm:$0xff]   ;;  %v1906_v19 = vrot.slane %v1905_v10, 4  ;;  %v2123_v26 = vpack.c.bf16 %v1916_v16, %v1916_v16  ;;  %6963 = vst [vmem:[#allocation15_spill] sm:$0xff] %v6229_v57  ;;  %6966 = vst [vmem:[#allocation18_spill] sm:$0xff] %v6248_v3 }
  0x77   : > { %5012 = vmatpush3.bf16.msra.mxu0 %v6008_v17  ;;  %2777 = vmatprep.mubr.bf16.mxu0 %v2122_v18  ;;  %v1880_v18 = vrot.slane %v1879_v6, 4 }
  0x78   : > { %5013 = vmatprep.subr.bf16.mxu0 %v6027_v34  ;;  %v1907_v28 = vadd.f32 %v1906_v19, %v1905_v10  ;;  %v6262_v10 = vld [vmem:[%s6913_s4 + $0x1a8] sm:$0xff]   ;;  %v550_v19 = vld [vmem:[%s6256_s20] sm:$0xff] }
  0x79   : > { %5034 = vmatpush3.bf16.msra.mxu1 %v6020_v25  ;;  %v1881_v35 = vadd.f32 %v1880_v18, %v1879_v6  ;;  %6967 = vst [vmem:[#allocation19_spill] sm:$0xff] %v6262_v10 }
  0x7a   : > { %5035 = vmatprep.subr.bf16.mxu1 %v6040_v36  ;;  %v1908_v42 = vrot.slane %v1907_v28, 2 }
  0x7b   : > { %5014 = vmatpush3.bf16.msra.mxu0 %v6032_v29  ;;  %v1882_v43 = vrot.slane %v1881_v35, 2 }
  0x7c   : > { %5015 = vmatprep.subr.bf16.mxu0 %v6053_v39  ;;  %v1909_v52 = vadd.f32 %v1908_v42, %v1907_v28  ;;  %v565_v28 = vld [vmem:[%s6256_s20 + $0x6c] sm:$0xff]  ;;  %v1922_v42 = vunpack.c.h.bf16 %v550_v19 }
  0x7d   : > { %5036 = vmatpush3.bf16.msra.mxu1 %v6046_v31  ;;  %v1883_v50 = vadd.f32 %v1882_v43, %v1881_v35  ;;  %v1921_v35 = vunpack.c.l.bf16 %v550_v19  ;;  %v551_v19 = vld [vmem:[%s6256_s20 + $0x8] sm:$0xff] }
  0x7e   : > { %5037 = vmatprep.subr.bf16.mxu1 %v6066_v48  ;;  %v1910_v61 = vrot.slane %v1909_v52, 1  ;;  %v557_v48 = vld [vmem:[%s6256_s20 + $0x34] sm:$0xff] }
  0x7f   : > { %5016 = vmatpush3.bf16.msra.mxu0 %v6058_v15  ;;  %v1884_v1 = vrot.slane %v1883_v50, 1 }
  0x80   : > { %5017 = vmatprep.subr.bf16.mxu0 %v6079_v8  ;;  %v1911_v6 = vadd.f32 %v1910_v61, %v1909_v52  ;;  %v6295_v52 = vld [vmem:[%s6913_s4 + $0x1f8] sm:$0xff]   ;;  %v6302_v61 = vld [vmem:[%s6913_s4 + $0x230] sm:$0xff]  }
  0x81   : > { %5038 = vmatpush3.bf16.msra.mxu1 %v6072_v51  ;;  %v1885_v5 = vadd.f32 %v1884_v1, %v1883_v50  ;;  %6971 = vst [vmem:[#allocation23_spill] sm:$0xff] %v6295_v52  ;;  %v570_v1 = vld [vmem:[%s6256_s20 + $0x90] sm:$0xff]  ;;  %6972 = vst [vmem:[#allocation24_spill] sm:$0xff] %v6302_v61 }
  0x82   : > { %5039 = vmatprep.subr.bf16.mxu1 %v6092_v59  ;;  %v6279_v18 = vmul.f32 0.015625, %v1911_v6 }
  0x83   : > { %5018 = vmatpush3.bf16.msra.mxu0 %v6084_v55  ;;  %v6277_v16 = vmul.f32 0.015625, %v1885_v5 }
  0x84   : > { %5019 = vmatprep.subr.bf16.mxu0 %v6105_v9 }
  0x85   : > { %5040 = vmatpush3.bf16.msra.mxu1 %v6098_v63  ;;  %v571_v63 = vld [vmem:[%s6256_s20 + $0x98] sm:$0xff] }
  0x86   : > { %5041 = vmatprep.subr.bf16.mxu1 %v6117_v7  ;;  %v6330_v7 = vld [vmem:[%s6913_s4 + $0x238] sm:$0xff]  }
  0x87   : > { %5020 = vmatpush3.bf16.msra.mxu0 %v6110_v4 }
  0x88   : > { %5021 = vmatprep.subr.bf16.mxu0 %v6129_v13 }
  0x89   : > { %5042 = vmatpush3.bf16.msra.mxu1 %v6122_v11  ;;  %v561_v11 = vld [vmem:[%s6256_s20 + $0x50] sm:$0xff] }
  0x8a   : > { %5043 = vmatprep.subr.bf16.mxu1 %v6141_v62 }
  0x8b   : > { %5022 = vmatpush3.bf16.msra.mxu0 %v6134_v46 }
  0x8c   : > { %5051 = vmatprep.subr.bf16.mxu0 %v6153_v23 }
  0x8d   : > { %5044 = vmatpush3.bf16.msra.mxu1 %v6146_v20  ;;  %v1957_v20 = vunpack.c.l.bf16 %v570_v1 }
  0x8e   : > { %2778 = vmatmul.mubr.bf16.vlgmr.msra.gmra.mrb[40].mxu0 %v2121_v21  ;;  %5203 = vmatprep.subr.bf16.mxu1 %v6931_v32  ;;  %v555_v21 = vld [vmem:[%s6256_s20 + $0x24] sm:$0xff] }
  0x8f   : > { %5052 = vmatpush3.bf16.msra.mxu0 %v6158_v30  ;;  %2857 = vmatprep.mubr.bf16.mxu0 %v2126_v24  ;;  %v6287_v24 = vld [vmem:[%s6913_s4 + $0x1b0] sm:$0xff]   ;;  %v1930_v43 = vunpack.c.l.bf16 %v555_v21  ;;  %v1931_v50 = vunpack.c.h.bf16 %v555_v21 }
  0x90   : > { %2818 = vmatmul.mubr.bf16.vlgmr.msra.gmra.mrb[36].mxu1 %v2123_v26  ;;  %5053 = vmatprep.subr.bf16.mxu0 %v6171_v33  ;;  %6970 = vst [vmem:[#allocation22_spill] sm:$0xff] %v6287_v24  ;;  %v560_v26 = vld [vmem:[%s6256_s20 + $0x48] sm:$0xff] }
  0x91   : > { %5204 = vmatpush3.bf16.msra.mxu1 %v6165_v27  ;;  %5219 = vmatprep.mubr.msk.bf16.mxu1 %vm5466_vm0, %v6931_v32  ;;  %v1939_v5 = vunpack.c.l.bf16 %v560_v26  ;;  %v1940_v6 = vunpack.c.h.bf16 %v560_v26  ;;  %v556_v21 = vld [vmem:[%s6256_s20 + $0x2c] sm:$0xff]  ;;  %v6316_v26 = vld [vmem:[%s6913_s4 + $0x1b8] sm:$0xff]   ;;  %v2006_v62 = vadd.f32 %v1931_v50, %v1922_v42 }
  0x92   : > { %5205 = vmatprep.subr.bf16.mxu1 %v6931_v32  ;;  %6973 = vst [vmem:[#allocation25_spill] sm:$0xff] %v6316_v26  ;;  %v6319_v27 = vld [vmem:[%s6256_s20 + $0xd8] sm:$0xff] }
  0x93   : > { %5054 = vmatpush3.bf16.msra.mxu0 %v6177_v37  ;;  %v2007_v42 = vadd.f32 %v2006_v62, %v1940_v6  ;;  %v566_v50 = vld [vmem:[%s6256_s20 + $0x74] sm:$0xff]  ;;  %v5437_v6 = vld [vmem:[%s6913_s4 + $0x40] sm:$0xff]  }
  0x94   : > { %5055 = vmatprep.subr.bf16.mxu0 %v6189_v41 }
  0x95   : > { %5206 = vmatpush3.bf16.msra.mxu1 %v6183_v38  ;;  %v1949_v38 = vunpack.c.h.bf16 %v565_v28 }
  0x96   : > { %5207 = vmatprep.subr.bf16.mxu1 %v6931_v32 }
  0x97   : > { %5056 = vmatpush3.bf16.msra.mxu0 %v6198_v45  ;;  %v2008_v62 = vadd.f32 %v2007_v42, %v1949_v38  ;;  %v1959_v38 = vunpack.c.l.bf16 %v571_v63  ;;  %v552_v42 = vld [vmem:[%s6256_s20 + $0x10] sm:$0xff] }
  0x98   : > { %5057 = vmatprep.subr.bf16.mxu0 %v6204_v47 }
  0x99   : > { %5208 = vmatpush3.bf16.msra.mxu1 %v6210_v49  ;;  %v1948_v49 = vunpack.c.l.bf16 %v565_v28  ;;  %v1923_v28 = vunpack.c.l.bf16 %v551_v19 }
  0x9a   : > { %5209 = vmatprep.subr.bf16.mxu1 %v6931_v32 }
  0x9b   : > { %5058 = vmatpush3.bf16.msra.mxu0 %v6217_v53 }
  0x9c   : > { %5059 = vmatprep.subr.bf16.mxu0 %v6223_v56 }
  0x9d   : > { %5210 = vmatpush3.bf16.msra.mxu1 %v6229_v57  ;;  %v6324_v57 = vld [vmem:[%s6256_s20 + $0xfc] sm:$0xff] }
  0x9e   : > { %5211 = vmatprep.subr.bf16.mxu1 %v6931_v32  ;;  %v1985_v59 = vunpack.c.h.bf16 %v6324_v57 }
  0x9f   : > { %5060 = vmatpush3.bf16.msra.mxu0 %v6236_v60  ;;  %v1984_v60 = vunpack.c.l.bf16 %v6324_v57 }
  0xa0   : > { %5061 = vmatprep.subr.bf16.mxu0 %v6242_v0  ;;  %v1942_v0 = vunpack.c.h.bf16 %v561_v11 }
  0xa1   : > { %5212 = vmatpush3.bf16.msra.mxu1 %v6248_v3  ;;  %v2125_v3 = vpack.c.bf16 %v6277_v16, %v6277_v16  ;;  %v1993_v16 = vadd.f32 %v1930_v43, %v1921_v35 }
  0xa2   : > { %5213 = vmatprep.subr.bf16.mxu1 %v6931_v32 }
  0xa3   : > { %5062 = vmatpush3.bf16.msra.mxu0 %v6262_v10  ;;  %v1933_v10 = vunpack.c.h.bf16 %v556_v21  ;;  %v1994_v43 = vadd.f32 %v1993_v16, %v1939_v5  ;;  %v576_v5 = vld [vmem:[%s6256_s20 + $0xbc] sm:$0xff] }
  0xa4   : > { %5063 = vmatprep.subr.bf16.mxu0 %v6268_v12  ;;  %v1932_v12 = vunpack.c.l.bf16 %v556_v21  ;;  %v1976_v21 = vunpack.c.h.bf16 %v6319_v27  ;;  %v6345_v16 = vld [vmem:[%s6256_s20 + $0xe0] sm:$0xff] }
  0xa5   : > { %5214 = vmatpush3.bf16.msra.mxu1 %v6274_v14  ;;  %v575_v14 = vld [vmem:[%s6256_s20 + $0xb4] sm:$0xff] }
  0xa6   : > { %5215 = vmatprep.subr.bf16.mxu1 %v6931_v32  ;;  %v1958_v32 = vunpack.c.h.bf16 %v570_v1  ;;  %v1966_v1 = vunpack.c.l.bf16 %v575_v14  ;;  %v1967_v35 = vunpack.c.h.bf16 %v575_v14  ;;  %v1995_v14 = vadd.f32 %v1994_v43, %v1948_v49 }
  0xa7   : > { %5064 = vmatpush3.bf16.msra.mxu0 %v6287_v24  ;;  %v1924_v24 = vunpack.c.h.bf16 %v551_v19  ;;  %v1975_v19 = vunpack.c.l.bf16 %v6319_v27  ;;  %v1950_v27 = vunpack.c.l.bf16 %v566_v50  ;;  %v1960_v49 = vunpack.c.h.bf16 %v571_v63 }
  0xa8   : > { %5065 = vmatprep.subr.bf16.mxu0 %v6295_v52  ;;  %v6974_v52 = vmov 0.0   ;;  %v2009_v51 = vadd.f32 %v2008_v62, %v1958_v32  ;;  %v1996_v57 = vadd.f32 %v1995_v14, %v1957_v20  ;;  %v1968_v43 = vunpack.c.l.bf16 %v576_v5 }
  0xa9   : > { %5216 = vmatpush3.bf16.msra.mxu1 %v6302_v61  ;;  %v1941_v61 = vunpack.c.l.bf16 %v561_v11  ;;  %v1951_v11 = vunpack.c.h.bf16 %v566_v50  ;;  %v1977_v63 = vunpack.c.l.bf16 %v6345_v16  ;;  %v1934_v50 = vunpack.c.l.bf16 %v557_v48 }
  0xaa   : > { %5217 = vmatprep.subr.bf16.mxu1 %v6974_v52  ;;  %v2032_v52 = vadd.f32 %v1933_v10, %v1924_v24  ;;  %v5438_v10 = vld [vmem:[%s6913_s4] sm:$0xff]   ;;  %v2010_v32 = vadd.f32 %v2009_v51, %v1967_v35  ;;  %v1997_v20 = vadd.f32 %v1996_v57, %v1966_v1  ;;  %v1925_v51 = vunpack.c.l.bf16 %v552_v42 }
  0xab   : > { %5066 = vmatpush3.bf16.msra.mxu0 %v6316_v26  ;;  %v2019_v26 = vadd.f32 %v1932_v12, %v1923_v28  ;;  %v586_v12 = vld [vmem:[%s6256_s20 + $0x104] sm:$0xff]  ;;  %v567_v35 = vld [vmem:[%s6256_s20 + $0x7c] sm:$0xff]  ;;  %v1935_v62 = vunpack.c.h.bf16 %v557_v48  ;;  %v5441_v48 = vld [vmem:[%s6913_s4 + $0x50] sm:$0xff]  }
  0xac   : > { %5082 = vmatprep.subr.bf16.mxu0 %v5437_v6  ;;  %v1969_v6 = vunpack.c.h.bf16 %v576_v5  ;;  %v2033_v56 = vadd.f32 %v2032_v52, %v1942_v0  ;;  %v5439_v0 = vld [vmem:[%s6913_s4 + $0x48] sm:$0xff]   ;;  %v2011_v28 = vadd.f32 %v2010_v32, %v1976_v21  ;;  %v1998_v1 = vadd.f32 %v1997_v20, %v1975_v19 }
  0xad   : > { %5218 = vmatpush3.bf16.msra.mxu1 %v6330_v7  ;;  %v2020_v53 = vadd.f32 %v2019_v26, %v1941_v61  ;;  %v562_v61 = vld [vmem:[%s6256_s20 + $0x58] sm:$0xff]  ;;  %v1926_v26 = vunpack.c.h.bf16 %v552_v42  ;;  %v1987_v14 = vunpack.c.h.bf16 %v586_v12  ;;  %v1952_v57 = vunpack.c.l.bf16 %v567_v35 }
  0xae   : > { %2858 = vmatmul.mubr.bf16.vlgmr.msra.gmra.mrb[44].mxu0 %v2125_v3  ;;  %5104 = vmatprep.subr.bf16.mxu1 %v5949_v40  ;;  %v1978_v3 = vunpack.c.h.bf16 %v6345_v16  ;;  %v6975_v40 = vpack.c.bf16 %v6279_v18, %v6279_v18  ;;  %v2034_v24 = vadd.f32 %v2033_v56, %v1951_v11  ;;  %v1986_v18 = vunpack.c.l.bf16 %v586_v12 }
  0xaf   : > { %5083 = vmatpush3.bf16.msra.mxu0 %v5438_v10  ;;  %v2021_v52 = vadd.f32 %v2020_v53, %v1950_v27  ;;  %v5440_v53 = vld [vmem:[%s6913_s4 + $0x8] sm:$0xff]   ;;  %v2012_v56 = vadd.f32 %v2011_v28, %v1985_v59  ;;  %v1999_v27 = vadd.f32 %v1998_v1, %v1984_v60  ;;  %v1943_v21 = vunpack.c.l.bf16 %v562_v61 }
  0xb0   : > { %5220 = vmatmul.mubr.bf16.vlgmr.msra.gmra.mrb[40].mxu1 %v6975_v40  ;;  %5084 = vmatprep.subr.bf16.mxu0 %v5439_v0  ;;  %v2035_v5 = vadd.f32 %v2034_v24, %v1960_v49  ;;  %v1944_v19 = vunpack.c.h.bf16 %v562_v61  ;;  %v6376_v10 = vld [vmem:[%s6256_s20 + $0xc4] sm:$0xff]  ;;  %v2058_v59 = vadd.f32 %v1935_v62, %v1926_v26  ;;  %v2045_v60 = vadd.f32 %v1934_v50, %v1925_v51  ;;  %v5443_v24 = vld [vmem:[%s6913_s4 + $0x58] sm:$0xff]   ;;  %v6392_v62 = vld [vmem:[%s6256_s20 + $0x10c] sm:$0xff] }
  0xb1   : > { %5105 = vmatpush3.bf16.msra.mxu1 %v5955_v44  ;;  %v2022_v16 = vadd.f32 %v2021_v52, %v1959_v38  ;;  %v572_v44 = vld [vmem:[%s6256_s20 + $0xa0] sm:$0xff]  ;;  %v1953_v38 = vunpack.c.h.bf16 %v567_v35  ;;  %v2013_v49 = vrot.slane %v2012_v56, 4  ;;  %v2000_v42 = vrot.slane %v1999_v27, 4 }
  0xb2   : > { %5106 = vmatprep.subr.bf16.mxu1 %v5968_v54  ;;  %v2036_v54 = vadd.f32 %v2035_v5, %v1969_v6  ;;  %v1962_v12 = vunpack.c.h.bf16 %v572_v44  ;;  %v2046_v0 = vadd.f32 %v2045_v60, %v1943_v21  ;;  %v1971_v61 = vunpack.c.h.bf16 %v6376_v10  ;;  %v5447_v60 = vld [vmem:[%s6913_s4 + $0x68] sm:$0xff]  }
  0xb3   : > { %5085 = vmatpush3.bf16.msra.mxu0 %v5440_v53  ;;  %v2023_v11 = vadd.f32 %v2022_v16, %v1968_v43  ;;  %v5442_v43 = vld [vmem:[%s6913_s4 + $0x10] sm:$0xff]   ;;  %v2014_v6 = vadd.f32 %v2013_v49, %v2012_v56  ;;  %v2001_v40 = vadd.f32 %v2000_v42, %v1999_v27  ;;  %v1970_v27 = vunpack.c.l.bf16 %v6376_v10  ;;  %v558_v49 = vld [vmem:[%s6256_s20 + $0x3c] sm:$0xff] }
  0xb4   : > { %5086 = vmatprep.subr.bf16.mxu0 %v5441_v48  ;;  %v2037_v32 = vadd.f32 %v2036_v54, %v1978_v3  ;;  %v6386_v3 = vld [vmem:[%s6256_s20 + $0xe8] sm:$0xff]  ;;  %v2047_v1 = vadd.f32 %v2046_v0, %v1952_v57  ;;  %v1989_v21 = vunpack.c.h.bf16 %v6392_v62  ;;  %v553_v54 = vld [vmem:[%s6256_s20 + $0x18] sm:$0xff]  ;;  %v5446_v42 = vld [vmem:[%s6913_s4 + $0x20] sm:$0xff]   ;;  %v1937_v0 = vunpack.c.h.bf16 %v558_v49 }
  0xb5   : > { %5107 = vmatpush3.bf16.msra.mxu1 %v5973_v58  ;;  %v2024_v20 = vadd.f32 %v2023_v11, %v1977_v63  ;;  %v2059_v58 = vadd.f32 %v2058_v59, %v1944_v19  ;;  %v1961_v63 = vunpack.c.l.bf16 %v572_v44  ;;  %v2015_v51 = vrot.slane %v2014_v6, 2 }
  0xb6   : > { %5108 = vmatprep.subr.bf16.mxu1 %v6003_v2  ;;  %v2038_v52 = vadd.f32 %v2037_v32, %v1987_v14  ;;  %v2002_v26 = vrot.slane %v2001_v40, 2 }
  0xb7   : > { %5087 = vmatpush3.bf16.msra.mxu0 %v5442_v43  ;;  %v2025_v2 = vadd.f32 %v2024_v20, %v1986_v18  ;;  %v2060_v28 = vadd.f32 %v2059_v58, %v1953_v38  ;;  %v5444_v18 = vld [vmem:[%s6913_s4 + $0x18] sm:$0xff]   ;;  %v2016_v14 = vadd.f32 %v2015_v51, %v2014_v6  ;;  %v2048_v48 = vadd.f32 %v2047_v1, %v1961_v63  ;;  %v563_v20 = vld [vmem:[%s6256_s20 + $0x60] sm:$0xff] }
  0xb8   : > { %5088 = vmatprep.subr.bf16.mxu0 %v5443_v24  ;;  %v2039_v35 = vrot.slane %v2038_v52, 4  ;;  %v2003_v5 = vadd.f32 %v2002_v26, %v2001_v40  ;;  %v1928_v43 = vunpack.c.h.bf16 %v553_v54  ;;  %v1936_v63 = vunpack.c.l.bf16 %v558_v49 }
  0xb9   : > { %5109 = vmatpush3.bf16.msra.mxu1 %v6008_v17  ;;  %v2026_v50 = vrot.slane %v2025_v2, 4  ;;  %v1980_v17 = vunpack.c.h.bf16 %v6386_v3  ;;  %v2061_v16 = vadd.f32 %v2060_v28, %v1962_v12  ;;  %v2017_v44 = vrot.slane %v2016_v14, 1  ;;  %v5449_v28 = vld [vmem:[%s6913_s4 + $0x70] sm:$0xff]  }
  0xba   : > { %5110 = vmatprep.subr.bf16.mxu1 %v6027_v34  ;;  %v5445_v34 = vld [vmem:[%s6913_s4 + $0x60] sm:$0xff]   ;;  %v2040_v53 = vadd.f32 %v2039_v35, %v2038_v52  ;;  %v2004_v11 = vrot.slane %v2003_v5, 1  ;;  %v1927_v12 = vunpack.c.l.bf16 %v553_v54  ;;  %v2049_v58 = vadd.f32 %v2048_v48, %v1970_v27  ;;  %v5451_v48 = vld [vmem:[%s6913_s4 + $0x78] sm:$0xff]  }
  0xbb   : > { %5089 = vmatpush3.bf16.msra.mxu0 %v5444_v18  ;;  %v2027_v56 = vadd.f32 %v2026_v50, %v2025_v2  ;;  %v2062_v19 = vadd.f32 %v2061_v16, %v1971_v61  ;;  %v2018_v10 = vadd.f32 %v2017_v44, %v2016_v14  ;;  %v5448_v61 = vld [vmem:[%s6913_s4 + $0x28] sm:$0xff]   ;;  %v1988_v35 = vunpack.c.l.bf16 %v6392_v62  ;;  %v5450_v62 = vld [vmem:[%s6913_s4 + $0x30] sm:$0xff]  }
  0xbc   : > { %5090 = vmatprep.subr.bf16.mxu0 %v5445_v34  ;;  %v2041_v57 = vrot.slane %v2040_v53, 2  ;;  %v2005_v24 = vadd.f32 %v2004_v11, %v2003_v5  ;;  %v573_v50 = vld [vmem:[%s6256_s20 + $0xa8] sm:$0xff]  ;;  %v1945_v18 = vunpack.c.l.bf16 %v563_v20  ;;  %v2084_v16 = vadd.f32 %v1937_v0, %v1928_v43  ;;  %v583_v11 = vld [vmem:[%s6256_s20 + $0xf0] sm:$0xff] }
  0xbd   : > { %5111 = vmatpush3.bf16.msra.mxu1 %v6032_v29  ;;  %v2028_v38 = vrot.slane %v2027_v56, 2  ;;  %v1979_v29 = vunpack.c.l.bf16 %v6386_v3  ;;  %v2063_v59 = vadd.f32 %v2062_v19, %v1980_v17  ;;  %v2111_v6 = vmul.f32 0.015625, %v2018_v10  ;;  %v568_v3 = vld [vmem:[%s6256_s20 + $0x84] sm:$0xff] }
  0xbe   : > { %5112 = vmatprep.subr.bf16.mxu1 %v6053_v39  ;;  %v2042_v39 = vadd.f32 %v2041_v57, %v2040_v53  ;;  %v1955_v17 = vunpack.c.h.bf16 %v568_v3  ;;  %v2110_v34 = vmul.f32 0.015625, %v2005_v24  ;;  %v1954_v27 = vunpack.c.l.bf16 %v568_v3 }
  0xbf   : > { %5091 = vmatpush3.bf16.msra.mxu0 %v5446_v42  ;;  %v2029_v32 = vadd.f32 %v2028_v38, %v2027_v56  ;;  %v2064_v40 = vadd.f32 %v2063_v59, %v1989_v21  ;;  %v2906_v51 = vpack.c.bf16 %v2111_v6, %v2111_v6  ;;  %v2050_v5 = vadd.f32 %v2049_v58, %v1979_v29  ;;  %v578_v56 = vld [vmem:[%s6256_s20 + $0xcc] sm:$0xff]  ;;  %v554_v6 = vld [vmem:[%s6256_s20 + $0x20] ss:$36 sps:$4 sm:$0xff]  }
  0xc0   : > { %5092 = vmatprep.subr.bf16.mxu0 %v5447_v60  ;;  %v2043_v52 = vrot.slane %v2042_v39, 1  ;;  %v2071_v44 = vadd.f32 %v1936_v63, %v1927_v12  ;;  %v1963_v57 = vunpack.c.l.bf16 %v573_v50  ;;  %v1973_v10 = vunpack.c.h.bf16 %v578_v56  ;;  %v588_v60 = vld [vmem:[%s6256_s20 + $0x114] sm:$0xff] }
  0xc1   : > { %5113 = vmatpush3.bf16.msra.mxu1 %v6058_v15  ;;  %v2030_v2 = vrot.slane %v2029_v32, 1  ;;  %v2065_v26 = vrot.slane %v2064_v40, 4  ;;  %v1946_v15 = vunpack.c.h.bf16 %v563_v20  ;;  %2946 = vmatprep.mubr.bf16.mxu0 %v2906_v51  ;;  %v2051_v42 = vadd.f32 %v2050_v5, %v1988_v35  ;;  %v5452_v20 = vld [vmem:[%s6913_s4 + $0x38] sm:$0xff]  }
  0xc2   : > { %5114 = vmatprep.subr.bf16.mxu1 %v6079_v8  ;;  %v2044_v8 = vadd.f32 %v2043_v52, %v2042_v39  ;;  %v2072_v38 = vadd.f32 %v2071_v44, %v1945_v18  ;;  %v2905_v59 = vpack.c.bf16 %v2110_v34, %v2110_v34  ;;  %v1972_v39 = vunpack.c.l.bf16 %v578_v56 }
  0xc3   : > { %5093 = vmatpush3.bf16.msra.mxu0 %v5448_v61  ;;  %v2031_v1 = vadd.f32 %v2030_v2, %v2029_v32  ;;  %v2066_v14 = vadd.f32 %v2065_v26, %v2064_v40  ;;  %v2085_v19 = vadd.f32 %v2084_v16, %v1946_v15  ;;  %v1982_v43 = vunpack.c.h.bf16 %v583_v11  ;;  %v5453_v40 = vld [vmem:[%s6913_s4 + $0x140] sm:$0xff]   ;;  %v5456_v16 = vld [vmem:[%s6913_s4 + $0x108] sm:$0xff]  }
  0xc4   : > { %5094 = vmatprep.subr.bf16.mxu0 %v5449_v28  ;;  %v2113_v53 = vmul.f32 0.015625, %v2044_v8  ;;  %v2073_v32 = vadd.f32 %v2072_v38, %v1954_v27  ;;  %v1981_v58 = vunpack.c.l.bf16 %v583_v11  ;;  %v2052_v52 = vrot.slane %v2051_v42, 4  ;;  %v5454_v15 = vld [vmem:[%s6913_s4 + $0x100] sm:$0xff]  }
  0xc5   : > { %5115 = vmatpush3.bf16.msra.mxu1 %v6084_v55  ;;  %v2067_v21 = vrot.slane %v2066_v14, 2  ;;  %v1964_v55 = vunpack.c.h.bf16 %v573_v50  ;;  %v2112_v54 = vmul.f32 0.015625, %v2031_v1  ;;  %v2086_v29 = vadd.f32 %v2085_v19, %v1955_v17  ;;  %v564_v1 = vld [vmem:[%s6256_s20 + $0x68] ss:$36 sps:$4 sm:$0xff]  }
  0xc6   : > { %5116 = vmatprep.subr.bf16.mxu1 %v6105_v9  ;;  %v2908_v9 = vpack.c.bf16 %v2113_v53, %v2113_v53  ;;  %v2074_v0 = vadd.f32 %v2073_v32, %v1963_v57  ;;  %v1991_v2 = vunpack.c.h.bf16 %v588_v60  ;;  %v1990_v63 = vunpack.c.l.bf16 %v588_v60  ;;  %v6982_v60 = vld [vmem:[#allocation17_spill] sm:$0xff] }
  0xc7   : > { %5095 = vmatpush3.bf16.msra.mxu0 %v5450_v62  ;;  %v2068_v49 = vadd.f32 %v2067_v21, %v2066_v14  ;;  %v1929_v51 = vunpack.c.l.bf16 %v554_v6  ;;  %v1938_v26 = vunpack.c.h.bf16 %v554_v6  ;;  %v2053_v18 = vadd.f32 %v2052_v52, %v2051_v42  ;;  %v574_v21 = vld [vmem:[%s6256_s20 + $0xb0] ss:$36 sps:$4 sm:$0xff]   ;;  %v584_v42 = vld [vmem:[%s6256_s20 + $0xf8] ss:$36 sps:$4 sm:$0xff]   ;;  %v6985_v6 = vld [vmem:[#allocation19_spill] sm:$0xff]  ;;  %s4804_s20 = sshll.u32 %s7002_s30, 5 }
  0xc8   : > { %5096 = vmatprep.subr.bf16.mxu0 %v5451_v48  ;;  %2986 = vmatprep.mubr.bf16.mxu1 %v2908_v9  ;;  %v2075_v61 = vadd.f32 %v2074_v0, %v1972_v39  ;;  %v1947_v5 = vunpack.c.l.bf16 %v564_v1  ;;  %v1956_v27 = vunpack.c.h.bf16 %v564_v1  ;;  %v1965_v19 = vunpack.c.l.bf16 %v574_v21  ;;  %v6976_v9 = vld [vmem:[#allocation2_spill] sm:$0xff]  ;;  %v6988_v52 = vld [vmem:[#allocation8_spill] sm:$0xff]  ;;  %s6562_s19 = scalar_lea.vmem %s6921_s12, %s4804_s20 }
  0xc9   : > { %5117 = vmatpush3.bf16.msra.mxu1 %v6110_v4  ;;  %v2069_v12 = vrot.slane %v2068_v49, 1  ;;  %v2087_v4 = vadd.f32 %v2086_v29, %v1964_v55  ;;  %v2097_v17 = vadd.f32 %v1938_v26, %v1929_v51  ;;  %v1983_v32 = vunpack.c.l.bf16 %v584_v42  ;;  %v6991_v26 = vld [vmem:[#allocation9_spill] sm:$0xff] }
  0xca   : > { %5118 = vmatprep.subr.bf16.mxu1 %v6129_v13  ;;  %v2907_v13 = vpack.c.bf16 %v2112_v54, %v2112_v54  ;;  %v2076_v35 = vadd.f32 %v2075_v61, %v1981_v58  ;;  %v6977_v54 = vld [vmem:[#allocation13_spill] sm:$0xff]  ;;  %v1992_v58 = vunpack.c.h.bf16 %v584_v42 }
  0xcb   : > { %5097 = vmatpush3.bf16.msra.mxu0 %v5452_v20  ;;  %v2070_v24 = vadd.f32 %v2069_v12, %v2068_v49  ;;  %v2088_v3 = vadd.f32 %v2087_v4, %v1973_v10  ;;  %v2098_v44 = vadd.f32 %v2097_v17, %v1947_v5  ;;  %v6979_v49 = vld [vmem:[#allocation3_spill] sm:$0xff]  ;;  %v6980_v10 = vld [vmem:[#allocation4_spill] sm:$0xff]  ;;  %v6983_v12 = vld [vmem:[#allocation5_spill] sm:$0xff] }
  0xcc   : > { %5126 = vmatprep.subr.bf16.mxu0 %v5453_v40  ;;  %v2077_v14 = vadd.f32 %v2076_v35, %v1990_v63  ;;  %v6986_v40 = vld [vmem:[#allocation20_spill] sm:$0xff]  ;;  %v6990_v63 = vld [vmem:[#allocation23_spill] sm:$0xff] }
  0xcd   : > { %5119 = vmatpush3.bf16.msra.mxu1 %v6134_v46  ;;  %v2115_v28 = vmul.f32 0.015625, %v2070_v24  ;;  %v2089_v8 = vadd.f32 %v2088_v3, %v1982_v43  ;;  %v5455_v46 = vld [vmem:[%s6913_s4 + $0x148] sm:$0xff]   ;;  %v6984_v43 = vld [vmem:[#allocation6_spill] sm:$0xff] }
  0xce   : > { %2947 = vmatmul.mubr.bf16.vlgmr.msra.gmra.mrb[48].mxu0 %v2905_v59  ;;  %5148 = vmatprep.subr.bf16.mxu1 %v6153_v23  ;;  %v2078_v53 = vrot.slane %v2077_v14, 4  ;;  %v6987_v24 = vld [vmem:[#allocation7_spill] sm:$0xff]  ;;  %v6989_v3 = vld [vmem:[#allocation22_spill] sm:$0xff] }
  0xcf   : > { %5127 = vmatpush3.bf16.msra.mxu0 %v5454_v15  ;;  %v2910_v23 = vpack.c.bf16 %v2115_v28, %v2115_v28  ;;  %v2090_v50 = vadd.f32 %v2089_v8, %v1991_v2  ;;  %v6992_v15 = vmov 0.0   ;;  %v6993_v8 = vld [vmem:[#allocation25_spill] sm:$0xff]  ;;  %v6997_v5 = vld [vmem:[#allocation15_spill] sm:$0xff] }
  0xd0   : > { %2987 = vmatmul.mubr.bf16.vlgmr.msra.gmra.mrb[44].mxu1 %v2907_v13  ;;  %5128 = vmatprep.subr.bf16.mxu0 %v5455_v46  ;;  %v2079_v56 = vadd.f32 %v2078_v53, %v2077_v14  ;;  %v6994_v46 = vld [vmem:[#allocation10_spill] sm:$0xff] }
  0xd1   : > { %5149 = vmatpush3.bf16.msra.mxu1 %v6158_v30  ;;  %3026 = vmatprep.mubr.bf16.mxu0 %v2910_v23  ;;  %v2091_v34 = vrot.slane %v2090_v50, 4  ;;  %v6995_v23 = vld [vmem:[#allocation11_spill] sm:$0xff] }
  0xd2   : > { %5150 = vmatprep.subr.bf16.mxu1 %v6171_v33  ;;  %v2054_v33 = vrot.slane %v2053_v18, 2  ;;  %v2080_v55 = vrot.slane %v2079_v56, 2 }
  0xd3   : > { %5129 = vmatpush3.bf16.msra.mxu0 %v5456_v16  ;;  %v2092_v30 = vadd.f32 %v2091_v34, %v2090_v50  ;;  %v6501_v16 = vld [vmem:[%s6912_s3] ss:$0 sm:$0xff] }
  0xd4   : > { %5130 = vmatprep.subr.bf16.mxu0 %v6015_v22 }
  0xd5   : > { %5151 = vmatpush3.bf16.msra.mxu1 %v6177_v37  ;;  %v2093_v62 = vrot.slane %v2092_v30, 2  ;;  %v2055_v37 = vadd.f32 %v2054_v33, %v2053_v18  ;;  %v6996_v18 = vld [vmem:[#allocation12_spill] sm:$0xff] }
  0xd6   : > { %5152 = vmatprep.subr.bf16.mxu1 %v6189_v41  ;;  %v2099_v41 = vadd.f32 %v2098_v44, %v1956_v27  ;;  %v6998_v44 = vld [vmem:[#allocation18_spill] sm:$0xff] }
  0xd7   : > { %5131 = vmatpush3.bf16.msra.mxu0 %v6020_v25  ;;  %v2094_v22 = vadd.f32 %v2093_v62, %v2092_v30  ;;  %v2081_v25 = vadd.f32 %v2080_v55, %v2079_v56  ;;  %v2056_v57 = vrot.slane %v2055_v37, 1 }
  0xd8   : > { %5132 = vmatprep.subr.bf16.mxu0 %v6040_v36  ;;  %v6978_v36 = vld [vmem:[#allocation14_spill] sm:$0xff]  ;;  %v2100_v38 = vadd.f32 %v2099_v41, %v1965_v19 }
  0xd9   : > { %5153 = vmatpush3.bf16.msra.mxu1 %v6198_v45  ;;  %v2095_v48 = vrot.slane %v2094_v22, 1  ;;  %v1974_v45 = vunpack.c.h.bf16 %v574_v21  ;;  %v2082_v29 = vrot.slane %v2081_v25, 1  ;;  %v2057_v39 = vadd.f32 %v2056_v57, %v2055_v37 }
  0xda   : > { %5154 = vmatprep.subr.bf16.mxu1 %v6204_v47 }
  0xdb   : > { %5133 = vmatpush3.bf16.msra.mxu0 %v6046_v31  ;;  %v2096_v11 = vadd.f32 %v2095_v48, %v2094_v22  ;;  %v6981_v31 = vld [vmem:[#allocation16_spill] sm:$0xff]  ;;  %v2101_v20 = vadd.f32 %v2100_v38, %v1974_v45  ;;  %v2083_v4 = vadd.f32 %v2082_v29, %v2081_v25  ;;  %v2114_v13 = vmul.f32 0.015625, %v2057_v39  ;;  %v3115_v45 = vld [vmem:[%s6915_s6] sm:$0xff] }
  0xdc   : > { %5134 = vmatprep.subr.bf16.mxu0 %v6976_v9  ;;  %v3119_v38 = vld [vmem:[%s6915_s6 + $0x20] sm:$0xff] }
  0xdd   : > { %5155 = vmatpush3.bf16.msra.mxu1 %v6977_v54  ;;  %v2117_v47 = vmul.f32 0.015625, %v2096_v11  ;;  %v2102_v0 = vadd.f32 %v2101_v20, %v1983_v32  ;;  %v2116_v2 = vmul.f32 0.015625, %v2083_v4  ;;  %v2909_v61 = vpack.c.bf16 %v2114_v13, %v2114_v13  ;;  %v6999_v54 = vld [vmem:[#allocation21_spill] sm:$0xff]  ;;  %v6525_v20 = vld [vmem:[%s6915_s6 + $0x10] sm:$0xff] }
  0xde   : > { %5156 = vmatprep.subr.bf16.mxu1 %v6978_v36  ;;  %v4743_v32 = vcombine.high %v3115_v45, %v3119_v38 }
  0xdf   : > { %5135 = vmatpush3.bf16.msra.mxu0 %v6979_v49  ;;  %v2912_v59 = vpack.c.bf16 %v2117_v47, %v2117_v47  ;;  %v2103_v51 = vadd.f32 %v2102_v0, %v1992_v58  ;;  %v2911_v28 = vpack.c.bf16 %v2116_v2, %v2116_v2 }
  0xe0   : > { %5136 = vmatprep.subr.bf16.mxu0 %v6980_v10  ;;  %v7000_v10 = vld [vmem:[#allocation24_spill] sm:$0xff] }
  0xe1   : > { %5157 = vmatpush3.bf16.msra.mxu1 %v6981_v31  ;;  %3066 = vmatprep.mubr.bf16.mxu1 %v2912_v59  ;;  %v2104_v1 = vrot.slane %v2103_v51, 4 }
  0xe2   : > { %5158 = vmatprep.subr.bf16.mxu1 %v6982_v60 }
  0xe3   : > { %5137 = vmatpush3.bf16.msra.mxu0 %v6983_v12  ;;  %v2105_v35 = vadd.f32 %v2104_v1, %v2103_v51  ;;  %v6530_v12 = vld [vmem:[%s6915_s6 + $0x30] sm:$0xff] }
  0xe4   : > { %5138 = vmatprep.subr.bf16.mxu0 %v6984_v43 }
  0xe5   : > { %5159 = vmatpush3.bf16.msra.mxu1 %v6985_v6  ;;  %v2106_v50 = vrot.slane %v2105_v35, 2  ;;  %v3123_v6 = vld [vmem:[%s6915_s6 + $0x40] sm:$0xff] }
  0xe6   : > { %5160 = vmatprep.subr.bf16.mxu1 %v6986_v40  ;;  %v3127_v40 = vld [vmem:[%s6915_s6 + $0x60] sm:$0xff] }
  0xe7   : > { %5139 = vmatpush3.bf16.msra.mxu0 %v6987_v24  ;;  %v2107_v14 = vadd.f32 %v2106_v50, %v2105_v35  ;;  %v4746_v24 = vcombine.low %v6525_v20, %v6530_v12 }
  0xe8   : > { %5140 = vmatprep.subr.bf16.mxu0 %v6988_v52  ;;  %v5467_v52 = vmov 0  }
  0xe9   : > { %5161 = vmatpush3.bf16.msra.mxu1 %v6989_v3  ;;  %v2108_v27 = vrot.slane %v2107_v14, 1 }
  0xea   : > { %5162 = vmatprep.subr.bf16.mxu1 %v6990_v63  ;;  %v4742_v63 = vcombine.low %v3115_v45, %v3119_v38 }
  0xeb   : > { %5141 = vmatpush3.bf16.msra.mxu0 %v6991_v26  ;;  %v2109_v25 = vadd.f32 %v2108_v27, %v2107_v14 }
  0xec   : > { %5223 = vmatprep.subr.bf16.mxu0 %v6992_v15 }
  0xed   : > { %5163 = vmatpush3.bf16.msra.mxu1 %v6993_v8  ;;  %v2118_v42 = vmul.f32 0.015625, %v2109_v25 }
  0xee   : > { %3027 = vmatmul.mubr.bf16.vlgmr.msra.gmra.mrb[52].mxu0 %v2909_v61  ;;  %v4751_v61 = vcombine.high %v3123_v6, %v3127_v40 }
  0xef   : > { %5224 = vmatpush3.bf16.msra.mxu0 %v6994_v46  ;;  %5239 = vmatprep.mubr.msk.bf16.mxu0 %vm5466_vm0, %v6992_v15  ;;  %v2913_v0 = vpack.c.bf16 %v2118_v42, %v2118_v42 }
  0xf0   : > { %3067 = vmatmul.mubr.bf16.vlgmr.msra.gmra.mrb[48].mxu1 %v2911_v28  ;;  %5225 = vmatprep.subr.bf16.mxu0 %v6992_v15  ;;  %v4750_v28 = vcombine.low %v3123_v6, %v3127_v40 }
  0xf1   : > { %3264 = vmatprep.mubr.bf16.mxu1 %v5467_v52 }
  0xf3   : > { %5226 = vmatpush3.bf16.msra.mxu0 %v6995_v23 }
  0xf4   : > { %5227 = vmatprep.subr.bf16.mxu0 %v6992_v15 }
  0xf7   : > { %5228 = vmatpush3.bf16.msra.mxu0 %v6996_v18 }
  0xf8   : > { %5229 = vmatprep.subr.bf16.mxu0 %v6992_v15 }
  0xfb   : > { %5230 = vmatpush3.bf16.msra.mxu0 %v6997_v5 }
  0xfc   : > { %5231 = vmatprep.subr.bf16.mxu0 %v6992_v15 }
  0xff   : > { %5232 = vmatpush3.bf16.msra.mxu0 %v6998_v44 }
 0x100   : > { %5233 = vmatprep.subr.bf16.mxu0 %v6992_v15 }
 0x101   : > { %v4829_v17 = vpop.f32.mrb[0].mxu0 }
 0x102   : > { %v4830_v34 = vpop.f32.mrb[1].mxu0 }
 0x103   : > { %v4831_v53 = vadd.f32 %v4830_v34, %v4829_v17  ;;  %v4832_v30 = vpop.f32.mrb[2].mxu0  ;;  %v4869_v33 = vpop.f32.mrb[0].mxu1  ;;  %5234 = vmatpush3.bf16.msra.mxu0 %v6999_v54 }
 0x104   : > { %v4833_v56 = vpop.f32.mrb[3].mxu0  ;;  %v4870_v55 = vpop.f32.mrb[1].mxu1  ;;  %5235 = vmatprep.subr.bf16.mxu0 %v6992_v15 }
 0x105   : > { %v1392_v62 = vadd.f32 %v4831_v53, %v6501_v16  ;;  %v4834_v21 = vadd.f32 %v4833_v56, %v4832_v30  ;;  %v4871_v22 = vadd.f32 %v4870_v55, %v4869_v33  ;;  %v4872_v37 = vpop.f32.mrb[2].mxu1 }
 0x106   : > { %v4873_v41 = vpop.f32.mrb[3].mxu1 }
 0x107   : > { %v1395_v19 = vadd.f32 %v4834_v21, %v6501_v16  ;;  %v6507_v48 = vadd.f32 %v4871_v22, %v1392_v62  ;;  %v4874_v9 = vadd.f32 %v4873_v41, %v4872_v37  ;;  %5236 = vmatpush3.bf16.msra.mxu0 %v7000_v10 }
 0x108   : > { %5237 = vmatprep.subr.bf16.mxu0 %v6992_v15 }
 0x109   : > { %v6510_v11 = vadd.f32 %v4874_v9, %v1395_v19  ;;  %v4835_v36 = vpop.f32.mrb[4].mxu0 }
 0x10a   : > { %v4836_v57 = vpop.f32.mrb[5].mxu0 }
 0x10b   : > { %v4837_v49 = vadd.f32 %v4836_v57, %v4835_v36  ;;  %v4838_v47 = vpop.f32.mrb[6].mxu0  ;;  %v4875_v29 = vpop.f32.mrb[4].mxu1  ;;  %5238 = vmatpush3.bf16.msra.mxu0 %v6330_v7  ;;  %v4747_v7 = vcombine.high %v6525_v20, %v6530_v12  ;;  %v3721_v20 = vld [vmem:[%s6919_s10 + $0x60] sm:$0xff] }
 0x10c   : > { %v4839_v31 = vpop.f32.mrb[7].mxu0  ;;  %v4876_v39 = vpop.f32.mrb[5].mxu1  ;;  %3479 = vmatprep.subr.bf16.mxu0 %v4743_v32 }
 0x10d   : > { %v1400_v59 = vadd.f32 %v4837_v49, %v6501_v16  ;;  %v4840_v60 = vadd.f32 %v4839_v31, %v4838_v47  ;;  %v4877_v43 = vadd.f32 %v4876_v39, %v4875_v29  ;;  %v4878_v4 = vpop.f32.mrb[6].mxu1 }
 0x10e   : > { %v4879_v58 = vpop.f32.mrb[7].mxu1  ;;  %5240 = vmatmul.mubr.bf16.vlgmr.msra.gmra.mrb[56].mxu0 %v2913_v0 }
 0x10f   : > { %v1403_v13 = vadd.f32 %v4840_v60, %v6501_v16  ;;  %v6543_v2 = vadd.f32 %v4877_v43, %v1400_v59  ;;  %v4880_v3 = vadd.f32 %v4879_v58, %v4878_v4  ;;  %3480 = vmatpush1.bf16.msra.mxu0 %v4742_v63  ;;  %3511 = vmatprep.mubr.bf16.mxu0 %v5467_v52 }
 0x110   : > { %3481 = vmatprep.subr.bf16.mxu0 %v4751_v61 }
 0x111   : > { %v6545_v51 = vadd.f32 %v4880_v3, %v1403_v13  ;;  %v4841_v26 = vpop.f32.mrb[8].mxu0 }
 0x112   : > { %v4842_v15 = vpop.f32.mrb[9].mxu0 }
 0x113   : > { %v4843_v8 = vadd.f32 %v4842_v15, %v4841_v26  ;;  %v4844_v1 = vpop.f32.mrb[10].mxu0  ;;  %v4881_v46 = vpop.f32.mrb[8].mxu1  ;;  %3482 = vmatpush1.bf16.msra.mxu0 %v4750_v28 }
 0x114   : > { %v4845_v35 = vpop.f32.mrb[11].mxu0  ;;  %v4882_v23 = vpop.f32.mrb[9].mxu1  ;;  %3561 = vmatprep.subr.bf16.mxu0 %v4747_v7 }
 0x115   : > { %v1408_v50 = vadd.f32 %v4843_v8, %v6501_v16  ;;  %v4846_v18 = vadd.f32 %v4845_v35, %v4844_v1  ;;  %v4883_v14 = vadd.f32 %v4882_v23, %v4881_v46  ;;  %v4884_v5 = vpop.f32.mrb[10].mxu1 }
 0x116   : > { %v4885_v17 = vpop.f32.mrb[11].mxu1 }
 0x117   : > { %v1411_v34 = vadd.f32 %v4846_v18, %v6501_v16  ;;  %v1473_v53 = vadd.f32 %v4883_v14, %v1408_v50  ;;  %v4886_v30 = vadd.f32 %v4885_v17, %v4884_v5 }
 0x119   : > { %v1476_v33 = vadd.f32 %v4886_v30, %v1411_v34  ;;  %v4847_v56 = vpop.f32.mrb[12].mxu0 }
 0x11a   : > { %v4848_v27 = vpop.f32.mrb[13].mxu0 }
 0x11b   : > { %v4849_v44 = vadd.f32 %v4848_v27, %v4847_v56  ;;  %v4850_v62 = vpop.f32.mrb[14].mxu0  ;;  %v4887_v21 = vpop.f32.mrb[12].mxu1 }
 0x11c   : > { %v4851_v55 = vpop.f32.mrb[15].mxu0  ;;  %v4888_v19 = vpop.f32.mrb[13].mxu1 }
 0x11d   : > { %v1416_v22 = vadd.f32 %v4849_v44, %v6501_v16  ;;  %v4852_v37 = vadd.f32 %v4851_v55, %v4850_v62  ;;  %v4889_v41 = vadd.f32 %v4888_v19, %v4887_v21  ;;  %v4890_v9 = vpop.f32.mrb[14].mxu1 }
 0x11e   : > { %v4891_v54 = vpop.f32.mrb[15].mxu1 }
 0x11f   : > { %v1419_v25 = vadd.f32 %v4852_v37, %v6501_v16  ;;  %v1481_v36 = vadd.f32 %v4889_v41, %v1416_v22  ;;  %v4892_v57 = vadd.f32 %v4891_v54, %v4890_v9 }
 0x121   : > { %v1484_v45 = vadd.f32 %v4892_v57, %v1419_v25  ;;  %v4909_v38 = vpop.f32.mrb[16].mxu0 }
 0x122   : > { %v4910_v49 = vpop.f32.mrb[17].mxu0 }
 0x123   : > { %v4911_v47 = vadd.f32 %v4910_v49, %v4909_v38  ;;  %v4912_v42 = vpop.f32.mrb[18].mxu0  ;;  %v4949_v10 = vpop.f32.mrb[16].mxu1 }
 0x124   : > { %v4913_v29 = vpop.f32.mrb[19].mxu0  ;;  %v4950_v60 = vpop.f32.mrb[17].mxu1 }
 0x125   : > { %v1522_v31 = vadd.f32 %v4911_v47, %v6507_v48  ;;  %v4914_v59 = vadd.f32 %v4913_v29, %v4912_v42  ;;  %v4951_v39 = vadd.f32 %v4950_v60, %v4949_v10  ;;  %v4952_v32 = vpop.f32.mrb[18].mxu1 }
 0x126   : > { %v4953_v4 = vpop.f32.mrb[19].mxu1 }
 0x127   : > { %v1525_v43 = vadd.f32 %v4914_v59, %v6510_v11  ;;  %v4954_v16 = vadd.f32 %v4953_v4, %v4952_v32  ;;  %v1587_v6 = vadd.f32 %v4951_v39, %v1522_v31 }
 0x129   : > { %v4915_v40 = vpop.f32.mrb[20].mxu0  ;;  %v1590_v58 = vadd.f32 %v4954_v16, %v1525_v43 }
 0x12a   : > { %v4916_v13 = vpop.f32.mrb[21].mxu0 }
 0x12b   : > { %v4917_v0 = vadd.f32 %v4916_v13, %v4915_v40  ;;  %v4918_v3 = vpop.f32.mrb[22].mxu0  ;;  %v4955_v63 = vpop.f32.mrb[20].mxu1 }
 0x12c   : > { %v4919_v61 = vpop.f32.mrb[23].mxu0  ;;  %v4956_v48 = vpop.f32.mrb[21].mxu1 }
 0x12d   : > { %v1530_v26 = vadd.f32 %v4917_v0, %v6543_v2  ;;  %v4920_v15 = vadd.f32 %v4919_v61, %v4918_v3  ;;  %v4957_v28 = vadd.f32 %v4956_v48, %v4955_v63  ;;  %v4958_v8 = vpop.f32.mrb[22].mxu1 }
 0x12e   : > { %v4959_v46 = vpop.f32.mrb[23].mxu1 }
 0x12f   : > { %v1533_v1 = vadd.f32 %v4920_v15, %v6545_v51  ;;  %v4960_v11 = vadd.f32 %v4959_v46, %v4958_v8  ;;  %v1595_v7 = vadd.f32 %v4957_v28, %v1530_v26  ;;  %v3136_v26 = vld [vmem:[%s6916_s7 + $0x20] sm:$0xff] }
 0x131   : > { %v4921_v35 = vpop.f32.mrb[24].mxu0  ;;  %v1598_v50 = vadd.f32 %v4960_v11, %v1533_v1 }
 0x132   : > { %v4922_v23 = vpop.f32.mrb[25].mxu0 }
 0x133   : > { %v4923_v18 = vadd.f32 %v4922_v23, %v4921_v35  ;;  %v4924_v14 = vpop.f32.mrb[26].mxu0  ;;  %v4961_v5 = vpop.f32.mrb[24].mxu1 }
 0x134   : > { %v4925_v17 = vpop.f32.mrb[27].mxu0  ;;  %v4962_v56 = vpop.f32.mrb[25].mxu1 }
 0x135   : > { %v1538_v34 = vadd.f32 %v4923_v18, %v1473_v53  ;;  %v4926_v30 = vadd.f32 %v4925_v17, %v4924_v14  ;;  %v4963_v2 = vadd.f32 %v4962_v56, %v4961_v5  ;;  %v4964_v27 = vpop.f32.mrb[26].mxu1  ;;  %v3140_v17 = vld [vmem:[%s6916_s7 + $0x40] sm:$0xff] }
 0x136   : > { %v4965_v62 = vpop.f32.mrb[27].mxu1 }
 0x137   : > { %v1541_v44 = vadd.f32 %v4926_v30, %v1476_v33  ;;  %v4966_v21 = vadd.f32 %v4965_v62, %v4964_v27  ;;  %v1603_v55 = vadd.f32 %v4963_v2, %v1538_v34  ;;  %v3144_v34 = vld [vmem:[%s6916_s7 + $0x60] sm:$0xff] }
 0x138   : > { %v6595_v30 = vld [vmem:[%s6914_s5] sm:$0x1]  ;;  %v4731_v56 = vcombine.high %v3140_v17, %v3144_v34  ;;  %v4730_v27 = vcombine.low %v3140_v17, %v3144_v34 }
 0x139   : > { %v4927_v51 = vpop.f32.mrb[28].mxu0  ;;  %v1606_v37 = vadd.f32 %v4966_v21, %v1541_v44 }
 0x13a   : > { %v4928_v22 = vpop.f32.mrb[29].mxu0 }
 0x13b   : > { %v4929_v19 = vadd.f32 %v4928_v22, %v4927_v51  ;;  %v4930_v41 = vpop.f32.mrb[30].mxu0  ;;  %v4967_v9 = vpop.f32.mrb[28].mxu1  ;;  %v6601_v22 = vld [vmem:[%s6916_s7 + $0x8] sm:$0xff] }
 0x13c   : > { %v4931_v25 = vpop.f32.mrb[31].mxu0  ;;  %v4968_v38 = vpop.f32.mrb[29].mxu1 }
 0x13d   : > { %v1546_v54 = vadd.f32 %v4929_v19, %v1481_v36  ;;  %v4932_v57 = vadd.f32 %v4931_v25, %v4930_v41  ;;  %v4969_v53 = vadd.f32 %v4968_v38, %v4967_v9  ;;  %v4970_v49 = vpop.f32.mrb[30].mxu1 }
 0x13e   : > { %v4971_v42 = vpop.f32.mrb[31].mxu1 }
 0x13f   : > { %v1549_v47 = vadd.f32 %v4932_v57, %v1484_v45  ;;  %v4972_v10 = vadd.f32 %v4971_v42, %v4970_v49  ;;  %v1611_v33 = vadd.f32 %v4969_v53, %v1546_v54 }
 0x141   : > { %v5197_v29 = vpop.f32.mrb[32].mxu0  ;;  %v1614_v31 = vadd.f32 %v4972_v10, %v1549_v47 }
 0x142   : > { %v1660_v59 = vadd.f32 %v5197_v29, %v1595_v7  ;;  %v1651_v60 = vpop.f32.mrb[33].mxu0 }
 0x143   : > { %v1652_v36 = vadd.f32 %v1651_v60, %v1587_v6  ;;  %v5198_v39 = vpop.f32.mrb[34].mxu0  ;;  %v5001_v32 = vpop.f32.mrb[32].mxu1  ;;  %v3132_v6 = vld [vmem:[%s6916_s7] sm:$0xff] }
 0x144   : > { %v4807_v45 = vpack.c.bf16 %v1660_v59, %v1660_v59  ;;  %v1663_v43 = vadd.f32 %v5198_v39, %v1598_v50  ;;  %v1654_v4 = vpop.f32.mrb[35].mxu0  ;;  %v5002_v16 = vpop.f32.mrb[33].mxu1  ;;  %v4722_v48 = vcombine.low %v3132_v6, %v3136_v26  ;;  %v3125_v39 = vld [vmem:[%s6915_s6 + $0x50] sm:$0xff] }
 0x145   : > { %v4805_v40 = vpack.c.bf16 %v1652_v36, %v1652_v36  ;;  %v1655_v13 = vadd.f32 %v1654_v4, %v1590_v58  ;;  %v5003_v0 = vadd.f32 %v5002_v16, %v5001_v32  ;;  %v5004_v3 = vpop.f32.mrb[34].mxu1  ;;  %v4723_v58 = vcombine.high %v3132_v6, %v3136_v26  ;;  %v3129_v32 = vld [vmem:[%s6915_s6 + $0x70] sm:$0xff] }
 0x146   : > { %1717 = vst.msk [vmem:[%s6562_s19 + $0x8] sm:$0xf] %vm1714_vm1, %v4807_v45  ;;  %v4808_v63 = vpack.c.bf16 %v1663_v43, %v1663_v43  ;;  %v5005_v61 = vpop.f32.mrb[35].mxu1  ;;  %v4755_v16 = vcombine.high %v3125_v39, %v3129_v32 }
 0x147   : > { %1715 = vst.msk [vmem:[%s6562_s19] sm:$0xf] %vm1714_vm1, %v4805_v40  ;;  %v4806_v15 = vpack.c.bf16 %v1655_v13, %v1655_v13  ;;  %3232 = vmatprep.subr.bf16.mxu1 %v4723_v58  ;;  %v2740_v62 = vadd.f32 %v5003_v0, %v6595_v30  ;;  %v4754_v40 = vcombine.low %v3125_v39, %v3129_v32  ;;  %v3709_v13 = vld [vmem:[%s6919_s10] sm:$0xff]  ;;  %v3146_v39 = vld [vmem:[%s6916_s7 + $0x70] sm:$0xff] }
 0x148   : > { %1718 = vst.msk [vmem:[%s6562_s19 + $0xc] sm:$0xf] %vm1714_vm1, %v4808_v63  ;;  %3233 = vmatpush1.bf16.msra.mxu1 %v4722_v48  ;;  %v3713_v0 = vld [vmem:[%s6919_s10 + $0x20] sm:$0xff] }
 0x149   : > { %1716 = vst.msk [vmem:[%s6562_s19 + $0x4] sm:$0xf] %vm1714_vm1, %v4806_v15  ;;  %v5201_v28 = vpop.f32.mrb[36].mxu0  ;;  %3234 = vmatprep.subr.bf16.mxu1 %v4731_v56  ;;  %v4763_v3 = vcombine.high %v3709_v13, %v3713_v0  ;;  %v3717_v63 = vld [vmem:[%s6919_s10 + $0x40] sm:$0xff]  ;;  %v4762_v12 = vcombine.low %v3709_v13, %v3713_v0 }
 0x14a   : > { %v1676_v8 = vadd.f32 %v5201_v28, %v1611_v33  ;;  %v1667_v1 = vpop.f32.mrb[37].mxu0  ;;  %v4770_v61 = vcombine.low %v3717_v63, %v3721_v20 }
 0x14b   : > { %v1668_v46 = vadd.f32 %v1667_v1, %v1603_v55  ;;  %v5202_v11 = vpop.f32.mrb[38].mxu0 }
 0x14c   : > { %v4811_v7 = vpack.c.bf16 %v1676_v8, %v1676_v8  ;;  %v1679_v35 = vadd.f32 %v5202_v11, %v1614_v31  ;;  %v1670_v23 = vpop.f32.mrb[39].mxu0  ;;  %3235 = vmatpush1.bf16.msra.mxu1 %v4730_v27 }
 0x14d   : > { %v4809_v50 = vpack.c.bf16 %v1668_v46, %v1668_v46  ;;  %v1671_v18 = vadd.f32 %v1670_v23, %v1606_v37  ;;  %v6606_v37 = vld [vmem:[%s6916_s7 + $0x28] sm:$0xff] }
 0x14e   : > { %1721 = vst.msk [vmem:[%s6562_s19 + $0x18] sm:$0xf] %vm1714_vm1, %v4811_v7  ;;  %v4812_v14 = vpack.c.bf16 %v1679_v35, %v1679_v35  ;;  %v4724_v9 = vcombine.low %v6601_v22, %v6606_v37  ;;  %v4725_v25 = vcombine.high %v6601_v22, %v6606_v37  ;;  %v3135_v37 = vld [vmem:[%s6916_s7 + $0x18] sm:$0xff] }
 0x14f   : > { %1719 = vst.msk [vmem:[%s6562_s19 + $0x10] sm:$0xf] %vm1714_vm1, %v4809_v50  ;;  %v4810_v5 = vpack.c.bf16 %v1671_v18, %v1671_v18 }
 0x150   : > { %1722 = vst.msk [vmem:[%s6562_s19 + $0x1c] sm:$0xf] %vm1714_vm1, %v4812_v14  ;;  %3273 = vmatprep.subr.bf16.mxu1 %v4725_v25 }
 0x151   : > { %1720 = vst.msk [vmem:[%s6562_s19 + $0x14] sm:$0xf] %vm1714_vm1, %v4810_v5 }
 0x161   : > { %v5023_v2 = vpop.f32.mrb[40].mxu0 }
 0x162   : > { %v5024_v44 = vpop.f32.mrb[41].mxu0 }
 0x163   : > { %v5025_v21 = vadd.f32 %v5024_v44, %v5023_v2  ;;  %v5026_v55 = vpop.f32.mrb[42].mxu0  ;;  %v5045_v51 = vpop.f32.mrb[36].mxu1 }
 0x164   : > { %v5027_v19 = vpop.f32.mrb[43].mxu0  ;;  %v5046_v41 = vpop.f32.mrb[37].mxu1  ;;  %v6655_v55 = vld [vmem:[%s6919_s10 + $0x18] sm:$0xff] }
 0x165   : > { %v2780_v54 = vadd.f32 %v5025_v21, %v2740_v62  ;;  %v5047_v57 = vadd.f32 %v5046_v41, %v5045_v51  ;;  %v5048_v38 = vpop.f32.mrb[38].mxu1  ;;  %v6650_v21 = vld [vmem:[%s6919_s10 + $0x30] sm:$0xff]  ;;  %v6662_v19 = vld [vmem:[%s6919_s10 + $0x38] sm:$0xff] }
 0x166   : > { %v5049_v53 = vpop.f32.mrb[39].mxu1  ;;  %v4768_v25 = vcombine.low %v6655_v55, %v6662_v19  ;;  %v3145_v38 = vld [vmem:[%s6916_s7 + $0x68] sm:$0xff] }
 0x167   : > { %v2820_v49 = vadd.f32 %v5047_v57, %v2780_v54  ;;  %v3141_v57 = vld [vmem:[%s6916_s7 + $0x48] sm:$0xff] }
 0x181   : > { %v5067_v47 = vpop.f32.mrb[44].mxu0 }
 0x182   : > { %v5068_v42 = vpop.f32.mrb[45].mxu0 }
 0x183   : > { %v5069_v10 = vadd.f32 %v5068_v42, %v5067_v47  ;;  %v5070_v33 = vpop.f32.mrb[46].mxu0  ;;  %v2899_v29 = vpop.f32.mrb[40].mxu1 }
 0x184   : > { %v5071_v31 = vpop.f32.mrb[47].mxu0  ;;  %v5221_v59 = vpop.f32.mrb[41].mxu1  ;;  %v4733_v33 = vcombine.high %v3141_v57, %v3145_v38 }
 0x185   : > { %v2860_v60 = vadd.f32 %v5069_v10, %v2820_v49  ;;  %v2902_v36 = vpop.f32.mrb[42].mxu1  ;;  %v3138_v31 = vld [vmem:[%s6916_s7 + $0x30] sm:$0xff]  ;;  %v4732_v59 = vcombine.low %v3141_v57, %v3145_v38  ;;  %v3697_v38 = vld [vmem:[%s6918_s9 + $0x20] sm:$0xff] }
 0x186   : > { %v5222_v45 = vpop.f32.mrb[43].mxu1  ;;  %v3142_v36 = vld [vmem:[%s6916_s7 + $0x50] sm:$0xff] }
 0x187   : > { %v2900_v43 = vadd.f32 %v2899_v29, %v2860_v60  ;;  %v3134_v29 = vld [vmem:[%s6916_s7 + $0x10] sm:$0xff]  ;;  %v4735_v22 = vcombine.high %v3142_v36, %v3146_v39  ;;  %v4734_v45 = vcombine.low %v3142_v36, %v3146_v39 }
 0x188   : > { %v4727_v60 = vcombine.high %v3134_v29, %v3138_v31  ;;  %v4726_v32 = vcombine.low %v3134_v29, %v3138_v31  ;;  %v3701_v29 = vld [vmem:[%s6918_s9 + $0x40] sm:$0xff]  ;;  %v3695_v36 = vld [vmem:[%s6918_s9 + $0x10] sm:$0xff] }
 0x189   : > { %v6618_v4 = vpack.c.bf16 %v2900_v43, %v2900_v43 }
 0x18b   : > { %4758 = vmatmul.mubr.msk.bf16.vlgmr.msra.gmra.mrb[60].mxu0 %vm3228_vm2, %v6618_v4 }
 0x18c   : > { %3562 = vmatpush1.bf16.msra.mxu0 %v4746_v24  ;;  %3593 = vmatprep.mubr.bf16.mxu0 %v5467_v52  ;;  %v4771_v24 = vcombine.high %v3717_v63, %v3721_v20  ;;  %v3120_v63 = vld [vmem:[%s6915_s6 + $0x28] sm:$0xff] }
 0x18d   : > { %3563 = vmatprep.subr.bf16.mxu0 %v4755_v16  ;;  %v3143_v16 = vld [vmem:[%s6916_s7 + $0x58] sm:$0xff] }
 0x190   : > { %3564 = vmatpush1.bf16.msra.mxu0 %v4754_v40  ;;  %v3147_v40 = vld [vmem:[%s6916_s7 + $0x78] sm:$0xff] }
 0x191   : > { %3811 = vmatprep.subr.bf16.mxu0 %v4763_v3  ;;  %v4737_v0 = vcombine.high %v3143_v16, %v3147_v40  ;;  %v3116_v3 = vld [vmem:[%s6915_s6 + $0x8] sm:$0xff]  ;;  %v4736_v20 = vcombine.low %v3143_v16, %v3147_v40 }
 0x193   : > { %4760 = vmatmul.mubr.msk.bf16.vlgmr.msra.gmra.mrb[64].mxu0 %vm3228_vm2, %v6618_v4 }
 0x194   : > { %3812 = vmatpush1.bf16.msra.mxu0 %v4762_v12  ;;  %3843 = vmatprep.mubr.bf16.mxu0 %v5467_v52  ;;  %v4745_v12 = vcombine.high %v3116_v3, %v3120_v63 }
 0x195   : > { %3813 = vmatprep.subr.bf16.mxu0 %v4771_v24  ;;  %v3124_v24 = vld [vmem:[%s6915_s6 + $0x48] sm:$0xff] }
 0x198   : > { %3814 = vmatpush1.bf16.msra.mxu0 %v4770_v61  ;;  %v3128_v61 = vld [vmem:[%s6915_s6 + $0x68] sm:$0xff] }
 0x1a1   : > { %v5098_v6 = vpop.f32.mrb[48].mxu0 }
 0x1a2   : > { %v5099_v26 = vpop.f32.mrb[49].mxu0 }
 0x1a3   : > { %v5100_v15 = vadd.f32 %v5099_v26, %v5098_v6  ;;  %v5101_v48 = vpop.f32.mrb[50].mxu0  ;;  %v5120_v58 = vpop.f32.mrb[44].mxu1  ;;  %v4744_v6 = vcombine.low %v3116_v3, %v3120_v63  ;;  %v4753_v26 = vcombine.high %v3124_v24, %v3128_v61  ;;  %v3704_v3 = vld [vmem:[%s6918_s9 + $0x58] sm:$0xff] }
 0x1a4   : > { %v5102_v28 = vpop.f32.mrb[51].mxu0  ;;  %v5121_v8 = vpop.f32.mrb[45].mxu1  ;;  %v3122_v48 = vld [vmem:[%s6915_s6 + $0x38] sm:$0xff] }
 0x1a5   : > { %v2949_v1 = vadd.f32 %v5100_v15, %v6595_v30  ;;  %v5122_v46 = vadd.f32 %v5121_v8, %v5120_v58  ;;  %v5123_v11 = vpop.f32.mrb[46].mxu1  ;;  %v6645_v30 = vld [vmem:[%s6919_s10 + $0x10] sm:$0xff]  ;;  %v3118_v15 = vld [vmem:[%s6915_s6 + $0x18] sm:$0xff]  ;;  %v4752_v58 = vcombine.low %v3124_v24, %v3128_v61 }
 0x1a6   : > { %v5124_v7 = vpop.f32.mrb[47].mxu1  ;;  %v4767_v51 = vcombine.high %v6645_v30, %v6650_v21  ;;  %v4766_v41 = vcombine.low %v6645_v30, %v6650_v21  ;;  %v4749_v28 = vcombine.high %v3118_v15, %v3122_v48  ;;  %v3126_v8 = vld [vmem:[%s6915_s6 + $0x58] sm:$0xff]  ;;  %v3705_v30 = vld [vmem:[%s6918_s9 + $0x60] sm:$0xff]  ;;  %v3702_v21 = vld [vmem:[%s6918_s9 + $0x48] sm:$0xff] }
 0x1a7   : > { %v2989_v35 = vadd.f32 %v5122_v46, %v2949_v1  ;;  %v3130_v1 = vld [vmem:[%s6915_s6 + $0x78] sm:$0xff]  ;;  %v4748_v46 = vcombine.low %v3118_v15, %v3122_v48  ;;  %v3710_v7 = vld [vmem:[%s6919_s10 + $0x8] sm:$0xff] }
 0x1a8   : > { %3893 = vmatprep.subr.bf16.mxu0 %v4767_v51  ;;  %v4757_v11 = vcombine.high %v3126_v8, %v3130_v1  ;;  %v3708_v63 = vld [vmem:[%s6918_s9 + $0x78] sm:$0xff] }
 0x1c1   : > { %v5142_v23 = vpop.f32.mrb[52].mxu0 }
 0x1c2   : > { %v5143_v50 = vpop.f32.mrb[53].mxu0 }
 0x1c3   : > { %v5144_v18 = vadd.f32 %v5143_v50, %v5142_v23  ;;  %v5145_v14 = vpop.f32.mrb[54].mxu0  ;;  %v5164_v5 = vpop.f32.mrb[48].mxu1  ;;  %v4756_v23 = vcombine.low %v3126_v8, %v3130_v1  ;;  %v4796_v8 = vcombine.low %v3704_v3, %v3708_v63  ;;  %v3645_v1 = vlaneseq }
 0x1c4   : > { %v5146_v17 = vpop.f32.mrb[55].mxu0  ;;  %v5165_v34 = vpop.f32.mrb[49].mxu1  ;;  %v3722_v14 = vld [vmem:[%s6919_s10 + $0x68] sm:$0xff] }
 0x1c5   : > { %v3029_v56 = vadd.f32 %v5144_v18, %v2989_v35  ;;  %v5166_v2 = vadd.f32 %v5165_v34, %v5164_v5  ;;  %v5167_v27 = vpop.f32.mrb[50].mxu1  ;;  %v3714_v35 = vld [vmem:[%s6919_s10 + $0x28] sm:$0xff] }
 0x1c6   : > { %v5168_v44 = vpop.f32.mrb[51].mxu1  ;;  %v4765_v50 = vcombine.high %v3710_v7, %v3714_v35  ;;  %v3718_v18 = vld [vmem:[%s6919_s10 + $0x48] sm:$0xff]  ;;  %v4764_v5 = vcombine.low %v3710_v7, %v3714_v35  ;;  %v3723_v27 = vld [vmem:[%s6919_s10 + $0x70] sm:$0xff]  ;;  %v3643_v7 = vld [vmem:[%s6917_s8] sm:$0xff] }
 0x1c7   : > { %v3069_v62 = vadd.f32 %v5166_v2, %v3029_v56  ;;  %v4773_v17 = vcombine.high %v3718_v18, %v3722_v14  ;;  %v4772_v34 = vcombine.low %v3718_v18, %v3722_v14  ;;  %v4769_v56 = vcombine.high %v6655_v55, %v6662_v19  ;;  %v3719_v2 = vld [vmem:[%s6919_s10 + $0x50] sm:$0xff]  ;;  %v3724_v44 = vld [vmem:[%s6919_s10 + $0x78] sm:$0xff]  ;;  %v3706_v55 = vld [vmem:[%s6918_s9 + $0x68] sm:$0xff] }
 0x1e1   : > { %v3108_v54 = vpop.f32.mrb[56].mxu0 }
 0x1e2   : > { %v3109_v53 = vadd.f32 %v3108_v54, %v3069_v62  ;;  %v5241_v49 = vpop.f32.mrb[57].mxu0  ;;  %v4775_v62 = vcombine.high %v3719_v2, %v3723_v27  ;;  %v3693_v54 = vld [vmem:[%s6918_s9] sm:$0xff] }
 0x1e3   : > { %v3111_v47 = vpop.f32.mrb[58].mxu0  ;;  %v3698_v49 = vld [vmem:[%s6918_s9 + $0x28] sm:$0xff] }
 0x1e4   : > { %v3131_v42 = vpack.c.bf16 %v3109_v53, %v3109_v53  ;;  %v5242_v10 = vpop.f32.mrb[59].mxu0  ;;  %v3694_v53 = vld [vmem:[%s6918_s9 + $0x8] sm:$0xff]  ;;  %v4774_v47 = vcombine.low %v3719_v2, %v3723_v27 }
 0x1e5   : > { %v4783_v10 = vcombine.high %v3693_v54, %v3697_v38 }
 0x1e6   : > { %3726 = vrot.lane.b32.xlu0 %v3131_v42, %s5468_s21  ;;  %4738 = vmatmul.mubr.msk.bf16.vlgmr.msra.gmra.mrb[52].mxu1 %vm3228_vm2, %v3131_v42 }
 0x1e7   : > { %3274 = vmatpush1.bf16.msra.mxu1 %v4724_v9  ;;  %3305 = vmatprep.mubr.bf16.mxu1 %v5467_v52  ;;  %v3139_v9 = vld [vmem:[%s6916_s7 + $0x38] sm:$0xff] }
 0x1e8   : > { %3275 = vmatprep.subr.bf16.mxu1 %v4733_v33  ;;  %v4729_v43 = vcombine.high %v3135_v37, %v3139_v9  ;;  %v4728_v13 = vcombine.low %v3135_v37, %v3139_v9  ;;  %v4785_v33 = vcombine.high %v3694_v53, %v3698_v49  ;;  %v3700_v37 = vld [vmem:[%s6918_s9 + $0x38] sm:$0xff] }
 0x1ea   : > { %3976 = vrot.lane.b32.xlu0 %v6618_v4, %s5468_s21 }
 0x1eb   : > { %3276 = vmatpush1.bf16.msra.mxu1 %v4732_v59  ;;  %v4791_v59 = vcombine.high %v3701_v29, %v3705_v30 }
 0x1ec   : > { %3314 = vmatprep.subr.bf16.mxu1 %v4727_v60  ;;  %v4793_v60 = vcombine.high %v3702_v21, %v3706_v55 }
 0x1ee   : > { %4739 = vmatmul.mubr.msk.bf16.vlgmr.msra.gmra.mrb[56].mxu1 %vm3228_vm2, %v3131_v42 }
 0x1ef   : > { %3315 = vmatpush1.bf16.msra.mxu1 %v4726_v32  ;;  %3346 = vmatprep.mubr.bf16.mxu1 %v5467_v52  ;;  %v3699_v32 = vld [vmem:[%s6918_s9 + $0x30] sm:$0xff] }
 0x1f0   : > { %3316 = vmatprep.subr.bf16.mxu1 %v4735_v22  ;;  %v3696_v22 = vld [vmem:[%s6918_s9 + $0x18] sm:$0xff]  ;;  %v4787_v16 = vcombine.high %v3695_v36, %v3699_v32 }
 0x1f1   : > { %v4789_v40 = vcombine.high %v3696_v22, %v3700_v37  ;;  %v4788_v24 = vcombine.low %v3696_v22, %v3700_v37 }
 0x1f3   : > { %3317 = vmatpush1.bf16.msra.mxu1 %v4734_v45  ;;  %v4790_v45 = vcombine.low %v3701_v29, %v3705_v30 }
 0x1f4   : > { %3355 = vmatprep.subr.bf16.mxu1 %v4729_v43  ;;  %v4792_v43 = vcombine.low %v3702_v21, %v3706_v55 }
 0x1f6   : > { %4740 = vmatmul.mubr.msk.bf16.vlgmr.msra.gmra.mrb[60].mxu1 %vm3228_vm2, %v3131_v42 }
 0x1f7   : > { %3356 = vmatpush1.bf16.msra.mxu1 %v4728_v13  ;;  %3387 = vmatprep.mubr.bf16.mxu1 %v5467_v52  ;;  %v3703_v13 = vld [vmem:[%s6918_s9 + $0x50] sm:$0xff] }
 0x1f8   : > { %3357 = vmatprep.subr.bf16.mxu1 %v4737_v0  ;;  %v3707_v0 = vld [vmem:[%s6918_s9 + $0x70] sm:$0xff] }
 0x1fb   : > { %3358 = vmatpush1.bf16.msra.mxu1 %v4736_v20 }
 0x1fc   : > { %3520 = vmatprep.subr.bf16.mxu1 %v4745_v12  ;;  %v4786_v12 = vcombine.low %v3695_v36, %v3699_v32 }
 0x1fe   : > { %4741 = vmatmul.mubr.msk.bf16.vlgmr.msra.gmra.mrb[64].mxu1 %vm3228_vm2, %v3131_v42 }
 0x1ff   : > { %3521 = vmatpush1.bf16.msra.mxu1 %v4744_v6  ;;  %3552 = vmatprep.mubr.bf16.mxu1 %v5467_v52  ;;  %v4795_v6 = vcombine.high %v3703_v13, %v3707_v0 }
 0x200   : > { %3522 = vmatprep.subr.bf16.mxu1 %v4753_v26  ;;  %v4797_v26 = vcombine.high %v3704_v3, %v3708_v63 }
 0x203   : > { %3523 = vmatpush1.bf16.msra.mxu1 %v4752_v58 }
 0x204   : > { %3602 = vmatprep.subr.bf16.mxu1 %v4749_v28  ;;  %v4794_v28 = vcombine.low %v3703_v13, %v3707_v0 }
 0x206   : > { %4759 = vmatmul.mubr.msk.bf16.vlgmr.msra.gmra.mrb[68].mxu1 %vm3228_vm2, %v6618_v4 }
 0x207   : > { %3603 = vmatpush1.bf16.msra.mxu1 %v4748_v46  ;;  %3634 = vmatprep.mubr.bf16.mxu1 %v5467_v52  ;;  %v6838_v46 = vshrl.u32 %v3645_v1, 7 }
 0x208   : > { %3604 = vmatprep.subr.bf16.mxu1 %v4757_v11 }
 0x209   : > { %v3647_v11 = vsub.s32 0, %v6838_v46  ;;  %v3651_v35 = vsub.s32 1, %v6838_v46  ;;  %v3671_v3 = vsub.s32 6, %v6838_v46 }
 0x20b   : > { %3605 = vmatpush1.bf16.msra.mxu1 %v4756_v23 }
 0x20c   : > { %3852 = vmatprep.subr.bf16.mxu1 %v4765_v50  ;;  %v3652_v50 = vrot.slane %v3643_v7, %v3651_v35 }
 0x20e   : > { %4761 = vmatmul.mubr.msk.bf16.vlgmr.msra.gmra.mrb[72].mxu1 %vm3228_vm2, %v6618_v4  ;;  %v3720_v4 = vld [vmem:[%s6919_s10 + $0x58] sm:$0xff] }
 0x20f   : > { %3853 = vmatpush1.bf16.msra.mxu1 %v4764_v5  ;;  %3884 = vmatprep.mubr.bf16.mxu1 %v5467_v52  ;;  %v4777_v51 = vcombine.high %v3720_v4, %v3724_v44  ;;  %v4776_v42 = vcombine.low %v3720_v4, %v3724_v44 }
 0x210   : > { %3854 = vmatprep.subr.bf16.mxu1 %v4773_v17 }
 0x213   : > { %3855 = vmatpush1.bf16.msra.mxu1 %v4772_v34 }
 0x214   : > { %3934 = vmatprep.subr.bf16.mxu1 %v4769_v56 }
 0x258   : > { %v3727_v57 = vpop.permute.xlu0 %3726 }
 0x259   : > { %4778 = vmatmul.mubr.msk.bf16.vlgmr.msra.gmra.mrb[68].mxu0 %vm3228_vm2, %v3727_v57  ;;  %4779 = vmatmul.mubr.msk.bf16.vlgmr.msra.gmra.mrb[76].mxu1 %vm3228_vm2, %v3727_v57 }
 0x25a   : > { %3894 = vmatpush1.bf16.msra.mxu0 %v4766_v41  ;;  %3935 = vmatpush1.bf16.msra.mxu1 %v4768_v25  ;;  %v4782_v41 = vcombine.low %v3693_v54, %v3697_v38  ;;  %v4784_v25 = vcombine.low %v3694_v53, %v3698_v49  ;;  %v3663_v54 = vsub.s32 4, %v6838_v46 }
 0x25b   : > { %3895 = vmatprep.subr.bf16.mxu0 %v4775_v62  ;;  %3936 = vmatprep.subr.bf16.mxu1 %v4777_v51 }
 0x25c   : > { %3925 = vmatprep.mubr.bf16.mxu0 %v5467_v52  ;;  %3966 = vmatprep.mubr.bf16.mxu1 %v5467_v52  ;;  %v3977_v15 = vpop.permute.xlu0 %3976  ;;  %v3664_v38 = vrot.slane %v3643_v7, %v3663_v54 }
 0x25e   : > { %3896 = vmatpush1.bf16.msra.mxu0 %v4774_v47  ;;  %3937 = vmatpush1.bf16.msra.mxu1 %v4776_v42  ;;  %v6800_v19 = vpop.f32.mrb[60].mxu0 }
 0x25f   : > { %v6802_v31 = vpop.f32.mrb[61].mxu0  ;;  %4061 = vmatprep.subr.bf16.mxu0 %v4783_v10  ;;  %4102 = vmatprep.subr.bf16.mxu1 %v4785_v33 }
 0x260   : > { %v3517_v39 = vpop.f32.mrb[62].mxu0 }
 0x261   : > { %v3518_v9 = vpop.f32.mrb[63].mxu0  ;;  %4780 = vmatmul.mubr.msk.bf16.vlgmr.msra.gmra.mrb[72].mxu0 %vm3228_vm2, %v3727_v57  ;;  %4781 = vmatmul.mubr.msk.bf16.vlgmr.msra.gmra.mrb[80].mxu1 %vm3228_vm2, %v3727_v57  ;;  %v3667_v57 = vsub.s32 5, %v6838_v46  ;;  %v3659_v39 = vsub.s32 3, %v6838_v46 }
 0x262   : > { %4062 = vmatpush1.bf16.msra.mxu0 %v4782_v41  ;;  %4103 = vmatpush1.bf16.msra.mxu1 %v4784_v25 }
 0x263   : > { %4063 = vmatprep.subr.bf16.mxu0 %v4791_v59  ;;  %4104 = vmatprep.subr.bf16.mxu1 %v4793_v60  ;;  %v3668_v49 = vrot.slane %v3643_v7, %v3667_v57  ;;  %v3655_v59 = vsub.s32 2, %v6838_v46  ;;  %v5469_v60 = vmov 1966171168   ;;  %v3660_v9 = vrot.slane %v3643_v7, %v3659_v39 }
 0x264   : > { %4093 = vmatprep.mubr.bf16.mxu0 %v5467_v52  ;;  %4134 = vmatprep.mubr.bf16.mxu1 %v5467_v52  ;;  %v4288_v36 = vunpack.c.l.s4 %v5469_v60 }
 0x265   : > { %v3656_v32 = vrot.slane %v3643_v7, %v3655_v59 }
 0x266   : > { %4064 = vmatpush1.bf16.msra.mxu0 %v4790_v45  ;;  %4105 = vmatpush1.bf16.msra.mxu1 %v4792_v43  ;;  %v3595_v20 = vpop.f32.mrb[64].mxu0  ;;  %v4289_v22 = vunpack.c.0.s8 %v4288_v36 }
 0x267   : > { %v3597_v61 = vpop.f32.mrb[65].mxu0  ;;  %4143 = vmatprep.subr.bf16.mxu0 %v4787_v16  ;;  %4184 = vmatprep.subr.bf16.mxu1 %v4789_v40 }
 0x268   : > { %v3599_v48 = vpop.f32.mrb[66].mxu0  ;;  %v6861_v63 = vsub.s32 %v4289_v22, %v6838_v46 }
 0x269   : > { %v3600_v58 = vpop.f32.mrb[67].mxu0  ;;  %4798 = vmatmul.mubr.msk.bf16.vlgmr.msra.gmra.mrb[76].mxu0 %vm3228_vm2, %v3977_v15  ;;  %4799 = vmatmul.mubr.msk.bf16.vlgmr.msra.gmra.mrb[84].mxu1 %vm3228_vm2, %v3977_v15 }
 0x26a   : > { %4144 = vmatpush1.bf16.msra.mxu0 %v4786_v12  ;;  %4185 = vmatpush1.bf16.msra.mxu1 %v4788_v24  ;;  %v3675_v12 = vsub.s32 7, %v6838_v46 }
 0x26b   : > { %4145 = vmatprep.subr.bf16.mxu0 %v4795_v6  ;;  %4186 = vmatprep.subr.bf16.mxu1 %v4797_v26 }
 0x26c   : > { %4175 = vmatprep.mubr.bf16.mxu0 %v5467_v52  ;;  %4216 = vmatprep.mubr.bf16.mxu1 %v5467_v52  ;;  %v3648_v52 = vrot.slane %v3643_v7, %v3647_v11  ;;  %v3676_v48 = vrot.slane %v3643_v7, %v3675_v12 }
 0x26e   : > { %4146 = vmatpush1.bf16.msra.mxu0 %v4794_v28  ;;  %4187 = vmatpush1.bf16.msra.mxu1 %v4796_v8 }
 0x271   : > { %4800 = vmatmul.mubr.msk.bf16.vlgmr.msra.gmra.mrb[80].mxu0 %vm3228_vm2, %v3977_v15  ;;  %4801 = vmatmul.mubr.msk.bf16.vlgmr.msra.gmra.mrb[88].mxu1 %vm3228_vm2, %v3977_v15 }
 0x2b9   : > { %v3266_v23 = vpop.f32.mrb[52].mxu1 }
 0x2ba   : > { %v3514_v18 = vadd.f32 %v6800_v19, %v3266_v23  ;;  %v3268_v14 = vpop.f32.mrb[53].mxu1 }
 0x2bb   : > { %v3516_v5 = vadd.f32 %v6802_v31, %v3268_v14  ;;  %v3270_v17 = vpop.f32.mrb[54].mxu1 }
 0x2bc   : > { %v3685_v34 = vadd.f32 %v3648_v52, %v3514_v18  ;;  %v3271_v56 = vpop.f32.mrb[55].mxu1 }
 0x2bd   : > { %v3686_v2 = vadd.f32 %v3652_v50, %v3516_v5 }
 0x2bf   : > { %v4283_v27 = vcombine.low %v3685_v34, %v3686_v2 }
 0x2c1   : > { %v3307_v4 = vpop.f32.mrb[56].mxu1  ;;  %v4293_v6 = vrot.slane %v4283_v27, %v6861_v63 }
 0x2c2   : > { %v3309_v44 = vpop.f32.mrb[57].mxu1 }
 0x2c3   : > { %v3311_v62 = vpop.f32.mrb[58].mxu1 }
 0x2c4   : > { %v3312_v51 = vpop.f32.mrb[59].mxu1 }
 0x2c9   : > { %v3348_v53 = vpop.f32.mrb[60].mxu1 }
 0x2ca   : > { %v3596_v47 = vadd.f32 %v3595_v20, %v3348_v53  ;;  %v3350_v42 = vpop.f32.mrb[61].mxu1 }
 0x2cb   : > { %v3598_v10 = vadd.f32 %v3597_v61, %v3350_v42  ;;  %v3352_v33 = vpop.f32.mrb[62].mxu1  ;;  %v3672_v61 = vrot.slane %v3643_v7, %v3671_v3 }
 0x2cc   : > { %v3689_v29 = vadd.f32 %v3664_v38, %v3596_v47  ;;  %v3353_v30 = vpop.f32.mrb[63].mxu1 }
 0x2cd   : > { %v3690_v21 = vadd.f32 %v3668_v49, %v3598_v10 }
 0x2cf   : > { %v4285_v55 = vcombine.low %v3689_v29, %v3690_v21 }
 0x2d1   : > { %v3389_v19 = vpop.f32.mrb[64].mxu1  ;;  %v4307_v5 = vrot.slane %v4285_v55, %v6861_v63 }
 0x2d2   : > { %v3391_v41 = vpop.f32.mrb[65].mxu1 }
 0x2d3   : > { %v3393_v25 = vpop.f32.mrb[66].mxu1 }
 0x2d4   : > { %v3394_v31 = vpop.f32.mrb[67].mxu1 }
 0x2d9   : > { %v3554_v37 = vpop.f32.mrb[68].mxu1 }
 0x2da   : > { %v3555_v45 = vadd.f32 %v3554_v37, %v3307_v4  ;;  %v3556_v43 = vpop.f32.mrb[69].mxu1 }
 0x2db   : > { %v3557_v16 = vadd.f32 %v3556_v43, %v3309_v44  ;;  %v3558_v40 = vpop.f32.mrb[70].mxu1 }
 0x2dc   : > { %v3687_v13 = vadd.f32 %v3656_v32, %v3555_v45  ;;  %v3559_v0 = vpop.f32.mrb[71].mxu1 }
 0x2dd   : > { %v3688_v20 = vadd.f32 %v3660_v9, %v3557_v16 }
 0x2df   : > { %v4284_v24 = vcombine.low %v3687_v13, %v3688_v20 }
 0x2e1   : > { %v4300_v26 = vrot.slane %v4284_v24, %v6861_v63  ;;  %v3636_v15 = vpop.f32.mrb[72].mxu1 }
 0x2e2   : > { %v3637_v58 = vadd.f32 %v3636_v15, %v3389_v19  ;;  %v3638_v28 = vpop.f32.mrb[73].mxu1  ;;  %v4225_v19 = vld [vmem:[%s6920_s11] sm:$0xff] }
 0x2e3   : > { %v4315_v8 = vcombine.low %v4293_v6, %v4300_v26  ;;  %v3639_v1 = vadd.f32 %v3638_v28, %v3391_v41  ;;  %v3640_v52 = vpop.f32.mrb[74].mxu1  ;;  %v4230_v41 = vrot.slane %v4225_v19, %v3647_v11  ;;  %v4238_v25 = vrot.slane %v4225_v19, %v3655_v59 }
 0x2e4   : > { %v3691_v23 = vadd.f32 %v3672_v61, %v3637_v58  ;;  %v3641_v50 = vpop.f32.mrb[75].mxu1  ;;  %v4234_v36 = vrot.slane %v4225_v19, %v3651_v35  ;;  %v4242_v32 = vrot.slane %v4225_v19, %v3659_v39  ;;  %v4246_v35 = vrot.slane %v4225_v19, %v3663_v54 }
 0x2e5   : > { %v3692_v18 = vadd.f32 %v3676_v48, %v3639_v1  ;;  %v4323_v56 = vrot.slane %v4315_v8, %v6861_v63  ;;  %v4254_v39 = vrot.slane %v4225_v19, %v3671_v3  ;;  %v4250_v8 = vrot.slane %v4225_v19, %v3667_v57 }
 0x2e6   : > { %v4258_v1 = vrot.slane %v4225_v19, %v3675_v12 }
 0x2e7   : > { %v4286_v14 = vcombine.low %v3691_v23, %v3692_v18 }
 0x2e9   : > { %v4314_v17 = vrot.slane %v4286_v14, %v6861_v63 }
 0x2eb   : > { %v4316_v34 = vcombine.low %v4307_v5, %v4314_v17 }
 0x2ed   : > { %v4330_v7 = vrot.slane %v4316_v34, %v6861_v63 }
 0x2ef   : > { %v4331_v2 = vcombine.low %v4323_v56, %v4330_v7 }
 0x2f1   : > { %4333 = vst [vmem:[%s504_s18] sm:$0xff] %v4331_v2 }
 0x32c   : > { %v3845_v27 = vpop.f32.mrb[68].mxu0  ;;  %v3886_v4 = vpop.f32.mrb[76].mxu1 }
 0x32d   : > { %v3847_v44 = vpop.f32.mrb[69].mxu0  ;;  %v3888_v62 = vpop.f32.mrb[77].mxu1 }
 0x32e   : > { %v3849_v51 = vpop.f32.mrb[70].mxu0  ;;  %v3890_v38 = vpop.f32.mrb[78].mxu1 }
 0x32f   : > { %v3850_v53 = vpop.f32.mrb[71].mxu0  ;;  %v3891_v49 = vpop.f32.mrb[79].mxu1 }
 0x334   : > { %v3927_v47 = vpop.f32.mrb[72].mxu0  ;;  %v3968_v42 = vpop.f32.mrb[80].mxu1 }
 0x335   : > { %v3929_v10 = vpop.f32.mrb[73].mxu0  ;;  %v3970_v33 = vpop.f32.mrb[81].mxu1 }
 0x336   : > { %v3931_v29 = vpop.f32.mrb[74].mxu0  ;;  %v3972_v30 = vpop.f32.mrb[82].mxu1 }
 0x337   : > { %v3932_v21 = vpop.f32.mrb[75].mxu0  ;;  %v3973_v55 = vpop.f32.mrb[83].mxu1 }
 0x33c   : > { %v4095_v31 = vpop.f32.mrb[76].mxu0  ;;  %v4136_v60 = vpop.f32.mrb[84].mxu1 }
 0x33d   : > { %v4096_v22 = vadd.f32 %v4095_v31, %v3845_v27  ;;  %v4137_v37 = vadd.f32 %v4136_v60, %v3886_v4  ;;  %v4097_v9 = vpop.f32.mrb[77].mxu0  ;;  %v4138_v45 = vpop.f32.mrb[85].mxu1 }
 0x33e   : > { %v4098_v43 = vadd.f32 %v4097_v9, %v3847_v44  ;;  %v4139_v16 = vadd.f32 %v4138_v45, %v3888_v62  ;;  %v4099_v40 = vpop.f32.mrb[78].mxu0  ;;  %v4140_v13 = vpop.f32.mrb[86].mxu1 }
 0x33f   : > { %v4267_v0 = vadd.f32 %v4230_v41, %v4096_v22  ;;  %v4269_v20 = vadd.f32 %v4238_v25, %v4137_v37  ;;  %v4100_v24 = vpop.f32.mrb[79].mxu0  ;;  %v4141_v61 = vpop.f32.mrb[87].mxu1 }
 0x340   : > { %v4268_v11 = vadd.f32 %v4234_v36, %v4098_v43  ;;  %v4270_v59 = vadd.f32 %v4242_v32, %v4139_v16 }
 0x342   : > { %v4342_v6 = vcombine.low %v4267_v0, %v4268_v11  ;;  %v4343_v26 = vcombine.low %v4269_v20, %v4270_v59 }
 0x344   : > { %v4352_v15 = vrot.slane %v4342_v6, %v6861_v63  ;;  %v4359_v48 = vrot.slane %v4343_v26, %v6861_v63  ;;  %v4177_v58 = vpop.f32.mrb[80].mxu0  ;;  %v4218_v28 = vpop.f32.mrb[88].mxu1 }
 0x345   : > { %v4178_v52 = vadd.f32 %v4177_v58, %v3927_v47  ;;  %v4219_v23 = vadd.f32 %v4218_v28, %v3968_v42  ;;  %v4179_v50 = vpop.f32.mrb[81].mxu0  ;;  %v4220_v18 = vpop.f32.mrb[89].mxu1 }
 0x346   : > { %v4374_v54 = vcombine.low %v4352_v15, %v4359_v48  ;;  %v4180_v14 = vadd.f32 %v4179_v50, %v3929_v10  ;;  %v4221_v5 = vadd.f32 %v4220_v18, %v3970_v33  ;;  %v4181_v3 = vpop.f32.mrb[82].mxu0  ;;  %v4222_v17 = vpop.f32.mrb[90].mxu1 }
 0x347   : > { %v4271_v34 = vadd.f32 %v4246_v35, %v4178_v52  ;;  %v4273_v56 = vadd.f32 %v4254_v39, %v4219_v23  ;;  %v4182_v7 = vpop.f32.mrb[83].mxu0  ;;  %v4223_v2 = vpop.f32.mrb[91].mxu1 }
 0x348   : > { %v4272_v27 = vadd.f32 %v4250_v8, %v4180_v14  ;;  %v4274_v4 = vadd.f32 %v4258_v1, %v4221_v5  ;;  %v4382_v51 = vrot.slane %v4374_v54, %v6861_v63 }
 0x34a   : > { %v4344_v57 = vcombine.low %v4271_v34, %v4272_v27  ;;  %v4345_v44 = vcombine.low %v4273_v56, %v4274_v4 }
 0x34c   : > { %v4366_v46 = vrot.slane %v4344_v57, %v6861_v63  ;;  %v4373_v12 = vrot.slane %v4345_v44, %v6861_v63 }
 0x34e   : > { %v4375_v62 = vcombine.low %v4366_v46, %v4373_v12 }
 0x350   : > { %v4389_v38 = vrot.slane %v4375_v62, %v6861_v63 }
 0x352   : > { %v4390_v53 = vcombine.low %v4382_v51, %v4389_v38 }
 0x354   : > { %4392 = vst [vmem:[%s508_s25] sm:$0xff] %v4390_v53 }
 0x355 PF: > { %s25_s29 = sadd.s32 1, %s5463_s29  }
 0x356   : > { %p22_p4 = scmp.ge.s32.totalorder %s25_s29, 4  }
 0x358   :  { %24 = sbr.rel (!%p22_p4) target bundleno = 1 (0x1), region = 125 }

</bundles_post_ra>
